<compile_context>
chip_gen: v7x
topology: tpu7x:2x2x1
jax: 0.10.0
libtpu: 0.0.40
codegen_flags: <defaults>
</compile_context>

<pallas_src>
import functools

import jax
import jax.numpy as jnp
from jax import lax
from jax.experimental import pallas as pl
from jax.experimental.pallas import tpu as pltpu

LEAKY = 0.2


def _lrelu(v):
    return jnp.where(v >= 0, v, LEAKY * v)


def resblock_kernel(xp_ref, w1_ref, b1_ref, w2_ref, b2_ref, ws_ref, bs_ref,
                    mask_ref, pw_ref, o_ref, a1_ref, a2_ref, *,
                    H, W, Wp, Cin, Cmid, Cout, M, p0):
    P = a1_ref.shape[0]          # (H+2)*(W+2)
    p1 = p0 + M                  # end of the contiguous conv-output range
    H2 = H // 2

    # ---- stage 1: LeakyReLU applied ONCE (lrelu(0)=0 keeps the zero pad valid) ----
    a1_ref[...] = _lrelu(xp_ref[...])

    # ---- conv1: fused im2col dot, K = 9*Cin -------------------------------------
    taps = []
    for t in range(9):
        dy, dx = t // 3, t % 3
        start = p0 + (dy - 1) * Wp + (dx - 1)
        taps.append(a1_ref[start:start + M, :])
    patches1 = jnp.concatenate(taps, axis=-1).astype(jnp.bfloat16)     # (M, 9*Cin)
    h1 = jnp.dot(patches1, w1_ref[...],
                 preferred_element_type=jnp.float32) + b1_ref[...]     # (M, Cmid) f32

    # ---- stage conv2 input: lrelu once, kill pad columns, zero only the border ----
    a2_ref[0:p0, :] = jnp.zeros((p0, Cmid), jnp.float32)
    a2_ref[p1:P, :] = jnp.zeros((P - p1, Cmid), jnp.float32)
    a2_ref[p0:p1, :] = _lrelu(h1) * mask_ref[...]

    # ---- conv2: fused im2col dot, K = 9*Cmid ------------------------------------
    taps = []
    for t in range(9):
        dy, dx = t // 3, t % 3
        start = p0 + (dy - 1) * Wp + (dx - 1)
        taps.append(a2_ref[start:start + M, :])
    patches2 = jnp.concatenate(taps, axis=-1).astype(jnp.bfloat16)     # (M, 9*Cmid)
    h2 = jnp.dot(patches2, w2_ref[...],
                 preferred_element_type=jnp.float32) + b2_ref[...]     # (M, Cout) f32

    # ---- learned 1x1 shortcut on raw (un-activated) x ---------------------------
    xs = jnp.dot(xp_ref[p0:p1, :].astype(jnp.bfloat16), ws_ref[...],
                 preferred_element_type=jnp.float32) + bs_ref[...]     # (M, Cout)

    tot = h2 + xs                                                      # (M, Cout)

    # ---- 2x2 average pool: vertical pair-add (VPU) + width-pool matmul (0.25 folded)
    pieces = []
    for i in range(H2):
        r_a = tot[2 * i * Wp: 2 * i * Wp + W, :]                       # image row 2i
        r_b = tot[(2 * i + 1) * Wp: (2 * i + 1) * Wp + W, :]           # image row 2i+1
        pieces.append(r_a + r_b)                                       # (W, Cout)
    pairs = jnp.concatenate(pieces, axis=-1)                           # (W, H2*Cout)
    pooled = jnp.dot(pw_ref[...], pairs,
                     preferred_element_type=jnp.float32)               # (W2, H2*Cout)
    o_ref[...] = pooled.astype(o_ref.dtype)


def residual_block_d(x, w1, b1, w2, b2, ws, bs):
    """x: (N, Cin, H, W) NCHW.  Returns (N, Cout, H//2, W//2) NCHW."""
    N, Cin, H, W = x.shape
    Cmid = w1.shape[0]
    Cout = w2.shape[0]
    H2, W2 = H // 2, W // 2
    Hp, Wp = H + 2, W + 2
    P = Hp * Wp
    p0 = Wp + 1                        # first valid (h=1, w=1) flat position
    M = (H - 1) * Wp + W               # contiguous range covering all valid positions

    # ---- glue: channels-last flattened padded layout + true (de-kron'd) weights ----
    x_nhwc = jnp.transpose(x, (0, 2, 3, 1))
    xp = jnp.pad(x_nhwc, ((0, 0), (1, 1), (1, 1), (0, 0))).reshape(N, P, Cin)

    # torch (Cout_, Cin_, 3, 3) -> (9*Cin_, Cout_), row index = (dy*3+dx)*Cin_ + ci
    w1m = jnp.transpose(w1, (2, 3, 1, 0)).reshape(9 * Cin, Cmid).astype(jnp.bfloat16)
    w2m = jnp.transpose(w2, (2, 3, 1, 0)).reshape(9 * Cmid, Cout).astype(jnp.bfloat16)
    wsm = ws[:, :, 0, 0].T.astype(jnp.bfloat16)                        # (Cin, Cout)
    b1m = b1[None, :].astype(jnp.float32)                              # (1, Cmid)
    b2m = b2[None, :].astype(jnp.float32)                              # (1, Cout)
    bsm = bs[None, :].astype(jnp.float32)                              # (1, Cout)

    # validity mask over the contiguous range (kills the pad columns w in {0, Wp-1})
    r = jnp.arange(M)
    wcol = (r + p0) % Wp
    mask = ((wcol >= 1) & (wcol <= W)).astype(jnp.float32)[:, None]    # (M, 1)

    # width-pool matrix with the 0.25 average folded in: (W2, W)
    pw = 0.25 * ((jnp.arange(W)[None, :] // 2)
                 == jnp.arange(W2)[:, None]).astype(jnp.float32)

    kernel = functools.partial(resblock_kernel, H=H, W=W, Wp=Wp,
                               Cin=Cin, Cmid=Cmid, Cout=Cout, M=M, p0=p0)

    out2d = pl.pallas_call(
        kernel,
        out_shape=jax.ShapeDtypeStruct((N, W2, H2 * Cout), jnp.float32),
        grid_spec=pltpu.PrefetchScalarGridSpec(
            num_scalar_prefetch=0,
            grid=(N,),
            in_specs=[
                pl.BlockSpec((None, P, Cin), lambda b: (b, 0, 0)),      # xp (per image)
                pl.BlockSpec((9 * Cin, Cmid), lambda b: (0, 0)),        # w1m (resident)
                pl.BlockSpec((1, Cmid), lambda b: (0, 0)),              # b1
                pl.BlockSpec((9 * Cmid, Cout), lambda b: (0, 0)),       # w2m (resident)
                pl.BlockSpec((1, Cout), lambda b: (0, 0)),              # b2
                pl.BlockSpec((Cin, Cout), lambda b: (0, 0)),            # wsm
                pl.BlockSpec((1, Cout), lambda b: (0, 0)),              # bs
                pl.BlockSpec((M, 1), lambda b: (0, 0)),                 # pad-col mask
                pl.BlockSpec((W2, W), lambda b: (0, 0)),                # width-pool mat
            ],
            out_specs=pl.BlockSpec((None, W2, H2 * Cout), lambda b: (b, 0, 0)),
            scratch_shapes=[pltpu.VMEM((P, Cin), jnp.float32),          # lrelu(x)
                            pltpu.VMEM((P, Cmid), jnp.float32)],        # lrelu(conv1)
        ),
        compiler_params=pltpu.CompilerParams(
            dimension_semantics=("parallel",),
            vmem_limit_bytes=32 * 1024 * 1024),
    )(xp, w1m, b1m, w2m, b2m, wsm, bsm, mask, pw)

    # out2d[n, w2, h2*Cout + c] -> NCHW
    out = out2d.reshape(N, W2, H2, Cout)
    return jnp.transpose(out, (0, 3, 2, 1))


# ---------------- pure-JAX reference (PyTorch semantics) ----------------
def reference(x, w1, b1, w2, b2, ws, bs):
    lrelu = lambda v: jnp.where(v >= 0, v, LEAKY * v)

    def conv(inp, w, b, pad):
        y = lax.conv_general_dilated(inp, w, (1, 1), [(pad, pad), (pad, pad)],
                                     dimension_numbers=('NCHW', 'OIHW', 'NCHW'))
        return y + b[None, :, None, None]

    def pool(v):
        n, c, h, w = v.shape
        return v.reshape(n, c, h // 2, 2, w // 2, 2).mean(axis=(3, 5))

    dx = conv(lrelu(x), w1, b1, 1)
    dx = conv(lrelu(dx), w2, b2, 1)
    dx = pool(dx)
    xs = pool(conv(x, ws, bs, 0))        # shortcut: conv_s then AvgPool2d(2)
    return xs + dx


if __name__ == "__main__":
    N, Cin, Cout, H, W = 2, 4, 8, 16, 16
    Cmid = Cout

    key = jax.random.PRNGKey(0)
    ks = jax.random.split(key, 7)
    w1 = 0.1 * jax.random.normal(ks[0], (Cmid, Cin, 3, 3), jnp.float32)
    b1 = 0.1 * jax.random.normal(ks[1], (Cmid,), jnp.float32)
    w2 = 0.1 * jax.random.normal(ks[2], (Cout, Cmid, 3, 3), jnp.float32)
    b2 = 0.1 * jax.random.normal(ks[3], (Cout,), jnp.float32)
    ws = 0.1 * jax.random.normal(ks[4], (Cout, Cin, 1, 1), jnp.float32)
    bs = 0.1 * jax.random.normal(ks[5], (Cout,), jnp.float32)
    x = jax.random.normal(ks[6], (N, Cin, H, W), jnp.float32)

    out = residual_block_d(x, w1, b1, w2, b2, ws, bs)
    out = jax.block_until_ready(out)

    ref = reference(x, w1, b1, w2, b2, ws, bs)
    assert out.shape == (N, Cout, H // 2, W // 2), out.shape
    max_err = float(jnp.max(jnp.abs(out - ref)))
    # bf16 weights/patches with f32 accumulation -> slightly looser tolerance.
    if not bool(jnp.allclose(out, ref, atol=2e-2, rtol=2e-2)):
        raise AssertionError(f"Pallas kernel mismatch vs reference, max abs err={max_err}")
    print("KERNEL_OK")
</pallas_src>

<mosaic_0001>
module attributes {stable_mosaic.version = 11 : i64} {
  func.func @resblock_kernel(%arg0: i32, %arg1: memref<1x324x4xf32, #tpu.memory_space<vmem>>, %arg2: memref<36x8xbf16, #tpu.memory_space<vmem>>, %arg3: memref<1x8xf32, #tpu.memory_space<vmem>>, %arg4: memref<72x8xbf16, #tpu.memory_space<vmem>>, %arg5: memref<1x8xf32, #tpu.memory_space<vmem>>, %arg6: memref<4x8xbf16, #tpu.memory_space<vmem>>, %arg7: memref<1x8xf32, #tpu.memory_space<vmem>>, %arg8: memref<286x1xf32, #tpu.memory_space<vmem>>, %arg9: memref<8x16xf32, #tpu.memory_space<vmem>>, %arg10: memref<1x8x64xf32, #tpu.memory_space<vmem>>, %arg11: memref<324x4xf32, #tpu.memory_space<vmem>>, %arg12: memref<324x8xf32, #tpu.memory_space<vmem>>) attributes {dimension_semantics = [#tpu.dimension_semantics<parallel>], iteration_bounds = array<i64: 2>, scalar_prefetch = 0 : i64, scratch_operands = 2 : i64, tpu.core_type = #tpu.core_type<tc>, window_params = [{transform_indices = @transform_0, window_bounds = array<i64: 1, 324, 4>}, {pipeline_mode = #tpu.pipeline_mode<synchronous>, transform_indices = @transform_1, window_bounds = array<i64: 36, 8>}, {pipeline_mode = #tpu.pipeline_mode<synchronous>, transform_indices = @transform_2, window_bounds = array<i64: 1, 8>}, {pipeline_mode = #tpu.pipeline_mode<synchronous>, transform_indices = @transform_3, window_bounds = array<i64: 72, 8>}, {pipeline_mode = #tpu.pipeline_mode<synchronous>, transform_indices = @transform_4, window_bounds = array<i64: 1, 8>}, {pipeline_mode = #tpu.pipeline_mode<synchronous>, transform_indices = @transform_5, window_bounds = array<i64: 4, 8>}, {pipeline_mode = #tpu.pipeline_mode<synchronous>, transform_indices = @transform_6, window_bounds = array<i64: 1, 8>}, {pipeline_mode = #tpu.pipeline_mode<synchronous>, transform_indices = @transform_7, window_bounds = array<i64: 286, 1>}, {pipeline_mode = #tpu.pipeline_mode<synchronous>, transform_indices = @transform_8, window_bounds = array<i64: 8, 16>}, {transform_indices = @transform_9, window_bounds = array<i64: 1, 8, 64>}]} {
    %c0 = arith.constant 0 : index
    %c0_0 = arith.constant 0 : index
    %c0_1 = arith.constant 0 : index
    %0 = vector.load %arg1[%c0, %c0_0, %c0_1] : memref<1x324x4xf32, #tpu.memory_space<vmem>>, vector<1x324x4xf32>
    %1 = vector.shape_cast %0 : vector<1x324x4xf32> to vector<324x4xf32>
    %cst = arith.constant 0.000000e+00 : f32
    %2 = vector.broadcast %cst : f32 to vector<324x4xf32>
    %3 = arith.cmpf oge, %1, %2 : vector<324x4xf32>
    %cst_2 = arith.constant 2.000000e-01 : f32
    %4 = vector.broadcast %cst_2 : f32 to vector<324x4xf32>
    %5 = arith.mulf %4, %1 : vector<324x4xf32>
    %6 = arith.select %3, %1, %5 : vector<324x4xi1>, vector<324x4xf32>
    %c0_3 = arith.constant 0 : index
    %c0_4 = arith.constant 0 : index
    %7 = vector.load %arg11[%c0_3, %c0_4] : memref<324x4xf32, #tpu.memory_space<vmem>>, vector<324x4xf32>
    tpu.vector_store %arg11[%c0_3, %c0_4], %6 {strides = array<i32>} : memref<324x4xf32, #tpu.memory_space<vmem>>, vector<324x4xf32>,
    %c0_5 = arith.constant 0 : index
    %c0_6 = arith.constant 0 : index
    %8 = vector.load %arg11[%c0_5, %c0_6] : memref<324x4xf32, #tpu.memory_space<vmem>>, vector<286x4xf32>
    %c1 = arith.constant 1 : index
    %c0_7 = arith.constant 0 : index
    %9 = vector.load %arg11[%c1, %c0_7] : memref<324x4xf32, #tpu.memory_space<vmem>>, vector<286x4xf32>
    %c2 = arith.constant 2 : index
    %c0_8 = arith.constant 0 : index
    %10 = vector.load %arg11[%c2, %c0_8] : memref<324x4xf32, #tpu.memory_space<vmem>>, vector<286x4xf32>
    %c18 = arith.constant 18 : index
    %c0_9 = arith.constant 0 : index
    %11 = vector.load %arg11[%c18, %c0_9] : memref<324x4xf32, #tpu.memory_space<vmem>>, vector<286x4xf32>
    %c19 = arith.constant 19 : index
    %c0_10 = arith.constant 0 : index
    %12 = vector.load %arg11[%c19, %c0_10] : memref<324x4xf32, #tpu.memory_space<vmem>>, vector<286x4xf32>
    %c20 = arith.constant 20 : index
    %c0_11 = arith.constant 0 : index
    %13 = vector.load %arg11[%c20, %c0_11] : memref<324x4xf32, #tpu.memory_space<vmem>>, vector<286x4xf32>
    %c36 = arith.constant 36 : index
    %c0_12 = arith.constant 0 : index
    %14 = vector.load %arg11[%c36, %c0_12] : memref<324x4xf32, #tpu.memory_space<vmem>>, vector<286x4xf32>
    %c37 = arith.constant 37 : index
    %c0_13 = arith.constant 0 : index
    %15 = vector.load %arg11[%c37, %c0_13] : memref<324x4xf32, #tpu.memory_space<vmem>>, vector<286x4xf32>
    %c38 = arith.constant 38 : index
    %c0_14 = arith.constant 0 : index
    %16 = vector.load %arg11[%c38, %c0_14] : memref<324x4xf32, #tpu.memory_space<vmem>>, vector<286x4xf32>
    %17 = tpu.concatenate %8, %9, %10, %11, %12, %13, %14, %15, %16 in 1 : vector<286x4xf32>, vector<286x4xf32>, vector<286x4xf32>, vector<286x4xf32>, vector<286x4xf32>, vector<286x4xf32>, vector<286x4xf32>, vector<286x4xf32>, vector<286x4xf32> -> vector<286x36xf32>
    %18 = arith.truncf %17 : vector<286x36xf32> to vector<286x36xbf16>
    %c0_15 = arith.constant 0 : index
    %c0_16 = arith.constant 0 : index
    %19 = vector.load %arg2[%c0_15, %c0_16] : memref<36x8xbf16, #tpu.memory_space<vmem>>, vector<36x8xbf16>
    %cst_17 = arith.constant dense<0.000000e+00> : vector<286x8xf32>
    %20 = tpu.matmul %18, %19, %cst_17 {dimension_numbers = #tpu.dot_dimension_numbers<[1], [0], [0], [1], [0, 0, 1, 1], [], []>} : vector<286x36xbf16>, vector<36x8xbf16>, vector<286x8xf32> -> vector<286x8xf32>
    %c0_18 = arith.constant 0 : index
    %c0_19 = arith.constant 0 : index
    %21 = vector.load %arg3[%c0_18, %c0_19] : memref<1x8xf32, #tpu.memory_space<vmem>>, vector<1x8xf32>
    %22 = vector.broadcast %21 : vector<1x8xf32> to vector<286x8xf32>
    %23 = arith.addf %20, %22 : vector<286x8xf32>
    %cst_20 = arith.constant 0.000000e+00 : f32
    %24 = vector.broadcast %cst_20 : f32 to vector<19x8xf32>
    %c0_21 = arith.constant 0 : index
    %c0_22 = arith.constant 0 : index
    %25 = vector.load %arg12[%c0_21, %c0_22] : memref<324x8xf32, #tpu.memory_space<vmem>>, vector<19x8xf32>
    tpu.vector_store %arg12[%c0_21, %c0_22], %24 {strides = array<i32>} : memref<324x8xf32, #tpu.memory_space<vmem>>, vector<19x8xf32>,
    %cst_23 = arith.constant 0.000000e+00 : f32
    %26 = vector.broadcast %cst_23 : f32 to vector<19x8xf32>
    %c305 = arith.constant 305 : index
    %c0_24 = arith.constant 0 : index
    %27 = vector.load %arg12[%c305, %c0_24] : memref<324x8xf32, #tpu.memory_space<vmem>>, vector<19x8xf32>
    tpu.vector_store %arg12[%c305, %c0_24], %26 {strides = array<i32>} : memref<324x8xf32, #tpu.memory_space<vmem>>, vector<19x8xf32>,
    %cst_25 = arith.constant 0.000000e+00 : f32
    %28 = vector.broadcast %cst_25 : f32 to vector<286x8xf32>
    %29 = arith.cmpf oge, %23, %28 : vector<286x8xf32>
    %cst_26 = arith.constant 2.000000e-01 : f32
    %30 = vector.broadcast %cst_26 : f32 to vector<286x8xf32>
    %31 = arith.mulf %30, %23 : vector<286x8xf32>
    %32 = arith.select %29, %23, %31 : vector<286x8xi1>, vector<286x8xf32>
    %c0_27 = arith.constant 0 : index
    %c0_28 = arith.constant 0 : index
    %33 = vector.load %arg8[%c0_27, %c0_28] : memref<286x1xf32, #tpu.memory_space<vmem>>, vector<286x1xf32>
    %34 = vector.broadcast %33 : vector<286x1xf32> to vector<286x8xf32>
    %35 = arith.mulf %32, %34 : vector<286x8xf32>
    %c19_29 = arith.constant 19 : index
    %c0_30 = arith.constant 0 : index
    %36 = vector.load %arg12[%c19_29, %c0_30] : memref<324x8xf32, #tpu.memory_space<vmem>>, vector<286x8xf32>
    tpu.vector_store %arg12[%c19_29, %c0_30], %35 {strides = array<i32>} : memref<324x8xf32, #tpu.memory_space<vmem>>, vector<286x8xf32>,
    %c0_31 = arith.constant 0 : index
    %c0_32 = arith.constant 0 : index
    %37 = vector.load %arg12[%c0_31, %c0_32] : memref<324x8xf32, #tpu.memory_space<vmem>>, vector<286x8xf32>
    %c1_33 = arith.constant 1 : index
    %c0_34 = arith.constant 0 : index
    %38 = vector.load %arg12[%c1_33, %c0_34] : memref<324x8xf32, #tpu.memory_space<vmem>>, vector<286x8xf32>
    %c2_35 = arith.constant 2 : index
    %c0_36 = arith.constant 0 : index
    %39 = vector.load %arg12[%c2_35, %c0_36] : memref<324x8xf32, #tpu.memory_space<vmem>>, vector<286x8xf32>
    %c18_37 = arith.constant 18 : index
    %c0_38 = arith.constant 0 : index
    %40 = vector.load %arg12[%c18_37, %c0_38] : memref<324x8xf32, #tpu.memory_space<vmem>>, vector<286x8xf32>
    %c19_39 = arith.constant 19 : index
    %c0_40 = arith.constant 0 : index
    %41 = vector.load %arg12[%c19_39, %c0_40] : memref<324x8xf32, #tpu.memory_space<vmem>>, vector<286x8xf32>
    %c20_41 = arith.constant 20 : index
    %c0_42 = arith.constant 0 : index
    %42 = vector.load %arg12[%c20_41, %c0_42] : memref<324x8xf32, #tpu.memory_space<vmem>>, vector<286x8xf32>
    %c36_43 = arith.constant 36 : index
    %c0_44 = arith.constant 0 : index
    %43 = vector.load %arg12[%c36_43, %c0_44] : memref<324x8xf32, #tpu.memory_space<vmem>>, vector<286x8xf32>
    %c37_45 = arith.constant 37 : index
    %c0_46 = arith.constant 0 : index
    %44 = vector.load %arg12[%c37_45, %c0_46] : memref<324x8xf32, #tpu.memory_space<vmem>>, vector<286x8xf32>
    %c38_47 = arith.constant 38 : index
    %c0_48 = arith.constant 0 : index
    %45 = vector.load %arg12[%c38_47, %c0_48] : memref<324x8xf32, #tpu.memory_space<vmem>>, vector<286x8xf32>
    %46 = tpu.concatenate %37, %38, %39, %40, %41, %42, %43, %44, %45 in 1 : vector<286x8xf32>, vector<286x8xf32>, vector<286x8xf32>, vector<286x8xf32>, vector<286x8xf32>, vector<286x8xf32>, vector<286x8xf32>, vector<286x8xf32>, vector<286x8xf32> -> vector<286x72xf32>
    %47 = arith.truncf %46 : vector<286x72xf32> to vector<286x72xbf16>
    %c0_49 = arith.constant 0 : index
    %c0_50 = arith.constant 0 : index
    %48 = vector.load %arg4[%c0_49, %c0_50] : memref<72x8xbf16, #tpu.memory_space<vmem>>, vector<72x8xbf16>
    %cst_51 = arith.constant dense<0.000000e+00> : vector<286x8xf32>
    %49 = tpu.matmul %47, %48, %cst_51 {dimension_numbers = #tpu.dot_dimension_numbers<[1], [0], [0], [1], [0, 0, 1, 1], [], []>} : vector<286x72xbf16>, vector<72x8xbf16>, vector<286x8xf32> -> vector<286x8xf32>
    %c0_52 = arith.constant 0 : index
    %c0_53 = arith.constant 0 : index
    %50 = vector.load %arg5[%c0_52, %c0_53] : memref<1x8xf32, #tpu.memory_space<vmem>>, vector<1x8xf32>
    %51 = vector.broadcast %50 : vector<1x8xf32> to vector<286x8xf32>
    %52 = arith.addf %49, %51 : vector<286x8xf32>
    %c0_54 = arith.constant 0 : index
    %c19_55 = arith.constant 19 : index
    %c0_56 = arith.constant 0 : index
    %53 = vector.load %arg1[%c0_54, %c19_55, %c0_56] : memref<1x324x4xf32, #tpu.memory_space<vmem>>, vector<1x286x4xf32>
    %54 = vector.shape_cast %53 : vector<1x286x4xf32> to vector<286x4xf32>
    %55 = arith.truncf %54 : vector<286x4xf32> to vector<286x4xbf16>
    %c0_57 = arith.constant 0 : index
    %c0_58 = arith.constant 0 : index
    %56 = vector.load %arg6[%c0_57, %c0_58] : memref<4x8xbf16, #tpu.memory_space<vmem>>, vector<4x8xbf16>
    %cst_59 = arith.constant dense<0.000000e+00> : vector<286x8xf32>
    %57 = tpu.matmul %55, %56, %cst_59 {dimension_numbers = #tpu.dot_dimension_numbers<[1], [0], [0], [1], [0, 0, 1, 1], [], []>} : vector<286x4xbf16>, vector<4x8xbf16>, vector<286x8xf32> -> vector<286x8xf32>
    %c0_60 = arith.constant 0 : index
    %c0_61 = arith.constant 0 : index
    %58 = vector.load %arg7[%c0_60, %c0_61] : memref<1x8xf32, #tpu.memory_space<vmem>>, vector<1x8xf32>
    %59 = vector.broadcast %58 : vector<1x8xf32> to vector<286x8xf32>
    %60 = arith.addf %57, %59 : vector<286x8xf32>
    %61 = arith.addf %52, %60 : vector<286x8xf32>
    %62 = vector.extract_strided_slice %61 {offsets = [0, 0], sizes = [16, 8], strides = [1, 1]} : vector<286x8xf32> to vector<16x8xf32>
    %63 = vector.extract_strided_slice %61 {offsets = [18, 0], sizes = [16, 8], strides = [1, 1]} : vector<286x8xf32> to vector<16x8xf32>
    %64 = arith.addf %62, %63 : vector<16x8xf32>
    %65 = vector.extract_strided_slice %61 {offsets = [36, 0], sizes = [16, 8], strides = [1, 1]} : vector<286x8xf32> to vector<16x8xf32>
    %66 = vector.extract_strided_slice %61 {offsets = [54, 0], sizes = [16, 8], strides = [1, 1]} : vector<286x8xf32> to vector<16x8xf32>
    %67 = arith.addf %65, %66 : vector<16x8xf32>
    %68 = vector.extract_strided_slice %61 {offsets = [72, 0], sizes = [16, 8], strides = [1, 1]} : vector<286x8xf32> to vector<16x8xf32>
    %69 = vector.extract_strided_slice %61 {offsets = [90, 0], sizes = [16, 8], strides = [1, 1]} : vector<286x8xf32> to vector<16x8xf32>
    %70 = arith.addf %68, %69 : vector<16x8xf32>
    %71 = vector.extract_strided_slice %61 {offsets = [108, 0], sizes = [16, 8], strides = [1, 1]} : vector<286x8xf32> to vector<16x8xf32>
    %72 = vector.extract_strided_slice %61 {offsets = [126, 0], sizes = [16, 8], strides = [1, 1]} : vector<286x8xf32> to vector<16x8xf32>
    %73 = arith.addf %71, %72 : vector<16x8xf32>
    %74 = vector.extract_strided_slice %61 {offsets = [144, 0], sizes = [16, 8], strides = [1, 1]} : vector<286x8xf32> to vector<16x8xf32>
    %75 = vector.extract_strided_slice %61 {offsets = [162, 0], sizes = [16, 8], strides = [1, 1]} : vector<286x8xf32> to vector<16x8xf32>
    %76 = arith.addf %74, %75 : vector<16x8xf32>
    %77 = vector.extract_strided_slice %61 {offsets = [180, 0], sizes = [16, 8], strides = [1, 1]} : vector<286x8xf32> to vector<16x8xf32>
    %78 = vector.extract_strided_slice %61 {offsets = [198, 0], sizes = [16, 8], strides = [1, 1]} : vector<286x8xf32> to vector<16x8xf32>
    %79 = arith.addf %77, %78 : vector<16x8xf32>
    %80 = vector.extract_strided_slice %61 {offsets = [216, 0], sizes = [16, 8], strides = [1, 1]} : vector<286x8xf32> to vector<16x8xf32>
    %81 = vector.extract_strided_slice %61 {offsets = [234, 0], sizes = [16, 8], strides = [1, 1]} : vector<286x8xf32> to vector<16x8xf32>
    %82 = arith.addf %80, %81 : vector<16x8xf32>
    %83 = vector.extract_strided_slice %61 {offsets = [252, 0], sizes = [16, 8], strides = [1, 1]} : vector<286x8xf32> to vector<16x8xf32>
    %84 = vector.extract_strided_slice %61 {offsets = [270, 0], sizes = [16, 8], strides = [1, 1]} : vector<286x8xf32> to vector<16x8xf32>
    %85 = arith.addf %83, %84 : vector<16x8xf32>
    %86 = tpu.concatenate %64, %67, %70, %73, %76, %79, %82, %85 in 1 : vector<16x8xf32>, vector<16x8xf32>, vector<16x8xf32>, vector<16x8xf32>, vector<16x8xf32>, vector<16x8xf32>, vector<16x8xf32>, vector<16x8xf32> -> vector<16x64xf32>
    %c0_62 = arith.constant 0 : index
    %c0_63 = arith.constant 0 : index
    %87 = vector.load %arg9[%c0_62, %c0_63] : memref<8x16xf32, #tpu.memory_space<vmem>>, vector<8x16xf32>
    %cst_64 = arith.constant dense<0.000000e+00> : vector<8x64xf32>
    %88 = tpu.matmul %87, %86, %cst_64 {dimension_numbers = #tpu.dot_dimension_numbers<[1], [0], [0], [1], [0, 0, 1, 1], [], []>} : vector<8x16xf32>, vector<16x64xf32>, vector<8x64xf32> -> vector<8x64xf32>
    %c0_65 = arith.constant 0 : index
    %c0_66 = arith.constant 0 : index
    %c0_67 = arith.constant 0 : index
    %89 = vector.load %arg10[%c0_65, %c0_66, %c0_67] : memref<1x8x64xf32, #tpu.memory_space<vmem>>, vector<1x8x64xf32>
    %90 = vector.shape_cast %89 : vector<1x8x64xf32> to vector<8x64xf32>
    %91 = vector.shape_cast %88 : vector<8x64xf32> to vector<1x8x64xf32>
    tpu.vector_store %arg10[%c0_65, %c0_66, %c0_67], %91 {strides = array<i32>} : memref<1x8x64xf32, #tpu.memory_space<vmem>>, vector<1x8x64xf32>,
    return
  }
  func.func @transform_0(%arg0: i32) -> (i32, i32, i32) {
    %c0_i32 = arith.constant 0 : i32
    %c0_i32_0 = arith.constant 0 : i32
    %c0_i32_1 = arith.constant 0 : i32
    return %arg0, %c0_i32, %c0_i32_0 : i32, i32, i32
  }
  func.func @transform_1(%arg0: i32) -> (i32, i32) {
    %c0_i32 = arith.constant 0 : i32
    %c0_i32_0 = arith.constant 0 : i32
    %c0_i32_1 = arith.constant 0 : i32
    return %c0_i32, %c0_i32_0 : i32, i32
  }
  func.func @transform_2(%arg0: i32) -> (i32, i32) {
    %c0_i32 = arith.constant 0 : i32
    %c0_i32_0 = arith.constant 0 : i32
    %c0_i32_1 = arith.constant 0 : i32
    return %c0_i32, %c0_i32_0 : i32, i32
  }
  func.func @transform_3(%arg0: i32) -> (i32, i32) {
    %c0_i32 = arith.constant 0 : i32
    %c0_i32_0 = arith.constant 0 : i32
    %c0_i32_1 = arith.constant 0 : i32
    return %c0_i32, %c0_i32_0 : i32, i32
  }
  func.func @transform_4(%arg0: i32) -> (i32, i32) {
    %c0_i32 = arith.constant 0 : i32
    %c0_i32_0 = arith.constant 0 : i32
    %c0_i32_1 = arith.constant 0 : i32
    return %c0_i32, %c0_i32_0 : i32, i32
  }
  func.func @transform_5(%arg0: i32) -> (i32, i32) {
    %c0_i32 = arith.constant 0 : i32
    %c0_i32_0 = arith.constant 0 : i32
    %c0_i32_1 = arith.constant 0 : i32
    return %c0_i32, %c0_i32_0 : i32, i32
  }
  func.func @transform_6(%arg0: i32) -> (i32, i32) {
    %c0_i32 = arith.constant 0 : i32
    %c0_i32_0 = arith.constant 0 : i32
    %c0_i32_1 = arith.constant 0 : i32
    return %c0_i32, %c0_i32_0 : i32, i32
  }
  func.func @transform_7(%arg0: i32) -> (i32, i32) {
    %c0_i32 = arith.constant 0 : i32
    %c0_i32_0 = arith.constant 0 : i32
    %c0_i32_1 = arith.constant 0 : i32
    return %c0_i32, %c0_i32_0 : i32, i32
  }
  func.func @transform_8(%arg0: i32) -> (i32, i32) {
    %c0_i32 = arith.constant 0 : i32
    %c0_i32_0 = arith.constant 0 : i32
    %c0_i32_1 = arith.constant 0 : i32
    return %c0_i32, %c0_i32_0 : i32, i32
  }
  func.func @transform_9(%arg0: i32) -> (i32, i32, i32) {
    %c0_i32 = arith.constant 0 : i32
    %c0_i32_0 = arith.constant 0 : i32
    %c0_i32_1 = arith.constant 0 : i32
    return %arg0, %c0_i32, %c0_i32_0 : i32, i32, i32
  }
}

</mosaic_0001>

<bundles_post_ra>
// kernel: tpu_custom_call.1
= control target key start
LH: loop header
LB: loop body
LE: loop exit
PB: predicated region body
PF: predicated region fallthrough
CT: control target
= control target key end

     0   :  { %14 = vsyncpa [#allocation5], 0  ;;  %s10266_s0 = inlined_call_operand.vmem [shape: f32[2,324,4], index: 0, kind: input, shape index: {}]   ;;  %s10267_s1 = inlined_call_operand.vmem [shape: bf16[36,8], index: 1, kind: input, shape index: {}]   ;;  %s10268_s2 = inlined_call_operand.vmem [shape: f32[1,8], index: 2, kind: input, shape index: {}]   ;;  %s10269_s3 = inlined_call_operand.vmem [shape: bf16[72,8], index: 3, kind: input, shape index: {}]   ;;  %s10270_s4 = inlined_call_operand.vmem [shape: f32[1,8], index: 4, kind: input, shape index: {}]   ;;  %s10271_s5 = inlined_call_operand.vmem [shape: bf16[4,8], index: 5, kind: input, shape index: {}]   ;;  %s10272_s6 = inlined_call_operand.vmem [shape: f32[1,8], index: 6, kind: input, shape index: {}]   ;;  %s10273_s7 = inlined_call_operand.vmem [shape: f32[286,1], index: 7, kind: input, shape index: {}]   ;;  %s10274_s8 = inlined_call_operand.vmem [shape: f32[8,16], index: 8, kind: input, shape index: {}]   ;;  %s10275_s9 = inlined_call_operand.hbm [shape: f32[2,8,64], index: 9, kind: output, shape index: {}]  }
   0x1   :  { %16 = vsyncpa [#allocation5 + $0x1], 0  ;;  %s7548_s30 = smov 0   ;;  %s7550_s10 = smov 0  }
   0x2   :  { %s7552_s11 = smov 0   ;;  %s7554_s12 = smov 0  }
   0x3 LB: > { %s7569_s13 = sadd.s32 4294967295, %s7479_s12   ;;  %s5475_s14 = sadd.s32 4294967294, %s7479_s12   ;;  %s7479_s12 = sphi %s7554_s12, %s10437_s12   ;;  %s7475_s11 = sphi %s7552_s11, %s10436_s11   ;;  %s7471_s10 = sphi %s7550_s10, %s10435_s10   ;;  %s7467_s30 = sphi %s7548_s30, %s10434_s30  }
   0x4   : > { %s7573_s15 = sadd.s32 1, %s7479_s12   ;;  %s223_s16 = sadd.s32 1, %s7475_s11 }
   0x5   : > { %s220_s17 = ssub.s32 %s7479_s12, %s7573_s15  ;;  %p233_p0 = scmp.ne.s32.totalorder %s7475_s11, %s7471_s10 }
   0x6   : > { %p221_p1 = scmp.eq.s32.totalorder %s220_s17, 0  ;;  %p234_p2 = scmp.eq.s32.totalorder %s7569_s13, 1 }
   0x7   : > { %p239_p3 = scmp.ne.s32.totalorder %s7471_s10, %s7467_s30  ;;  %p240_p4 = scmp.eq.s32.totalorder %s5475_s14, 1 }
   0x8   : > { %s7584_s18 = scalar_select %p221_p1, %s7475_s11, %s223_s16  }
   0x9   : > { %p7586_p5 = por %p234_p2, %p233_p0  ;;  %p7590_p6 = por %p240_p4, %p239_p3 }
   0xa   : > { %p5478_p7 = scmp.ge.s32.totalorder %s7479_s12, 1  ;;  %p290_p8 = scmp.lt.s32.totalorder %s7479_s12, 3 }
   0xc   : > { %p291_p9 = pnand %p5478_p7, %p290_p8 }
   0xe   : > { %294 = sbr.rel (%p291_p9) target bundleno = 1625 (0x659), region = 56 }
  0x15   : > { %p326_p10 = scmp.lt.s32.totalorder %s7569_s13, 1  ;;  %vm496_vm0 = vcmask 31744   ;;  %s7481_s26 = smov 4  }
  0x16   : > { %s7482_s27 = smov 8   ;;  %s7483_s28 = smov 12  }
  0x17   : > { %s327_s21 = scalar_select %p326_p10, %s7569_s13, 1 }
  0x18   : > { %s7484_s29 = smov 16   ;;  %s7485_s14 = smov 20  }
  0x19   : > { %s5875_s22 = smul.u32 328, %s327_s21  ;;  %s7486_s23 = smov 24  }
  0x1a   : > { %s7488_s16 = smov 32   ;;  %s7491_s24 = smov 40  }
  0x1b   : > { %s7601_s25 = scalar_lea.vmem %s10266_s0, %s5875_s22  ;;  %s7493_s22 = smov 56  }
  0x1c   : > { %v336_v0 = vld [vmem:[%s7601_s25 + $0x20] sm:$0xff]  ;;  %v337_v1 = vld [vmem:[%s7601_s25 + $0x28] sm:$0xff]  ;;  %v338_v2 = vld [vmem:[%s7601_s25 + $0x30] sm:$0xff]  ;;  %s7494_s17 = smov 64  }
  0x1d   : > { %vm377_vm1 = vcmp.ge.f32.partialorder %v336_v0, 0.0  ;;  %vm378_vm2 = vcmp.ge.f32.partialorder %v337_v1, 0.0  ;;  %vm379_vm3 = vcmp.ge.f32.partialorder %v338_v2, 0.0  ;;  %v418_v3 = vmul.f32 0.2, %v336_v0  ;;  %v332_v4 = vld [vmem:[%s7601_s25] sm:$0xff] }
  0x1e   : > { %v419_v5 = vmul.f32 0.2, %v337_v1  ;;  %v420_v6 = vmul.f32 0.2, %v338_v2  ;;  %v333_v7 = vld [vmem:[%s7601_s25 + $0x8] sm:$0xff]  ;;  %v334_v8 = vld [vmem:[%s7601_s25 + $0x10] sm:$0xff] }
  0x1f   : > { %v459_v9 = vsel %vm377_vm1, %v336_v0, %v418_v3  ;;  %vm373_vm4 = vcmp.ge.f32.partialorder %v332_v4, 0.0  ;;  %vm374_vm5 = vcmp.ge.f32.partialorder %v333_v7, 0.0  ;;  %vm375_vm6 = vcmp.ge.f32.partialorder %v334_v8, 0.0  ;;  %v339_v10 = vld [vmem:[%s7601_s25 + $0x38] sm:$0xff]  ;;  %v340_v11 = vld [vmem:[%s7601_s25 + $0x40] sm:$0xff]  ;;  %v342_v17 = vld [vmem:[%s7601_s25 + $0x50] sm:$0xff] }
  0x20   : > { %v335_v12 = vld [vmem:[%s7601_s25 + $0x18] sm:$0xff]  ;;  %v460_v13 = vsel %vm378_vm2, %v337_v1, %v419_v5  ;;  %v461_v14 = vsel %vm379_vm3, %v338_v2, %v420_v6  ;;  %501 = vst.msk [vmem:[#allocation2 + $0x20] sm:$0xff] %vm496_vm0, %v459_v9  ;;  %v414_v15 = vmul.f32 0.2, %v332_v4  ;;  %v415_v16 = vmul.f32 0.2, %v333_v7 }
  0x21   : > { %v343_v18 = vld [vmem:[%s7601_s25 + $0x58] sm:$0xff]  ;;  %502 = vst.msk [vmem:[#allocation2 + $0x28] sm:$0xff] %vm496_vm0, %v460_v13  ;;  %503 = vst.msk [vmem:[#allocation2 + $0x30] sm:$0xff] %vm496_vm0, %v461_v14  ;;  %v416_v19 = vmul.f32 0.2, %v334_v8  ;;  %vm380_vm7 = vcmp.ge.f32.partialorder %v339_v10, 0.0 }
  0x22   : > { %vm381_vm8 = vcmp.ge.f32.partialorder %v340_v11, 0.0  ;;  %v421_v20 = vmul.f32 0.2, %v339_v10  ;;  %v455_v21 = vsel %vm373_vm4, %v332_v4, %v414_v15  ;;  %v456_v22 = vsel %vm374_vm5, %v333_v7, %v415_v16  ;;  %v344_v24 = vld [vmem:[%s7601_s25 + $0x60] sm:$0xff]  ;;  %v341_v25 = vld [vmem:[%s7601_s25 + $0x48] sm:$0xff]  ;;  %v346_v29 = vld [vmem:[%s7601_s25 + $0x70] sm:$0xff] }
  0x23   : > { %v422_v23 = vmul.f32 0.2, %v340_v11  ;;  %vm376_vm9 = vcmp.ge.f32.partialorder %v335_v12, 0.0  ;;  %v457_v26 = vsel %vm375_vm6, %v334_v8, %v416_v19  ;;  %497 = vst.msk [vmem:[#allocation2] sm:$0xff] %vm496_vm0, %v455_v21  ;;  %498 = vst.msk [vmem:[#allocation2 + $0x8] sm:$0xff] %vm496_vm0, %v456_v22  ;;  %vm383_vm10 = vcmp.ge.f32.partialorder %v342_v17, 0.0 }
  0x24   : > { %v462_v27 = vsel %vm380_vm7, %v339_v10, %v421_v20  ;;  %v417_v28 = vmul.f32 0.2, %v335_v12  ;;  %v347_v30 = vld [vmem:[%s7601_s25 + $0x78] sm:$0xff]  ;;  %499 = vst.msk [vmem:[#allocation2 + $0x10] sm:$0xff] %vm496_vm0, %v457_v26  ;;  %vm384_vm11 = vcmp.ge.f32.partialorder %v343_v18, 0.0  ;;  %vm385_vm12 = vcmp.ge.f32.partialorder %v344_v24, 0.0 }
  0x25   : > { %v463_v31 = vsel %vm381_vm8, %v340_v11, %v422_v23  ;;  %504 = vst.msk [vmem:[#allocation2 + $0x38] sm:$0xff] %vm496_vm0, %v462_v27  ;;  %v424_v32 = vmul.f32 0.2, %v342_v17  ;;  %v348_v33 = vld [vmem:[%s7601_s25 + $0x80] sm:$0xff]  ;;  %v425_v35 = vmul.f32 0.2, %v343_v18 }
  0x26   : > { %505 = vst.msk [vmem:[#allocation2 + $0x40] sm:$0xff] %vm496_vm0, %v463_v31  ;;  %v458_v34 = vsel %vm376_vm9, %v335_v12, %v417_v28  ;;  %v426_v36 = vmul.f32 0.2, %v344_v24  ;;  %vm382_vm13 = vcmp.ge.f32.partialorder %v341_v25, 0.0  ;;  %v423_v38 = vmul.f32 0.2, %v341_v25 }
  0x27   : > { %500 = vst.msk [vmem:[#allocation2 + $0x18] sm:$0xff] %vm496_vm0, %v458_v34  ;;  %v465_v37 = vsel %vm383_vm10, %v342_v17, %v424_v32  ;;  %vm387_vm14 = vcmp.ge.f32.partialorder %v346_v29, 0.0  ;;  %vm388_vm15 = vcmp.ge.f32.partialorder %v347_v30, 0.0  ;;  %v345_v39 = vld [vmem:[%s7601_s25 + $0x68] sm:$0xff]  ;;  %v350_v40 = vld [vmem:[%s7601_s25 + $0x90] sm:$0xff]  ;;  %v466_v41 = vsel %vm384_vm11, %v343_v18, %v425_v35  ;;  %v351_v44 = vld [vmem:[%s7601_s25 + $0x98] sm:$0xff] }
  0x28   : > { %v467_v42 = vsel %vm385_vm12, %v344_v24, %v426_v36  ;;  %507 = vst.msk [vmem:[#allocation2 + $0x50] sm:$0xff] %vm496_vm0, %v465_v37  ;;  %vm389_vm1 = vcmp.ge.f32.partialorder %v348_v33, 0.0  ;;  %v428_v43 = vmul.f32 0.2, %v346_v29  ;;  %v352_v45 = vld [vmem:[%s7601_s25 + $0xa0] sm:$0xff]  ;;  %v349_v46 = vld [vmem:[%s7601_s25 + $0x88] sm:$0xff]  ;;  %v464_v49 = vsel %vm382_vm13, %v341_v25, %v423_v38 }
  0x29   : > { %v579_v47 = vld [vmem:[#allocation2 + $0x21] sm:$0xff]  ;;  %v580_v48 = vld [vmem:[#allocation2 + $0x29] sm:$0xff]  ;;  %508 = vst.msk [vmem:[#allocation2 + $0x58] sm:$0xff] %vm496_vm0, %v466_v41  ;;  %509 = vst.msk [vmem:[#allocation2 + $0x60] sm:$0xff] %vm496_vm0, %v467_v42  ;;  %v429_v50 = vmul.f32 0.2, %v347_v30 }
  0x2a   : > { %v430_v51 = vmul.f32 0.2, %v348_v33  ;;  %v5941_v52 = vpack.i.bf16 %v580_v48, %v579_v47  ;;  %506 = vst.msk [vmem:[#allocation2 + $0x48] sm:$0xff] %vm496_vm0, %v464_v49  ;;  %v469_v53 = vsel %vm387_vm14, %v346_v29, %v428_v43  ;;  %vm386_vm2 = vcmp.ge.f32.partialorder %v345_v39, 0.0  ;;  %v354_v55 = vld [vmem:[%s7601_s25 + $0xb0] sm:$0xff]  ;;  %v575_v56 = vld [vmem:[#allocation2 + $0x1] sm:$0xff] }
  0x2b   : > { %v427_v54 = vmul.f32 0.2, %v345_v39  ;;  %v470_v57 = vsel %vm388_vm15, %v347_v30, %v429_v50  ;;  %511 = vst.msk [vmem:[#allocation2 + $0x70] sm:$0xff] %vm496_vm0, %v469_v53  ;;  %vm391_vm3 = vcmp.ge.f32.partialorder %v350_v40, 0.0  ;;  %vm392_vm4 = vcmp.ge.f32.partialorder %v351_v44, 0.0  ;;  %v355_v59 = vld [vmem:[%s7601_s25 + $0xb8] sm:$0xff] }
  0x2c   : > { %v471_v58 = vsel %vm389_vm1, %v348_v33, %v430_v51  ;;  %v356_v60 = vld [vmem:[%s7601_s25 + $0xc0] sm:$0xff]  ;;  %5942 = vrot.lane.b32.xlu1 %v5941_v52, %s7481_s26  ;;  %v576_v61 = vld [vmem:[#allocation2 + $0x9] sm:$0xff]  ;;  %v581_v62 = vld [vmem:[#allocation2 + $0x31] sm:$0xff]  ;;  %512 = vst.msk [vmem:[#allocation2 + $0x78] sm:$0xff] %vm496_vm0, %v470_v57  ;;  %vm393_vm5 = vcmp.ge.f32.partialorder %v352_v45, 0.0  ;;  %vm390_vm6 = vcmp.ge.f32.partialorder %v349_v46, 0.0 }
  0x2d   : > { %513 = vst.msk [vmem:[#allocation2 + $0x80] sm:$0xff] %vm496_vm0, %v471_v58  ;;  %v468_v63 = vsel %vm386_vm2, %v345_v39, %v427_v54  ;;  %v432_v0 = vmul.f32 0.2, %v350_v40  ;;  %v353_v1 = vld [vmem:[%s7601_s25 + $0xa8] sm:$0xff]  ;;  %v5931_v2 = vpack.i.bf16 %v576_v61, %v575_v56  ;;  %v582_v3 = vld [vmem:[#allocation2 + $0x39] sm:$0xff]  ;;  %vm395_vm7 = vcmp.ge.f32.partialorder %v354_v55, 0.0 }
  0x2e   : > { %510 = vst.msk [vmem:[#allocation2 + $0x68] sm:$0xff] %vm496_vm0, %v468_v63  ;;  %v433_v4 = vmul.f32 0.2, %v351_v44  ;;  %v434_v5 = vmul.f32 0.2, %v352_v45  ;;  %v5946_v6 = vpack.i.bf16 %v582_v3, %v581_v62  ;;  %v577_v7 = vld [vmem:[#allocation2 + $0x11] sm:$0xff] }
  0x2f   : > { %v578_v8 = vld [vmem:[#allocation2 + $0x19] sm:$0xff]  ;;  %v473_v9 = vsel %vm391_vm3, %v350_v40, %v432_v0  ;;  %v431_v10 = vmul.f32 0.2, %v349_v46  ;;  %vm396_vm8 = vcmp.ge.f32.partialorder %v355_v59, 0.0  ;;  %v358_v11 = vld [vmem:[%s7601_s25 + $0xd0] sm:$0xff]  ;;  %5932 = vrot.lane.b32.xlu0 %v5931_v2, %s7481_s26  ;;  %vm397_vm9 = vcmp.ge.f32.partialorder %v356_v60, 0.0 }
  0x30   : > { %v5936_v12 = vpack.i.bf16 %v578_v8, %v577_v7  ;;  %v474_v13 = vsel %vm392_vm4, %v351_v44, %v433_v4  ;;  %v475_v14 = vsel %vm393_vm5, %v352_v45, %v434_v5  ;;  %515 = vst.msk [vmem:[#allocation2 + $0x90] sm:$0xff] %vm496_vm0, %v473_v9  ;;  %v359_v15 = vld [vmem:[%s7601_s25 + $0xd8] sm:$0xff]  ;;  %v360_v16 = vld [vmem:[%s7601_s25 + $0xe0] sm:$0xff]  ;;  %5947 = vrot.lane.b32.xlu1 %v5946_v6, %s7481_s26  ;;  %v436_v20 = vmul.f32 0.2, %v354_v55  ;;  %v357_v22 = vld [vmem:[%s7601_s25 + $0xc8] sm:$0xff] }
  0x31   : > { %v585_v17 = vld [vmem:[#allocation2 + $0x51] sm:$0xff]  ;;  %v586_v18 = vld [vmem:[#allocation2 + $0x59] sm:$0xff]  ;;  %516 = vst.msk [vmem:[#allocation2 + $0x98] sm:$0xff] %vm496_vm0, %v474_v13  ;;  %517 = vst.msk [vmem:[#allocation2 + $0xa0] sm:$0xff] %vm496_vm0, %v475_v14  ;;  %v472_v19 = vsel %vm390_vm6, %v349_v46, %v431_v10  ;;  %v437_v21 = vmul.f32 0.2, %v355_v59 }
  0x32   : > { %v5956_v23 = vpack.i.bf16 %v586_v18, %v585_v17  ;;  %v583_v24 = vld [vmem:[#allocation2 + $0x41] sm:$0xff]  ;;  %v584_v25 = vld [vmem:[#allocation2 + $0x49] sm:$0xff]  ;;  %514 = vst.msk [vmem:[#allocation2 + $0x88] sm:$0xff] %vm496_vm0, %v472_v19  ;;  %v438_v26 = vmul.f32 0.2, %v356_v60  ;;  %vm394_vm10 = vcmp.ge.f32.partialorder %v353_v1, 0.0  ;;  %v477_v29 = vsel %vm395_vm7, %v354_v55, %v436_v20 }
  0x33   : > { %vm399_vm11 = vcmp.ge.f32.partialorder %v358_v11, 0.0  ;;  %v362_v27 = vld [vmem:[%s7601_s25 + $0xf0] sm:$0xff]  ;;  %v5951_v28 = vpack.i.bf16 %v584_v25, %v583_v24  ;;  %v478_v30 = vsel %vm396_vm8, %v355_v59, %v437_v21  ;;  %v435_v31 = vmul.f32 0.2, %v353_v1  ;;  %v363_v32 = vld [vmem:[%s7601_s25 + $0xf8] sm:$0xff]  ;;  %v364_v33 = vld [vmem:[%s7601_s25 + $0x100] sm:$0xff]  ;;  %5937 = vrot.lane.b32.xlu0 %v5936_v12, %s7481_s26 }
  0x34   : > { %v361_v34 = vld [vmem:[%s7601_s25 + $0xe8] sm:$0xff]  ;;  %v589_v35 = vld [vmem:[#allocation2 + $0x71] sm:$0xff]  ;;  %v590_v36 = vld [vmem:[#allocation2 + $0x79] sm:$0xff]  ;;  %v479_v37 = vsel %vm397_vm9, %v356_v60, %v438_v26  ;;  %519 = vst.msk [vmem:[#allocation2 + $0xb0] sm:$0xff] %vm496_vm0, %v477_v29  ;;  %vm400_vm12 = vcmp.ge.f32.partialorder %v359_v15, 0.0  ;;  %vm401_vm13 = vcmp.ge.f32.partialorder %v360_v16, 0.0  ;;  %5957 = vrot.lane.b32.xlu1 %v5956_v23, %s7481_s26 }
  0x35   : > { %520 = vst.msk [vmem:[#allocation2 + $0xb8] sm:$0xff] %vm496_vm0, %v478_v30  ;;  %v440_v38 = vmul.f32 0.2, %v358_v11  ;;  %v5966_v39 = vpack.i.bf16 %v590_v36, %v589_v35  ;;  %v587_v40 = vld [vmem:[#allocation2 + $0x61] sm:$0xff]  ;;  %v588_v41 = vld [vmem:[#allocation2 + $0x69] sm:$0xff]  ;;  %521 = vst.msk [vmem:[#allocation2 + $0xc0] sm:$0xff] %vm496_vm0, %v479_v37  ;;  %v476_v42 = vsel %vm394_vm10, %v353_v1, %v435_v31 }
  0x36   : > { %v441_v43 = vmul.f32 0.2, %v359_v15  ;;  %v442_v44 = vmul.f32 0.2, %v360_v16  ;;  %v5961_v45 = vpack.i.bf16 %v588_v41, %v587_v40  ;;  %518 = vst.msk [vmem:[#allocation2 + $0xa8] sm:$0xff] %vm496_vm0, %v476_v42  ;;  %vm398_vm14 = vcmp.ge.f32.partialorder %v357_v22, 0.0 }
  0x37   : > { %v481_v46 = vsel %vm399_vm11, %v358_v11, %v440_v38  ;;  %v439_v47 = vmul.f32 0.2, %v357_v22  ;;  %vm403_vm15 = vcmp.ge.f32.partialorder %v362_v27, 0.0  ;;  %vm404_vm1 = vcmp.ge.f32.partialorder %v363_v32, 0.0  ;;  %v366_v50 = vld [vmem:[%s7601_s25 + $0x110] sm:$0xff]  ;;  %v367_v51 = vld [vmem:[%s7601_s25 + $0x118] sm:$0xff]  ;;  %5952 = vrot.lane.b32.xlu0 %v5951_v28, %s7481_s26 }
  0x38   : > { %v482_v48 = vsel %vm400_vm12, %v359_v15, %v441_v43  ;;  %v483_v49 = vsel %vm401_vm13, %v360_v16, %v442_v44  ;;  %523 = vst.msk [vmem:[#allocation2 + $0xd0] sm:$0xff] %vm496_vm0, %v481_v46  ;;  %v365_v52 = vld [vmem:[%s7601_s25 + $0x108] sm:$0xff]  ;;  %v593_v53 = vld [vmem:[#allocation2 + $0x91] sm:$0xff]  ;;  %v594_v54 = vld [vmem:[#allocation2 + $0x99] sm:$0xff]  ;;  %vm405_vm2 = vcmp.ge.f32.partialorder %v364_v33, 0.0  ;;  %vm402_vm3 = vcmp.ge.f32.partialorder %v361_v34, 0.0  ;;  %5967 = vrot.lane.b32.xlu1 %v5966_v39, %s7481_s26 }
  0x39   : > { %524 = vst.msk [vmem:[#allocation2 + $0xd8] sm:$0xff] %vm496_vm0, %v482_v48  ;;  %525 = vst.msk [vmem:[#allocation2 + $0xe0] sm:$0xff] %vm496_vm0, %v483_v49  ;;  %v480_v55 = vsel %vm398_vm14, %v357_v22, %v439_v47  ;;  %v444_v56 = vmul.f32 0.2, %v362_v27  ;;  %v5976_v57 = vpack.i.bf16 %v594_v54, %v593_v53  ;;  %v591_v58 = vld [vmem:[#allocation2 + $0x81] sm:$0xff]  ;;  %v592_v59 = vld [vmem:[#allocation2 + $0x89] sm:$0xff] }
  0x3a   : > { %522 = vst.msk [vmem:[#allocation2 + $0xc8] sm:$0xff] %vm496_vm0, %v480_v55  ;;  %v445_v60 = vmul.f32 0.2, %v363_v32  ;;  %v446_v61 = vmul.f32 0.2, %v364_v33  ;;  %v5971_v62 = vpack.i.bf16 %v592_v59, %v591_v58  ;;  %vm407_vm4 = vcmp.ge.f32.partialorder %v366_v50, 0.0 }
  0x3b   : > { %v485_v63 = vsel %vm403_vm15, %v362_v27, %v444_v56  ;;  %v443_v0 = vmul.f32 0.2, %v361_v34  ;;  %vm408_vm5 = vcmp.ge.f32.partialorder %v367_v51, 0.0  ;;  %v448_v4 = vmul.f32 0.2, %v366_v50  ;;  %5962 = vrot.lane.b32.xlu0 %v5961_v45, %s7481_s26  ;;  %v614_v35 = vld [vmem:[#allocation2 + $0x1a] sm:$0xff] }
  0x3c   : > { %v597_v1 = vld [vmem:[#allocation2 + $0xb1] sm:$0xff]  ;;  %v486_v2 = vsel %vm404_vm1, %v363_v32, %v445_v60  ;;  %v487_v3 = vsel %vm405_vm2, %v364_v33, %v446_v61  ;;  %527 = vst.msk [vmem:[#allocation2 + $0xf0] sm:$0xff] %vm496_vm0, %v485_v63  ;;  %v598_v5 = vld [vmem:[#allocation2 + $0xb9] sm:$0xff]  ;;  %v449_v7 = vmul.f32 0.2, %v367_v51  ;;  %vm406_vm6 = vcmp.ge.f32.partialorder %v365_v52, 0.0  ;;  %5977 = vrot.lane.b32.xlu1 %v5976_v57, %s7481_s26 }
  0x3d   : > { %528 = vst.msk [vmem:[#allocation2 + $0xf8] sm:$0xff] %vm496_vm0, %v486_v2  ;;  %529 = vst.msk [vmem:[#allocation2 + $0x100] sm:$0xff] %vm496_vm0, %v487_v3  ;;  %v484_v6 = vsel %vm402_vm3, %v361_v34, %v443_v0  ;;  %v447_v8 = vmul.f32 0.2, %v365_v52  ;;  %v5986_v9 = vpack.i.bf16 %v598_v5, %v597_v1  ;;  %v595_v10 = vld [vmem:[#allocation2 + $0xa1] sm:$0xff]  ;;  %v596_v11 = vld [vmem:[#allocation2 + $0xa9] sm:$0xff]  ;;  %v489_v12 = vsel %vm407_vm4, %v366_v50, %v448_v4 }
  0x3e   : > { %526 = vst.msk [vmem:[#allocation2 + $0xe8] sm:$0xff] %vm496_vm0, %v484_v6  ;;  %v490_v13 = vsel %vm408_vm5, %v367_v51, %v449_v7  ;;  %531 = vst.msk [vmem:[#allocation2 + $0x110] sm:$0xff] %vm496_vm0, %v489_v12  ;;  %v5981_v17 = vpack.i.bf16 %v596_v11, %v595_v10  ;;  %v368_v33 = vld [vmem:[%s7601_s25 + $0x120] sm:$0xff]  ;;  %v613_v34 = vld [vmem:[#allocation2 + $0x12] sm:$0xff]  ;;  %vm537_vm12 = vcmask 27648   ;;  %vm2278_vm13 = vcmask 1041408  }
  0x3f   : > { %v488_v14 = vsel %vm406_vm6, %v365_v52, %v447_v8  ;;  %532 = vst.msk [vmem:[#allocation2 + $0x118] sm:$0xff] %vm496_vm0, %v490_v13  ;;  %5972 = vrot.lane.b32.xlu0 %v5971_v62, %s7481_s26  ;;  %v369_v36 = vld [vmem:[%s7601_s25 + $0x128] sm:$0xff]  ;;  %vm409_vm7 = vcmp.ge.f32.partialorder %v368_v33, 0.0  ;;  %v450_v37 = vmul.f32 0.2, %v368_v33  ;;  %v7724_v41 = vpack.i.bf16 %v614_v35, %v613_v34  ;;  %v617_v45 = vld [vmem:[#allocation2 + $0x32] sm:$0xff] }
  0x40   : > { %v601_v15 = vld [vmem:[#allocation2 + $0xd1] sm:$0xff]  ;;  %v602_v16 = vld [vmem:[#allocation2 + $0xd9] sm:$0xff]  ;;  %530 = vst.msk [vmem:[#allocation2 + $0x108] sm:$0xff] %vm496_vm0, %v488_v14  ;;  %5987 = vrot.lane.b32.xlu1 %v5986_v9, %s7481_s26  ;;  %vm410_vm8 = vcmp.ge.f32.partialorder %v369_v36, 0.0  ;;  %v451_v38 = vmul.f32 0.2, %v369_v36 }
  0x41   : > { %v5996_v18 = vpack.i.bf16 %v602_v16, %v601_v15  ;;  %v599_v19 = vld [vmem:[#allocation2 + $0xc1] sm:$0xff]  ;;  %v600_v20 = vld [vmem:[#allocation2 + $0xc9] sm:$0xff]  ;;  %v491_v40 = vsel %vm409_vm7, %v368_v33, %v450_v37  ;;  %v621_v51 = vld [vmem:[#allocation2 + $0x52] sm:$0xff]  ;;  %vm1919_vm14 = vcmask 64512   ;;  %vm1956_vm15 = vcmask 97280  }
  0x42   : > { %v5991_v23 = vpack.i.bf16 %v600_v20, %v599_v19  ;;  %v611_v42 = vld [vmem:[#allocation2 + $0x2] sm:$0xff]  ;;  %v612_v43 = vld [vmem:[#allocation2 + $0xa] sm:$0xff]  ;;  %v492_v44 = vsel %vm410_vm8, %v369_v36, %v451_v38  ;;  %533 = vst.msk [vmem:[#allocation2 + $0x120] sm:$0xff] %vm496_vm0, %v491_v40  ;;  %v618_v46 = vld [vmem:[#allocation2 + $0x3a] sm:$0xff]  ;;  %vm1993_vm1 = vcmask 130048   ;;  %vm2030_vm2 = vcmask 162816  }
  0x43   : > { %5982 = vrot.lane.b32.xlu0 %v5981_v17, %s7481_s26  ;;  %534 = vst.msk [vmem:[#allocation2 + $0x128] sm:$0xff] %vm496_vm0, %v492_v44  ;;  %v6021_v47 = vpack.i.bf16 %v612_v43, %v611_v42  ;;  %v7731_v48 = vpack.i.bf16 %v618_v46, %v617_v45  ;;  %v615_v49 = vld [vmem:[#allocation2 + $0x22] sm:$0xff]  ;;  %v616_v50 = vld [vmem:[#allocation2 + $0x2a] sm:$0xff]  ;;  %v622_v52 = vld [vmem:[#allocation2 + $0x5a] sm:$0xff]  ;;  %vm2067_vm3 = vcmask 195584   ;;  %vm2104_vm4 = vcmask 228352  }
  0x44   : > { %v605_v21 = vld [vmem:[#allocation2 + $0xf1] sm:$0xff]  ;;  %v606_v22 = vld [vmem:[#allocation2 + $0xf9] sm:$0xff]  ;;  %5997 = vrot.lane.b32.xlu1 %v5996_v18, %s7481_s26  ;;  %v6031_v53 = vpack.i.bf16 %v616_v50, %v615_v49  ;;  %v7736_v54 = vpack.i.bf16 %v622_v52, %v621_v51  ;;  %v619_v55 = vld [vmem:[#allocation2 + $0x42] sm:$0xff]  ;;  %vm2141_vm5 = vcmask 261120   ;;  %vm2223_vm6 = vcmask 293888  }
  0x45   : > { %v6006_v24 = vpack.i.bf16 %v606_v22, %v605_v21  ;;  %v603_v25 = vld [vmem:[#allocation2 + $0xe1] sm:$0xff]  ;;  %v604_v26 = vld [vmem:[#allocation2 + $0xe9] sm:$0xff]  ;;  %v625_v57 = vld [vmem:[#allocation2 + $0x72] sm:$0xff]  ;;  %vm2461_vm7 = vcmask 59392  }
  0x46   : > { %v609_v27 = vld [vmem:[#allocation2 + $0x111] sm:$0xff]  ;;  %v610_v28 = vld [vmem:[#allocation2 + $0x119] sm:$0x3f]  ;;  %v6001_v29 = vpack.i.bf16 %v604_v26, %v603_v25  ;;  %v623_v61 = vld [vmem:[#allocation2 + $0x62] sm:$0xff] }
  0x47   : > { %5992 = vrot.lane.b32.xlu0 %v5991_v23, %s7481_s26  ;;  %v6016_v30 = vpack.i.bf16 %v610_v28, %v609_v27  ;;  %v607_v31 = vld [vmem:[#allocation2 + $0x101] sm:$0xff]  ;;  %v608_v32 = vld [vmem:[#allocation2 + $0x109] sm:$0xff]  ;;  %v629_v63 = vld [vmem:[#allocation2 + $0x92] sm:$0xff] }
  0x48   : > { %6007 = vrot.lane.b32.xlu1 %v6006_v24, %s7481_s26  ;;  %v6011_v39 = vpack.i.bf16 %v608_v32, %v607_v31  ;;  %v620_v56 = vld [vmem:[#allocation2 + $0x4a] sm:$0xff]  ;;  %v626_v58 = vld [vmem:[#allocation2 + $0x7a] sm:$0xff]  ;;  %v627_v3 = vld [vmem:[#allocation2 + $0x82] sm:$0xff] }
  0x49   : > { %v6041_v59 = vpack.i.bf16 %v620_v56, %v619_v55  ;;  %v6056_v60 = vpack.i.bf16 %v626_v58, %v625_v57  ;;  %v624_v62 = vld [vmem:[#allocation2 + $0x6a] sm:$0xff]  ;;  %v630_v0 = vld [vmem:[#allocation2 + $0x9a] sm:$0xff]  ;;  %v633_v5 = vld [vmem:[#allocation2 + $0xb2] sm:$0xff] }
  0x4a   : > { %v6051_v1 = vpack.i.bf16 %v624_v62, %v623_v61  ;;  %v6066_v2 = vpack.i.bf16 %v630_v0, %v629_v63  ;;  %v628_v4 = vld [vmem:[#allocation2 + $0x8a] sm:$0xff]  ;;  %v634_v6 = vld [vmem:[#allocation2 + $0xba] sm:$0xff]  ;;  %v631_v11 = vld [vmem:[#allocation2 + $0xa2] sm:$0xff] }
  0x4b   : > { %6002 = vrot.lane.b32.xlu0 %v6001_v29, %s7481_s26  ;;  %v370_v7 = vld [vmem:[%s7601_s25 + $0x130] sm:$0xff]  ;;  %v6061_v8 = vpack.i.bf16 %v628_v4, %v627_v3  ;;  %v6076_v10 = vpack.i.bf16 %v634_v6, %v633_v5  ;;  %v638_v14 = vld [vmem:[#allocation2 + $0xda] sm:$0xff]  ;;  %v635_v18 = vld [vmem:[#allocation2 + $0xc2] sm:$0xff] }
  0x4c   : > { %6017 = vrot.lane.b32.xlu1 %v6016_v30, %s7481_s26  ;;  %vm411_vm9 = vcmp.ge.f32.partialorder %v370_v7, 0.0  ;;  %v452_v9 = vmul.f32 0.2, %v370_v7  ;;  %v632_v12 = vld [vmem:[#allocation2 + $0xaa] sm:$0xff]  ;;  %v637_v13 = vld [vmem:[#allocation2 + $0xd2] sm:$0xff]  ;;  %v642_v21 = vld [vmem:[#allocation2 + $0xfa] sm:$0xff] }
  0x4d   : > { %v6071_v16 = vpack.i.bf16 %v632_v12, %v631_v11  ;;  %v6086_v17 = vpack.i.bf16 %v638_v14, %v637_v13  ;;  %v636_v19 = vld [vmem:[#allocation2 + $0xca] sm:$0xff]  ;;  %v641_v20 = vld [vmem:[#allocation2 + $0xf2] sm:$0xff]  ;;  %v639_v24 = vld [vmem:[#allocation2 + $0xe2] sm:$0xff] }
  0x4e   : > { %v493_v15 = vsel %vm411_vm9, %v370_v7, %v452_v9  ;;  %v6081_v22 = vpack.i.bf16 %v636_v19, %v635_v18  ;;  %v6096_v23 = vpack.i.bf16 %v642_v21, %v641_v20  ;;  %v640_v25 = vld [vmem:[#allocation2 + $0xea] sm:$0xff]  ;;  %v645_v26 = vld [vmem:[#allocation2 + $0x112] sm:$0xff]  ;;  %v646_v27 = vld [vmem:[#allocation2 + $0x11a] sm:$0x3f] }
  0x4f   : > { %6012 = vrot.lane.b32.xlu0 %v6011_v39, %s7481_s26  ;;  %535 = vst.msk [vmem:[#allocation2 + $0x130] sm:$0xff] %vm496_vm0, %v493_v15  ;;  %v6091_v28 = vpack.i.bf16 %v640_v25, %v639_v24  ;;  %v6106_v29 = vpack.i.bf16 %v646_v27, %v645_v26  ;;  %v643_v30 = vld [vmem:[#allocation2 + $0x102] sm:$0xff]  ;;  %v644_v31 = vld [vmem:[#allocation2 + $0x10a] sm:$0xff]  ;;  %v647_v36 = vld [vmem:[#allocation2 + $0x11a] sm:$0xff]  ;;  %s7492_s26 = smov 48  }
  0x50   : > { %6027 = vrot.lane.b32.xlu1 %v7724_v41, %s7482_s27  ;;  %v6101_v32 = vpack.i.bf16 %v644_v31, %v643_v30  ;;  %v648_v33 = vld [vmem:[#allocation2 + $0x122] sm:$0xff]  ;;  %v649_v34 = vld [vmem:[#allocation2 + $0x12a] sm:$0x3f]  ;;  %v6191_v39 = vpack.i.bf16 %v647_v36, %v645_v26  ;;  %v666_v4 = vld [vmem:[#allocation2 + $0x93] sm:$0xff] }
  0x51   : > { %v6196_v35 = vpack.i.bf16 %v649_v34, %v648_v33  ;;  %v652_v37 = vld [vmem:[#allocation2 + $0x23] sm:$0xff]  ;;  %v653_v38 = vld [vmem:[#allocation2 + $0x2b] sm:$0xff]  ;;  %v651_v42 = vld [vmem:[#allocation2 + $0x1b] sm:$0xff] }
  0x52   : > { %v6206_v40 = vpack.i.bf16 %v653_v38, %v652_v37  ;;  %v656_v43 = vld [vmem:[#allocation2 + $0x43] sm:$0xff]  ;;  %v657_v44 = vld [vmem:[#allocation2 + $0x4b] sm:$0xff]  ;;  %v663_v61 = vld [vmem:[#allocation2 + $0x7b] sm:$0xff] }
  0x53   : > { %6022 = vrot.lane.b32.xlu0 %v6021_v47, %s7482_s27  ;;  %v6216_v46 = vpack.i.bf16 %v657_v44, %v656_v43  ;;  %v654_v47 = vld [vmem:[#allocation2 + $0x33] sm:$0xff]  ;;  %v660_v49 = vld [vmem:[#allocation2 + $0x63] sm:$0xff]  ;;  %v661_v50 = vld [vmem:[#allocation2 + $0x6b] sm:$0xff] }
  0x54   : > { %6037 = vrot.lane.b32.xlu1 %v7731_v48, %s7482_s27  ;;  %v6226_v52 = vpack.i.bf16 %v661_v50, %v660_v49  ;;  %v664_v55 = vld [vmem:[#allocation2 + $0x83] sm:$0xff]  ;;  %v665_v56 = vld [vmem:[#allocation2 + $0x8b] sm:$0xff]  ;;  %v667_v5 = vld [vmem:[#allocation2 + $0x9b] sm:$0xff] }
  0x55   : > { %v668_v63 = vld [vmem:[#allocation2 + $0xa3] sm:$0xff]  ;;  %v669_v0 = vld [vmem:[#allocation2 + $0xab] sm:$0xff]  ;;  %v670_v12 = vld [vmem:[#allocation2 + $0xb3] sm:$0xff] }
  0x56   : > { %v6246_v3 = vpack.i.bf16 %v669_v0, %v668_v63  ;;  %v672_v7 = vld [vmem:[#allocation2 + $0xc3] sm:$0xff]  ;;  %v671_v13 = vld [vmem:[#allocation2 + $0xbb] sm:$0xff]  ;;  %v674_v20 = vld [vmem:[#allocation2 + $0xd3] sm:$0xff] }
  0x57   : > { %6032 = vrot.lane.b32.xlu0 %v6031_v53, %s7482_s27  ;;  %v676_v15 = vld [vmem:[#allocation2 + $0xe3] sm:$0xff]  ;;  %v6251_v18 = vpack.i.bf16 %v671_v13, %v670_v12  ;;  %v675_v21 = vld [vmem:[#allocation2 + $0xdb] sm:$0xff]  ;;  %v681_v24 = vld [vmem:[#allocation2 + $0x10b] sm:$0xff] }
  0x58   : > { %6047 = vrot.lane.b32.xlu1 %v7736_v54, %s7482_s27  ;;  %v6261_v26 = vpack.i.bf16 %v675_v21, %v674_v20  ;;  %v684_v31 = vld [vmem:[#allocation2 + $0x123] sm:$0xff]  ;;  %v682_v36 = vld [vmem:[#allocation2 + $0x113] sm:$0xff]  ;;  %v683_v37 = vld [vmem:[#allocation2 + $0x11b] sm:$0xff] }
  0x59   : > { %v688_v38 = vld [vmem:[#allocation2 + $0x24] sm:$0xff]  ;;  %v697_v0 = vld [vmem:[#allocation2 + $0x6c] sm:$0xff] }
  0x5a   : > { %v696_v63 = vld [vmem:[#allocation2 + $0x64] sm:$0xff] }
  0x5b   : > { %6042 = vrot.lane.b32.xlu0 %v6041_v59, %s7482_s27  ;;  %v7408_v20 = vld [vmem:[%s10267_s1] sm:$0xff]  }
  0x5c   : > { %6057 = vrot.lane.b32.xlu1 %v6056_v60, %s7482_s27  ;;  %5617 = vmatprep.subr.bf16.mxu0 %v7408_v20 }
  0x5d   : > { %5618 = vmatpush3.bf16.msra.mxu0 %v7408_v20 }
  0x5f   : > { %6052 = vrot.lane.b32.xlu0 %v6051_v1, %s7482_s27 }
  0x60   : > { %6067 = vrot.lane.b32.xlu1 %v6066_v2, %s7482_s27 }
  0x63   : > { %6062 = vrot.lane.b32.xlu0 %v6061_v8, %s7482_s27 }
  0x64   : > { %6077 = vrot.lane.b32.xlu1 %v6076_v10, %s7482_s27 }
  0x67   : > { %6072 = vrot.lane.b32.xlu0 %v6071_v16, %s7482_s27 }
  0x68   : > { %6087 = vrot.lane.b32.xlu1 %v6086_v17, %s7482_s27 }
  0x6b   : > { %6082 = vrot.lane.b32.xlu0 %v6081_v22, %s7482_s27 }
  0x6c   : > { %6097 = vrot.lane.b32.xlu1 %v6096_v23, %s7482_s27 }
  0x6f   : > { %6092 = vrot.lane.b32.xlu0 %v6091_v28, %s7482_s27 }
  0x70   : > { %6107 = vrot.lane.b32.xlu1 %v6106_v29, %s7482_s27  ;;  %v679_v29 = vld [vmem:[#allocation2 + $0xfb] sm:$0xff] }
  0x73   : > { %6102 = vrot.lane.b32.xlu0 %v6101_v32, %s7482_s27 }
  0x74   : > { %6117 = vrot.lane.b32.xlu1 %v6031_v53, %s7483_s28  ;;  %v658_v53 = vld [vmem:[#allocation2 + $0x53] sm:$0xff] }
  0x77   : > { %6112 = vrot.lane.b32.xlu0 %v7724_v41, %s7483_s28  ;;  %v650_v41 = vld [vmem:[#allocation2 + $0x13] sm:$0xff] }
  0x78   : > { %6127 = vrot.lane.b32.xlu1 %v6041_v59, %s7483_s28  ;;  %v6201_v45 = vpack.i.bf16 %v651_v42, %v650_v41  ;;  %v6236_v59 = vpack.i.bf16 %v665_v56, %v664_v55  ;;  %v371_v41 = vld [vmem:[%s7601_s25 + $0x138] sm:$0xff]  ;;  %v372_v42 = vld [vmem:[%s7601_s25 + $0x140] sm:$0xf] }
  0x79   : > { %v453_v44 = vmul.f32 0.2, %v371_v41  ;;  %vm412_vm10 = vcmp.ge.f32.partialorder %v371_v41, 0.0  ;;  %vm413_vm11 = vcmp.ge.f32.partialorder %v372_v42, 0.0  ;;  %v454_v49 = vmul.f32 0.2, %v372_v42 }
  0x7b   : > { %6122 = vrot.lane.b32.xlu0 %v7731_v48, %s7483_s28  ;;  %v655_v48 = vld [vmem:[#allocation2 + $0x3b] sm:$0xff]  ;;  %v494_v50 = vsel %vm412_vm10, %v371_v41, %v453_v44  ;;  %v495_v55 = vsel %vm413_vm11, %v372_v42, %v454_v49 }
  0x7c   : > { %6137 = vrot.lane.b32.xlu1 %v6051_v1, %s7483_s28  ;;  %v6211_v51 = vpack.i.bf16 %v655_v48, %v654_v47  ;;  %v686_v47 = vld [vmem:[#allocation2 + $0x14] sm:$0xff]  ;;  %v687_v48 = vld [vmem:[#allocation2 + $0x1c] sm:$0xff]  ;;  %536 = vst.msk [vmem:[#allocation2 + $0x138] sm:$0xff] %vm496_vm0, %v494_v50 }
  0x7d   : > { %v6291_v56 = vpack.i.bf16 %v687_v48, %v686_v47  ;;  %538 = vst.msk [vmem:[#allocation2 + $0x140] sm:$0xf] %vm537_vm12, %v495_v55  ;;  %v763_v50 = vld [vmem:[#allocation2 + $0x36] sm:$0xff]  ;;  %v729_v55 = vld [vmem:[#allocation2 + $0x45] sm:$0xff] }
  0x7f   : > { %6132 = vrot.lane.b32.xlu0 %v7736_v54, %s7483_s28  ;;  %v659_v54 = vld [vmem:[#allocation2 + $0x5b] sm:$0xff] }
  0x80   : > { %6147 = vrot.lane.b32.xlu1 %v6061_v8, %s7483_s28  ;;  %v6221_v58 = vpack.i.bf16 %v659_v54, %v658_v53  ;;  %v673_v8 = vld [vmem:[#allocation2 + $0xcb] sm:$0xff] }
  0x81   : > { %v6256_v11 = vpack.i.bf16 %v673_v8, %v672_v7  ;;  %v693_v53 = vld [vmem:[#allocation2 + $0x4c] sm:$0xff]  ;;  %v695_v7 = vld [vmem:[#allocation2 + $0x5c] sm:$0xff] }
  0x83   : > { %6142 = vrot.lane.b32.xlu0 %v6056_v60, %s7483_s28  ;;  %v662_v60 = vld [vmem:[#allocation2 + $0x73] sm:$0xff] }
  0x84   : > { %6157 = vrot.lane.b32.xlu1 %v6071_v16, %s7483_s28  ;;  %v677_v16 = vld [vmem:[#allocation2 + $0xeb] sm:$0xff] }
  0x85   : > { %v6266_v19 = vpack.i.bf16 %v677_v16, %v676_v15  ;;  %v698_v16 = vld [vmem:[#allocation2 + $0x74] sm:$0xff] }
  0x87   : > { %6152 = vrot.lane.b32.xlu0 %v6066_v2, %s7483_s28  ;;  %v6231_v2 = vpack.i.bf16 %v663_v61, %v662_v60  ;;  %v691_v60 = vld [vmem:[#allocation2 + $0x3c] sm:$0xff] }
  0x88   : > { %6167 = vrot.lane.b32.xlu1 %v6081_v22, %s7483_s28 }
  0x8b   : > { %6162 = vrot.lane.b32.xlu0 %v6076_v10, %s7483_s28  ;;  %v6241_v10 = vpack.i.bf16 %v667_v5, %v666_v4  ;;  %v7820_v4 = vpack.i.bf16 %v697_v0, %v696_v63  ;;  %v694_v5 = vld [vmem:[#allocation2 + $0x54] sm:$0xff] }
  0x8c   : > { %6177 = vrot.lane.b32.xlu1 %v6091_v28, %s7483_s28  ;;  %v678_v28 = vld [vmem:[#allocation2 + $0xf3] sm:$0xff]  ;;  %v7827_v13 = vpack.i.bf16 %v695_v7, %v694_v5 }
  0x8d   : > { %v6271_v34 = vpack.i.bf16 %v679_v29, %v678_v28  ;;  %v725_v28 = vld [vmem:[#allocation2 + $0x25] sm:$0xff]  ;;  %v726_v29 = vld [vmem:[#allocation2 + $0x2d] sm:$0xff] }
  0x8e   : > { %v766_v5 = vld [vmem:[#allocation2 + $0x4e] sm:$0xff] }
  0x8f   : > { %6172 = vrot.lane.b32.xlu0 %v6086_v17, %s7483_s28 }
  0x90   : > { %6187 = vrot.lane.b32.xlu1 %v6101_v32, %s7483_s28  ;;  %v685_v32 = vld [vmem:[#allocation2 + $0x12b] sm:$0x3f] }
  0x93   : > { %6182 = vrot.lane.b32.xlu0 %v6096_v23, %s7483_s28  ;;  %v680_v23 = vld [vmem:[#allocation2 + $0x103] sm:$0xff] }
  0x94   : > { %6197 = vrot.lane.b32.xlu1 %v6196_v35, %s7483_s28  ;;  %v6276_v27 = vpack.i.bf16 %v681_v24, %v680_v23  ;;  %v6286_v35 = vpack.i.bf16 %v685_v32, %v684_v31  ;;  %v702_v24 = vld [vmem:[#allocation2 + $0x94] sm:$0xff]  ;;  %v7409_v31 = vld [vmem:[%s10267_s1 + $0x8] sm:$0xff]  }
  0x95   : > { %5619 = vmatprep.subr.bf16.mxu0 %v7409_v31 }
  0x96   : > { %5620 = vmatpush3.bf16.msra.mxu0 %v7409_v31  ;;  %v734_v31 = vld [vmem:[#allocation2 + $0x6d] sm:$0xff] }
  0x97   : > { %6192 = vrot.lane.b32.xlu0 %v6191_v39, %s7483_s28  ;;  %s7487_s28 = smov 28  }
  0x98   : > { %6207 = vrot.lane.b32.xlu1 %v6206_v40, %s7484_s29  ;;  %v689_v40 = vld [vmem:[#allocation2 + $0x2c] sm:$0xff] }
  0x9b   : > { %6202 = vrot.lane.b32.xlu0 %v6201_v45, %s7484_s29  ;;  %v6281_v45 = vpack.i.bf16 %v683_v37, %v682_v36  ;;  %v761_v37 = vld [vmem:[#allocation2 + $0x26] sm:$0xff] }
  0x9c   : > { %6217 = vrot.lane.b32.xlu1 %v6216_v46, %s7484_s29  ;;  %v6296_v46 = vpack.i.bf16 %v689_v40, %v688_v38  ;;  %v762_v38 = vld [vmem:[#allocation2 + $0x2e] sm:$0xff] }
  0x9d   : > { %v7410_v40 = vld [vmem:[%s10267_s1 + $0x10] ss:$0 sps:$4 sm:$0x33]   ;;  %v6356_v44 = vpack.i.bf16 %v762_v38, %v761_v37 }
  0x9e   : > { %v7762_v57 = vpop.permute.xlu1 %5942  ;;  %5871 = vmatprep.subr.msk.bf16.mxu0 %vm2278_vm13, %v7410_v40  ;;  %v2280_v42 = vsel %vm2278_vm13, %v7410_v40, 0 }
  0x9f   : > { %6212 = vrot.lane.b32.xlu0 %v6211_v51, %s7484_s29  ;;  %5622 = vmatpush3.bf16.msra.mxu0 %v2280_v42  ;;  %v770_v42 = vld [vmem:[#allocation2 + $0x6e] sm:$0xff] }
  0xa0   : > { %6227 = vrot.lane.b32.xlu1 %v6226_v52, %s7484_s29  ;;  %v692_v52 = vld [vmem:[#allocation2 + $0x44] sm:$0xff] }
  0xa1   : > { %v7766_v62 = vpop.permute.xlu0 %5932 }
  0xa2   : > { %v7768_v1 = vpop.permute.xlu1 %5947 }
  0xa3   : > { %6222 = vrot.lane.b32.xlu0 %v6221_v58, %s7484_s29  ;;  %v7811_v58 = vpack.i.bf16 %v693_v53, %v692_v52  ;;  %v764_v52 = vld [vmem:[#allocation2 + $0x3e] sm:$0xff] }
  0xa4   : > { %6237 = vrot.lane.b32.xlu1 %v6236_v59, %s7484_s29  ;;  %v690_v59 = vld [vmem:[#allocation2 + $0x34] sm:$0xff] }
  0xa5   : > { %v7772_v6 = vpop.permute.xlu0 %5937 }
  0xa6   : > { %v7774_v9 = vpop.permute.xlu1 %5957 }
  0xa7   : > { %6232 = vrot.lane.b32.xlu0 %v6231_v2, %s7484_s29 }
  0xa8   : > { %6247 = vrot.lane.b32.xlu1 %v6246_v3, %s7484_s29  ;;  %v6301_v3 = vpack.i.bf16 %v691_v60, %v690_v59  ;;  %v6361_v60 = vpack.i.bf16 %v764_v52, %v763_v50 }
  0xa9   : > { %v7778_v14 = vpop.permute.xlu0 %5952 }
  0xaa   : > { %v7780_v17 = vpop.permute.xlu1 %5967 }
  0xab   : > { %6242 = vrot.lane.b32.xlu0 %v6241_v10, %s7484_s29  ;;  %v700_v10 = vld [vmem:[#allocation2 + $0x84] sm:$0xff] }
  0xac   : > { %6257 = vrot.lane.b32.xlu1 %v6256_v11, %s7484_s29  ;;  %v701_v11 = vld [vmem:[#allocation2 + $0x8c] sm:$0xff] }
  0xad   : > { %v7784_v22 = vpop.permute.xlu0 %5962  ;;  %v7831_v15 = vpack.i.bf16 %v701_v11, %v700_v10  ;;  %v731_v11 = vld [vmem:[#allocation2 + $0x55] sm:$0xff] }
  0xae   : > { %v7786_v25 = vpop.permute.xlu1 %5977 }
  0xaf   : > { %6252 = vrot.lane.b32.xlu0 %v6251_v18, %s7484_s29  ;;  %v699_v18 = vld [vmem:[#allocation2 + $0x7c] sm:$0xff] }
  0xb0   : > { %6267 = vrot.lane.b32.xlu1 %v6266_v19, %s7484_s29  ;;  %v7842_v23 = vpack.i.bf16 %v699_v18, %v698_v16  ;;  %v732_v16 = vld [vmem:[#allocation2 + $0x5d] sm:$0xff] }
  0xb1   : > { %v7790_v30 = vpop.permute.xlu0 %5972 }
  0xb2   : > { %v7792_v33 = vpop.permute.xlu1 %5987 }
  0xb3   : > { %6262 = vrot.lane.b32.xlu0 %v6261_v26, %s7484_s29  ;;  %v703_v26 = vld [vmem:[#allocation2 + $0x9c] sm:$0xff] }
  0xb4   : > { %6277 = vrot.lane.b32.xlu1 %v6276_v27, %s7484_s29 }
  0xb5   : > { %v7796_v39 = vpop.permute.xlu0 %5982 }
  0xb6   : > { %v7800_v43 = vpop.permute.xlu1 %5997 }
  0xb7   : > { %10327 = vst [vmem:[#allocation7_spill] sm:$0xff] %v7800_v43  ;;  %6272 = vrot.lane.b32.xlu0 %v6271_v34, %s7484_s29  ;;  %v7855_v34 = vpack.i.bf16 %v703_v26, %v702_v24  ;;  %v767_v24 = vld [vmem:[#allocation2 + $0x56] sm:$0xff]  ;;  %v768_v26 = vld [vmem:[#allocation2 + $0x5e] sm:$0xff] }
  0xb8   : > { %6287 = vrot.lane.b32.xlu1 %v6286_v35, %s7484_s29  ;;  %v6346_v35 = vpack.i.bf16 %v726_v29, %v725_v28  ;;  %v733_v29 = vld [vmem:[#allocation2 + $0x65] sm:$0xff]  ;;  %v6391_v37 = vpack.i.bf16 %v768_v26, %v767_v24 }
  0xb9   : > { %v7804_v51 = vpop.permute.xlu0 %5992  ;;  %v6406_v38 = vpack.i.bf16 %v734_v31, %v733_v29  ;;  %v739_v29 = vld [vmem:[#allocation2 + $0x95] sm:$0xff]  ;;  %v740_v31 = vld [vmem:[#allocation2 + $0x9d] sm:$0xff] }
  0xba   : > { %10328 = vst [vmem:[#allocation8_spill] sm:$0xff] %v7804_v51  ;;  %v7807_v54 = vpop.permute.xlu1 %6007  ;;  %v546_v51 = vld [vmem:[#allocation2 + $0x38] sm:$0xff] }
  0xbb   : > { %10329 = vst [vmem:[#allocation9_spill] sm:$0xff] %v7807_v54  ;;  %6282 = vrot.lane.b32.xlu0 %v6281_v45, %s7484_s29  ;;  %v727_v45 = vld [vmem:[#allocation2 + $0x35] sm:$0xff]  ;;  %v5935_v54 = vunpack.i.h.bf16 %v7766_v62 }
  0xbc   : > { %6297 = vrot.lane.b32.xlu1 %v6296_v46, %s7485_s14 }
  0xbd   : > { %v7813_v61 = vpop.permute.xlu0 %6002 }
  0xbe   : > { %10330 = vst [vmem:[#allocation10_spill] sm:$0xff] %v7813_v61  ;;  %v7815_v2 = vpop.permute.xlu1 %6017 }
  0xbf   : > { %10331 = vst [vmem:[#allocation11_spill] sm:$0xff] %v7815_v2  ;;  %6292 = vrot.lane.b32.xlu0 %v6291_v56, %s7485_s14  ;;  %v730_v56 = vld [vmem:[#allocation2 + $0x4d] sm:$0xff]  ;;  %v712_v2 = vld [vmem:[#allocation2 + $0xe4] sm:$0xff] }
  0xc0   : > { %6307 = vrot.lane.b32.xlu1 %v7811_v58, %s7485_s14  ;;  %v6376_v63 = vpack.i.bf16 %v730_v56, %v729_v55  ;;  %v771_v55 = vld [vmem:[#allocation2 + $0x76] sm:$0xff]  ;;  %v772_v56 = vld [vmem:[#allocation2 + $0x7e] sm:$0xff] }
  0xc1   : > { %v7822_v8 = vpop.permute.xlu0 %6012 }
  0xc2   : > { %10332 = vst [vmem:[#allocation12_spill] sm:$0xff] %v7822_v8  ;;  %v7824_v12 = vpop.permute.xlu1 %6027 }
  0xc3   : > { %6302 = vrot.lane.b32.xlu0 %v6301_v3, %s7485_s14 }
  0xc4   : > { %6317 = vrot.lane.b32.xlu1 %v7820_v4, %s7485_s14 }
  0xc5   : > { %v7833_v19 = vpop.permute.xlu0 %6022 }
  0xc6   : > { %v7838_v21 = vpop.permute.xlu1 %6037 }
  0xc7   : > { %6312 = vrot.lane.b32.xlu0 %v7827_v13, %s7485_s14 }
  0xc8   : > { %6327 = vrot.lane.b32.xlu1 %v7831_v15, %s7485_s14 }
  0xc9   : > { %v7846_v27 = vpop.permute.xlu0 %6032 }
  0xca   : > { %v7851_v32 = vpop.permute.xlu1 %6047 }
  0xcb   : > { %6322 = vrot.lane.b32.xlu0 %v7842_v23, %s7485_s14 }
  0xcc   : > { %6337 = vrot.lane.b32.xlu1 %v6296_v46, %s7486_s23  ;;  %v728_v46 = vld [vmem:[#allocation2 + $0x3d] sm:$0xff] }
  0xcd   : > { %v7858_v36 = vpop.permute.xlu0 %6042  ;;  %v6351_v49 = vpack.i.bf16 %v728_v46, %v727_v45  ;;  %v735_v46 = vld [vmem:[#allocation2 + $0x75] sm:$0xff] }
  0xce   : > { %v7863_v41 = vpop.permute.xlu1 %6057 }
  0xcf   : > { %6332 = vrot.lane.b32.xlu0 %v7855_v34, %s7485_s14 }
  0xd0   : > { %6347 = vrot.lane.b32.xlu1 %v6346_v35, %s7487_s28 }
  0xd1   : > { %v7870_v47 = vpop.permute.xlu0 %6052 }
  0xd2   : > { %v7872_v48 = vpop.permute.xlu1 %6067 }
  0xd3   : > { %6342 = vrot.lane.b32.xlu0 %v6301_v3, %s7486_s23  ;;  %v765_v3 = vld [vmem:[#allocation2 + $0x46] sm:$0xff] }
  0xd4   : > { %6357 = vrot.lane.b32.xlu1 %v6356_v44, %s7488_s16  ;;  %v6386_v10 = vpack.i.bf16 %v766_v5, %v765_v3  ;;  %v738_v3 = vld [vmem:[#allocation2 + $0x8d] sm:$0xff] }
  0xd5   : > { %v7876_v53 = vpop.permute.xlu0 %6062 }
  0xd6   : > { %10333 = vst [vmem:[#allocation13_spill] sm:$0xff] %v7876_v53  ;;  %v7878_v59 = vpop.permute.xlu1 %6077  ;;  %v556_v53 = vld [vmem:[#allocation2 + $0x88] sm:$0xff] }
  0xd7   : > { %10334 = vst [vmem:[#allocation14_spill] sm:$0xff] %v7878_v59  ;;  %6352 = vrot.lane.b32.xlu0 %v6351_v49, %s7487_s28  ;;  %v736_v49 = vld [vmem:[#allocation2 + $0x7d] sm:$0xff]  ;;  %v545_v59 = vld [vmem:[#allocation2 + $0x30] sm:$0xff] }
  0xd8   : > { %6367 = vrot.lane.b32.xlu1 %v7811_v58, %s7486_s23  ;;  %v6381_v58 = vpack.i.bf16 %v732_v16, %v731_v11 }
  0xd9   : > { %v7883_v0 = vpop.permute.xlu0 %6072 }
  0xda   : > { %10335 = vst [vmem:[#allocation15_spill] sm:$0xff] %v7883_v0  ;;  %v7885_v7 = vpop.permute.xlu1 %6087 }
  0xdb   : > { %10336 = vst [vmem:[#allocation16_spill] sm:$0xff] %v7885_v7  ;;  %6362 = vrot.lane.b32.xlu0 %v6361_v60, %s7488_s16 }
  0xdc   : > { %6377 = vrot.lane.b32.xlu1 %v6376_v63, %s7487_s28  ;;  %v737_v63 = vld [vmem:[#allocation2 + $0x85] sm:$0xff] }
  0xdd   : > { %v7889_v18 = vpop.permute.xlu0 %6082  ;;  %v6436_v11 = vpack.i.bf16 %v738_v3, %v737_v63  ;;  %v707_v63 = vld [vmem:[#allocation2 + $0xbc] sm:$0xff] }
  0xde   : > { %10337 = vst [vmem:[#allocation17_spill] sm:$0xff] %v7889_v18  ;;  %v7891_v20 = vpop.permute.xlu1 %6097  ;;  %v788_v18 = vld [vmem:[#allocation2 + $0xfe] sm:$0xff] }
  0xdf   : > { %10338 = vst [vmem:[#allocation18_spill] sm:$0xff] %v7891_v20  ;;  %6372 = vrot.lane.b32.xlu0 %v7827_v13, %s7486_s23  ;;  %v769_v13 = vld [vmem:[#allocation2 + $0x66] sm:$0xff]  ;;  %v782_v20 = vld [vmem:[#allocation2 + $0xce] sm:$0xff] }
  0xe0   : > { %6387 = vrot.lane.b32.xlu1 %v6386_v10, %s7488_s16  ;;  %v6416_v45 = vpack.i.bf16 %v770_v42, %v769_v13  ;;  %v6421_v10 = vpack.i.bf16 %v772_v56, %v771_v55  ;;  %v705_v13 = vld [vmem:[#allocation2 + $0xac] sm:$0xff]  ;;  %v706_v56 = vld [vmem:[#allocation2 + $0xb4] sm:$0xff] }
  0xe1   : > { %v7896_v28 = vpop.permute.xlu0 %6092 }
  0xe2   : > { %10339 = vst [vmem:[#allocation19_spill] sm:$0xff] %v7896_v28  ;;  %v7898_v35 = vpop.permute.xlu1 %6107 }
  0xe3   : > { %10340 = vst [vmem:[#allocation20_spill] sm:$0xff] %v7898_v35  ;;  %6382 = vrot.lane.b32.xlu0 %v6381_v58, %s7487_s28  ;;  %v774_v58 = vld [vmem:[#allocation2 + $0x8e] sm:$0xff]  ;;  %v708_v35 = vld [vmem:[#allocation2 + $0xc4] sm:$0xff] }
  0xe4   : > { %6397 = vrot.lane.b32.xlu1 %v7820_v4, %s7486_s23  ;;  %v6411_v4 = vpack.i.bf16 %v736_v49, %v735_v46  ;;  %v775_v49 = vld [vmem:[#allocation2 + $0x96] sm:$0xff] }
  0xe5   : > { %v7903_v40 = vpop.permute.xlu0 %6102 }
  0xe6   : > { %10341 = vst [vmem:[#allocation21_spill] sm:$0xff] %v7903_v40  ;;  %v7905_v44 = vpop.permute.xlu1 %6117  ;;  %v778_v40 = vld [vmem:[#allocation2 + $0xae] sm:$0xff] }
  0xe7   : > { %6392 = vrot.lane.b32.xlu0 %v6391_v37, %s7488_s16 }
  0xe8   : > { %6407 = vrot.lane.b32.xlu1 %v6406_v38, %s7487_s28  ;;  %v704_v38 = vld [vmem:[#allocation2 + $0xa4] sm:$0xff] }
  0xe9   : > { %v7909_v50 = vpop.permute.xlu0 %6112  ;;  %v6456_v46 = vpack.i.bf16 %v705_v13, %v704_v38  ;;  %v742_v38 = vld [vmem:[#allocation2 + $0xad] sm:$0xff] }
  0xea   : > { %v7911_v52 = vpop.permute.xlu1 %6127 }
  0xeb   : > { %6402 = vrot.lane.b32.xlu0 %v7842_v23, %s7486_s23  ;;  %v773_v23 = vld [vmem:[#allocation2 + $0x86] sm:$0xff] }
  0xec   : > { %6417 = vrot.lane.b32.xlu1 %v6416_v45, %s7488_s16  ;;  %v6446_v26 = vpack.i.bf16 %v774_v58, %v773_v23  ;;  %v7489_v45 = vmov 0   ;;  %v743_v23 = vld [vmem:[#allocation2 + $0xb5] sm:$0xff]  ;;  %v744_v58 = vld [vmem:[#allocation2 + $0xbd] sm:$0xff] }
  0xed   : > { %v7916_v60 = vpop.permute.xlu0 %6122  ;;  %6652 = vset.pattern.permute.xlu1 %v7489_v45  ;;  %6651 = vset.pattern.permute.xlu0 %v7489_v45  ;;  %v780_v45 = vld [vmem:[#allocation2 + $0xbe] sm:$0xff] }
  0xee   : > { %10342 = vst [vmem:[#allocation22_spill] sm:$0xff] %v7916_v60  ;;  %v7918_v5 = vpop.permute.xlu1 %6137 }
  0xef   : > { %10343 = vst [vmem:[#allocation23_spill] sm:$0xff] %v7918_v5  ;;  %6412 = vrot.lane.b32.xlu0 %v6411_v4, %s7487_s28  ;;  %v776_v4 = vld [vmem:[#allocation2 + $0x9e] sm:$0xff] }
  0xf0   : > { %6427 = vrot.lane.b32.xlu1 %v7831_v15, %s7486_s23  ;;  %v6441_v15 = vpack.i.bf16 %v740_v31, %v739_v29  ;;  %v6476_v29 = vpack.i.bf16 %v744_v58, %v743_v23  ;;  %v741_v31 = vld [vmem:[#allocation2 + $0xa5] sm:$0xff] }
  0xf1   : > { %v7923_v16 = vpop.permute.xlu0 %6132  ;;  %v709_v23 = vld [vmem:[#allocation2 + $0xcc] sm:$0xff]  ;;  %v559_v5 = vld [vmem:[#allocation2 + $0xa0] sm:$0xff] }
  0xf2   : > { %10344 = vst [vmem:[#allocation24_spill] sm:$0xff] %v7923_v16  ;;  %v7925_v24 = vpop.permute.xlu1 %6147  ;;  %v754_v16 = vld [vmem:[#allocation2 + $0x10d] sm:$0xff] }
  0xf3   : > { %10345 = vst [vmem:[#allocation25_spill] sm:$0xff] %v7925_v24  ;;  %6422 = vrot.lane.b32.xlu0 %v6421_v10, %s7488_s16  ;;  %v6451_v10 = vpack.i.bf16 %v776_v4, %v775_v49  ;;  %v6471_v4 = vpack.i.bf16 %v742_v38, %v741_v31  ;;  %v711_v31 = vld [vmem:[#allocation2 + $0xdc] sm:$0xff] }
  0xf4   : > { %6437 = vrot.lane.b32.xlu1 %v6436_v11, %s7487_s28 }
  0xf5   : > { %v7929_v37 = vpop.permute.xlu0 %6142 }
  0xf6   : > { %10346 = vst [vmem:[#allocation26_spill] sm:$0xff] %v7929_v37  ;;  %v7931_v42 = vpop.permute.xlu1 %6157  ;;  %v562_v37 = vld [vmem:[#allocation2 + $0xb8] sm:$0xff] }
  0xf7   : > { %10347 = vst [vmem:[#allocation27_spill] sm:$0xff] %v7931_v42  ;;  %6432 = vrot.lane.b32.xlu0 %v7855_v34, %s7486_s23  ;;  %v6466_v34 = vpack.i.bf16 %v707_v63, %v706_v56  ;;  %v777_v63 = vld [vmem:[#allocation2 + $0xa6] sm:$0xff] }
  0xf8   : > { %6447 = vrot.lane.b32.xlu1 %v6446_v26, %s7488_s16  ;;  %v6481_v8 = vpack.i.bf16 %v778_v40, %v777_v63  ;;  %v745_v40 = vld [vmem:[#allocation2 + $0xc5] sm:$0xff] }
  0xf9   : > { %v7936_v55 = vpop.permute.xlu0 %6152 }
  0xfa   : > { %10348 = vst [vmem:[#allocation28_spill] sm:$0xff] %v7936_v55  ;;  %v7938_v3 = vpop.permute.xlu1 %6167  ;;  %v5959_v55 = vunpack.i.l.bf16 %v7774_v9 }
  0xfb   : > { %10349 = vst [vmem:[#allocation29_spill] sm:$0xff] %v7938_v3  ;;  %6442 = vrot.lane.b32.xlu0 %v6441_v15, %s7487_s28  ;;  %v779_v15 = vld [vmem:[#allocation2 + $0xb6] sm:$0xff]  ;;  %v716_v3 = vld [vmem:[#allocation2 + $0x104] sm:$0xff] }
  0xfc   : > { %6457 = vrot.lane.b32.xlu1 %v6456_v46, %s7485_s14  ;;  %v6486_v56 = vpack.i.bf16 %v780_v45, %v779_v15  ;;  %v747_v45 = vld [vmem:[#allocation2 + $0xd5] sm:$0xff] }
  0xfd   : > { %v7942_v11 = vpop.permute.xlu0 %6162 }
  0xfe   : > { %10350 = vst [vmem:[#allocation30_spill] sm:$0xff] %v7942_v11  ;;  %v7944_v26 = vpop.permute.xlu1 %6177 }
  0xff   : > { %10351 = vst [vmem:[#allocation31_spill] sm:$0xff] %v7944_v26  ;;  %6452 = vrot.lane.b32.xlu0 %v6451_v10, %s7488_s16 }
 0x100   : > { %6467 = vrot.lane.b32.xlu1 %v6466_v34, %s7486_s23 }
 0x101   : > { %v7948_v13 = vpop.permute.xlu0 %6172 }
 0x102   : > { %10352 = vst [vmem:[#allocation32_spill] sm:$0xff] %v7948_v13  ;;  %v7950_v49 = vpop.permute.xlu1 %6187 }
 0x103   : > { %10353 = vst [vmem:[#allocation33_spill] sm:$0xff] %v7950_v49  ;;  %6462 = vrot.lane.b32.xlu0 %v6456_v46, %s7486_s23  ;;  %v6496_v49 = vpack.i.bf16 %v709_v23, %v708_v35  ;;  %v710_v46 = vld [vmem:[#allocation2 + $0xd4] sm:$0xff] }
 0x104   : > { %6477 = vrot.lane.b32.xlu1 %v6476_v29, %s7487_s28  ;;  %v6506_v38 = vpack.i.bf16 %v711_v31, %v710_v46  ;;  %v783_v23 = vld [vmem:[#allocation2 + $0xd6] sm:$0xff] }
 0x105   : > { %v7954_v10 = vpop.permute.xlu0 %6182 }
 0x106   : > { %10354 = vst [vmem:[#allocation34_spill] sm:$0xff] %v7954_v10  ;;  %v7956_v58 = vpop.permute.xlu1 %6197  ;;  %v781_v10 = vld [vmem:[#allocation2 + $0xc6] sm:$0xff] }
 0x107   : > { %10355 = vst [vmem:[#allocation35_spill] sm:$0xff] %v7956_v58  ;;  %6472 = vrot.lane.b32.xlu0 %v6471_v4, %s7487_s28  ;;  %v748_v58 = vld [vmem:[#allocation2 + $0xdd] sm:$0xff]  ;;  %v6521_v13 = vpack.i.bf16 %v782_v20, %v781_v10  ;;  %v749_v10 = vld [vmem:[#allocation2 + $0xe5] sm:$0xff] }
 0x108   : > { %6487 = vrot.lane.b32.xlu1 %v6486_v56, %s7488_s16  ;;  %v6516_v35 = vpack.i.bf16 %v748_v58, %v747_v45  ;;  %v746_v56 = vld [vmem:[#allocation2 + $0xcd] sm:$0xff] }
 0x109   : > { %v7960_v28 = vpop.permute.xlu0 %6192  ;;  %v6511_v46 = vpack.i.bf16 %v746_v56, %v745_v40  ;;  %v713_v58 = vld [vmem:[#allocation2 + $0xec] sm:$0xff]  ;;  %v715_v40 = vld [vmem:[#allocation2 + $0xfc] sm:$0xff] }
 0x10a   : > { %10356 = vst [vmem:[#allocation36_spill] sm:$0xff] %v7960_v28  ;;  %v7962_v29 = vpop.permute.xlu1 %6207  ;;  %v6536_v26 = vpack.i.bf16 %v713_v58, %v712_v2 }
 0x10b   : > { %10357 = vst [vmem:[#allocation37_spill] sm:$0xff] %v7962_v29  ;;  %6482 = vrot.lane.b32.xlu0 %v6481_v8, %s7488_s16  ;;  %v784_v8 = vld [vmem:[#allocation2 + $0xde] sm:$0xff]  ;;  %v560_v29 = vld [vmem:[#allocation2 + $0xa8] sm:$0xff] }
 0x10c   : > { %6497 = vrot.lane.b32.xlu1 %v6496_v49, %s7485_s14  ;;  %v6526_v31 = vpack.i.bf16 %v784_v8, %v783_v23  ;;  %v751_v8 = vld [vmem:[#allocation2 + $0xf5] sm:$0xff] }
 0x10d   : > { %v7966_v15 = vpop.permute.xlu0 %6202 }
 0x10e   : > { %v7968_v4 = vpop.permute.xlu1 %6217 }
 0x10f   : > { %10358 = vst [vmem:[#allocation38_spill] sm:$0xff] %v7968_v4  ;;  %6492 = vrot.lane.b32.xlu0 %v6466_v34, %s7485_s14  ;;  %v753_v4 = vld [vmem:[#allocation2 + $0x105] sm:$0xff] }
 0x110   : > { %6507 = vrot.lane.b32.xlu1 %v6506_v38, %s7486_s23 }
 0x111   : > { %v7972_v63 = vpop.permute.xlu0 %6212 }
 0x112   : > { %10359 = vst [vmem:[#allocation39_spill] sm:$0xff] %v7972_v63  ;;  %v7974_v28 = vpop.permute.xlu1 %6227  ;;  %v792_v63 = vld [vmem:[#allocation2 + $0x11e] sm:$0xff] }
 0x113   : > { %10360 = vst [vmem:[#allocation40_spill] sm:$0xff] %v7974_v28  ;;  %6502 = vrot.lane.b32.xlu0 %v6496_v49, %s7486_s23  ;;  %v714_v49 = vld [vmem:[#allocation2 + $0xf4] sm:$0xff] }
 0x114   : > { %6517 = vrot.lane.b32.xlu1 %v6516_v35, %s7487_s28  ;;  %v7990_v56 = vpack.i.bf16 %v715_v40, %v714_v49  ;;  %v561_v28 = vld [vmem:[#allocation2 + $0xb0] sm:$0xff] }
 0x115   : > { %v7978_v34 = vpop.permute.xlu0 %6222 }
 0x116   : > { %10361 = vst [vmem:[#allocation41_spill] sm:$0xff] %v7978_v34  ;;  %v7980_v45 = vpop.permute.xlu1 %6237  ;;  %v5990_v34 = vunpack.i.h.bf16 %v7792_v33 }
 0x117   : > { %10362 = vst [vmem:[#allocation42_spill] sm:$0xff] %v7980_v45  ;;  %6512 = vrot.lane.b32.xlu0 %v6511_v46, %s7487_s28  ;;  %v752_v46 = vld [vmem:[#allocation2 + $0xfd] sm:$0xff]  ;;  %v5955_v45 = vunpack.i.h.bf16 %v7778_v14 }
 0x118   : > { %6527 = vrot.lane.b32.xlu1 %v6526_v31, %s7488_s16  ;;  %v6556_v2 = vpack.i.bf16 %v752_v46, %v751_v8  ;;  %v750_v31 = vld [vmem:[#allocation2 + $0xed] sm:$0xff]  ;;  %v5945_v46 = vunpack.i.h.bf16 %v7762_v57 }
 0x119   : > { %v7984_v61 = vpop.permute.xlu0 %6232  ;;  %v6551_v40 = vpack.i.bf16 %v750_v31, %v749_v10  ;;  %v717_v8 = vld [vmem:[#allocation2 + $0x10c] sm:$0xff]  ;;  %v5949_v31 = vunpack.i.l.bf16 %v7768_v1 }
 0x11a   : > { %10363 = vst [vmem:[#allocation43_spill] sm:$0xff] %v7984_v61  ;;  %v7986_v35 = vpop.permute.xlu1 %6247  ;;  %v540_v10 = vld [vmem:[#allocation2 + $0x8] sm:$0xff]  ;;  %v5975_v61 = vunpack.i.h.bf16 %v7790_v30 }
 0x11b   : > { %10364 = vst [vmem:[#allocation44_spill] sm:$0xff] %v7986_v35  ;;  %6522 = vrot.lane.b32.xlu0 %v6521_v13, %s7488_s16  ;;  %v787_v13 = vld [vmem:[#allocation2 + $0xf6] sm:$0xff]  ;;  %v5939_v35 = vunpack.i.l.bf16 %v7772_v6 }
 0x11c   : > { %6537 = vrot.lane.b32.xlu1 %v6536_v26, %s7485_s14  ;;  %v6566_v7 = vpack.i.bf16 %v788_v18, %v787_v13  ;;  %v5950_v18 = vunpack.i.h.bf16 %v7768_v1 }
 0x11d   : > { %v7992_v23 = vpop.permute.xlu0 %6242 }
 0x11e   : > { %10365 = vst [vmem:[#allocation45_spill] sm:$0xff] %v7992_v23  ;;  %v7994_v20 = vpop.permute.xlu1 %6257  ;;  %v542_v23 = vld [vmem:[#allocation2 + $0x18] sm:$0xff] }
 0x11f   : > { %10366 = vst [vmem:[#allocation46_spill] sm:$0xff] %v7994_v20  ;;  %6532 = vrot.lane.b32.xlu0 %v6506_v38, %s7485_s14  ;;  %v785_v20 = vld [vmem:[#allocation2 + $0xe6] sm:$0xff]  ;;  %v786_v38 = vld [vmem:[#allocation2 + $0xee] sm:$0xff] }
 0x120   : > { %6547 = vrot.lane.b32.xlu1 %v7990_v56, %s7486_s23  ;;  %v6561_v13 = vpack.i.bf16 %v786_v38, %v785_v20  ;;  %v719_v20 = vld [vmem:[#allocation2 + $0x11c] sm:$0xff] }
 0x121   : > { %v7999_v58 = vpop.permute.xlu0 %6252 }
 0x122   : > { %10367 = vst [vmem:[#allocation47_spill] sm:$0xff] %v7999_v58  ;;  %v8001_v49 = vpop.permute.xlu1 %6267  ;;  %v5944_v58 = vunpack.i.l.bf16 %v7762_v57  ;;  %v5940_v57 = vunpack.i.h.bf16 %v7772_v6  ;;  %v550_v6 = vld [vmem:[#allocation2 + $0x58] sm:$0xff] }
 0x123   : > { %10368 = vst [vmem:[#allocation48_spill] sm:$0xff] %v8001_v49  ;;  %6542 = vrot.lane.b32.xlu0 %v6536_v26, %s7486_s23  ;;  %v544_v49 = vld [vmem:[#allocation2 + $0x28] sm:$0xff]  ;;  %v543_v26 = vld [vmem:[#allocation2 + $0x20] sm:$0xff] }
 0x124   : > { %6557 = vrot.lane.b32.xlu1 %v6556_v2, %s7487_s28  ;;  %v5934_v2 = vunpack.i.l.bf16 %v7766_v62  ;;  %v5960_v62 = vunpack.i.h.bf16 %v7774_v9  ;;  %v8026_v38 = vsel %vm496_vm0, %v544_v49, %v5945_v46  ;;  %v8029_v42 = vsel %vm496_vm0, %v543_v26, %v5944_v58  ;;  %v548_v58 = vld [vmem:[#allocation2 + $0x48] sm:$0xff]  ;;  %v547_v46 = vld [vmem:[#allocation2 + $0x40] sm:$0xff] }
 0x125   : > { %v8005_v11 = vpop.permute.xlu0 %6262  ;;  %v8044_v49 = vsel %vm496_vm0, %v545_v59, %v5949_v31  ;;  %v5954_v26 = vunpack.i.l.bf16 %v7778_v14  ;;  %v5969_v14 = vunpack.i.l.bf16 %v7780_v17 }
 0x126   : > { %10369 = vst [vmem:[#allocation49_spill] sm:$0xff] %v8005_v11  ;;  %v8010_v0 = vpop.permute.xlu1 %6277  ;;  %v539_v11 = vld [vmem:[#allocation2] sm:$0xff]  ;;  %v8060_v59 = vsel %vm496_vm0, %v550_v6, %v5960_v62  ;;  %v5965_v62 = vunpack.i.h.bf16 %v7784_v22 }
 0x127   : > { %10370 = vst [vmem:[#allocation50_spill] sm:$0xff] %v8010_v0  ;;  %6552 = vrot.lane.b32.xlu0 %v6551_v40, %s7487_s28  ;;  %v8018_v0 = vpack.i.bf16 %v717_v8, %v716_v3  ;;  %v718_v40 = vld [vmem:[#allocation2 + $0x114] sm:$0xff]  ;;  %v8038_v9 = vsel %vm496_vm0, %v539_v11, %v5934_v2 }
 0x128   : > { %6567 = vrot.lane.b32.xlu1 %v6566_v7, %s7488_s16  ;;  %v8032_v7 = vsel %vm496_vm0, %v540_v10, %v5935_v54  ;;  %v541_v3 = vld [vmem:[#allocation2 + $0x10] sm:$0xff]  ;;  %v8048_v54 = vsel %vm496_vm0, %v542_v23, %v5940_v57  ;;  %v5970_v10 = vunpack.i.h.bf16 %v7780_v17  ;;  %v8054_v11 = vpack.i.bf16 %v719_v20, %v718_v40  ;;  %v756_v57 = vld [vmem:[#allocation2 + $0x11d] sm:$0xff]  ;;  %v552_v20 = vld [vmem:[#allocation2 + $0x68] sm:$0xff] }
 0x129   : > { %v8023_v1 = vpop.permute.xlu0 %6272  ;;  %v549_v8 = vld [vmem:[#allocation2 + $0x50] sm:$0xff]  ;;  %v8069_v40 = vsel %vm496_vm0, %v548_v58, %v5955_v45  ;;  %v558_v17 = vld [vmem:[#allocation2 + $0x98] sm:$0xff]  ;;  %v5974_v45 = vunpack.i.l.bf16 %v7790_v30  ;;  %v8082_v58 = vsel %vm496_vm0, %v547_v46, %v5954_v26  ;;  %v5989_v30 = vunpack.i.l.bf16 %v7792_v33 }
 0x12a   : > { %10371 = vst [vmem:[#allocation51_spill] sm:$0xff] %v8023_v1  ;;  %v8035_v24 = vpop.permute.xlu1 %6287  ;;  %v8041_v1 = vsel %vm496_vm0, %v546_v51, %v5950_v18  ;;  %v8057_v51 = vsel %vm496_vm0, %v541_v3, %v5939_v35  ;;  %v8063_v2 = vsel %vm496_vm0, %v549_v8, %v5959_v55  ;;  %v553_v23 = vld [vmem:[#allocation2 + $0x70] sm:$0xff]  ;;  %v554_v18 = vld [vmem:[#allocation2 + $0x78] sm:$0xff]  ;;  %v551_v35 = vld [vmem:[#allocation2 + $0x60] sm:$0xff]  ;;  %v5964_v3 = vunpack.i.l.bf16 %v7784_v22 }
 0x12b   : > { %10372 = vst [vmem:[#allocation52_spill] sm:$0xff] %v8035_v24  ;;  %6562 = vrot.lane.b32.xlu0 %v6561_v13, %s7488_s16  ;;  %v755_v13 = vld [vmem:[#allocation2 + $0x115] sm:$0xff]  ;;  %v5980_v8 = vunpack.i.h.bf16 %v7786_v25  ;;  %v5979_v24 = vunpack.i.l.bf16 %v7786_v25  ;;  %v8085_v22 = vsel %vm496_vm0, %v554_v18, %v5970_v10  ;;  %v5984_v46 = vunpack.i.l.bf16 %v7796_v39 }
 0x12c   : > { %6577 = vrot.lane.b32.xlu1 %v8018_v0, %s7485_s14  ;;  %v557_v55 = vld [vmem:[#allocation2 + $0x90] sm:$0xff]  ;;  %v6596_v25 = vpack.i.bf16 %v756_v57, %v755_v13  ;;  %v6000_v26 = vunpack.i.h.bf16 %v7800_v43  ;;  %v8100_v13 = vsel %vm496_vm0, %v552_v20, %v5965_v62  ;;  %v8103_v57 = vsel %vm496_vm0, %v551_v35, %v5964_v3  ;;  %v789_v43 = vld [vmem:[#allocation2 + $0x106] sm:$0xff] }
 0x12d   : > { %v8066_v31 = vpop.permute.xlu0 %6282  ;;  %v791_v18 = vld [vmem:[#allocation2 + $0x116] sm:$0xff]  ;;  %v8106_v33 = vsel %vm496_vm0, %v558_v17, %v5980_v8  ;;  %v6591_v35 = vpack.i.bf16 %v754_v16, %v753_v4  ;;  %v790_v20 = vld [vmem:[#allocation2 + $0x10e] sm:$0xff]  ;;  %v8121_v62 = vld [vmem:[#allocation2 + $0x124] sm:$0xff]  ;;  %v8124_v8 = vsel %vm496_vm0, %v562_v37, %v5990_v34  ;;  %v8140_v37 = vsel %vm496_vm0, %v559_v5, %v5984_v46 }
 0x12e   : > { %10373 = vst [vmem:[#allocation53_spill] sm:$0xff] %v8066_v31  ;;  %v8074_v6 = vpop.permute.xlu1 %6297  ;;  %v555_v31 = vld [vmem:[#allocation2 + $0x80] sm:$0xff]  ;;  %v721_v3 = vld [vmem:[#allocation2 + $0x12c] sm:$0x3f]  ;;  %10377 = vst [vmem:[#allocation57_spill] sm:$0xff] %v8140_v37  ;;  %v6040_v46 = vunpack.i.h.bf16 %v7838_v21  ;;  %v6045_v37 = vunpack.i.h.bf16 %v7858_v36 }
 0x12f   : > { %10374 = vst [vmem:[#allocation54_spill] sm:$0xff] %v8074_v6  ;;  %6572 = vrot.lane.b32.xlu0 %v7990_v56, %s7485_s14  ;;  %v5985_v56 = vunpack.i.h.bf16 %v7796_v39  ;;  %v8097_v6 = vsel %vm496_vm0, %v553_v23, %v5969_v14  ;;  %v566_v39 = vld [vmem:[#allocation2 + $0xd8] sm:$0xff]  ;;  %v8114_v23 = vsel %vm496_vm0, %v556_v53, %v5975_v61  ;;  %v8117_v14 = vsel %vm496_vm0, %v555_v31, %v5974_v45  ;;  %v8131_v31 = vld [vmem:[#allocation2 + $0x12c] sm:$0xff] }
 0x130   : > { %6587 = vrot.lane.b32.xlu1 %v8054_v11, %s7486_s23  ;;  %v6606_v61 = vpack.i.bf16 %v792_v63, %v791_v18  ;;  %v8129_v53 = vld [vmem:[#allocation2 + $0x134] sm:$0xff]  ;;  %v8143_v4 = vsel %vm496_vm0, %v566_v39, %v6000_v26  ;;  %v8147_v34 = vld [vmem:[#allocation2 + $0x13c] sm:$0x3f]  ;;  %v6024_v45 = vunpack.i.l.bf16 %v7833_v19  ;;  %v6616_v5 = vpack.i.bf16 %v721_v3, %v8121_v62 }
 0x131   : > { %v8094_v10 = vpop.permute.xlu0 %6292  ;;  %v8137_v16 = vsel %vm496_vm0, %v560_v29, %v5985_v56  ;;  %10378 = vst [vmem:[#allocation58_spill] sm:$0xff] %v8143_v4  ;;  %v8149_v63 = vld [vmem:[#allocation2 + $0x135] sm:$0xff]  ;;  %v8151_v17 = vld [vmem:[#allocation2 + $0x13d] sm:$0x3f]  ;;  %v8160_v56 = vld [vmem:[#allocation2 + $0x12d] sm:$0xff]  ;;  %v6039_v26 = vunpack.i.l.bf16 %v7838_v21  ;;  %v6626_v39 = vpack.i.bf16 %v8147_v34, %v8129_v53  ;;  %v6050_v3 = vunpack.i.h.bf16 %v7851_v32 }
 0x132   : > { %10375 = vst [vmem:[#allocation55_spill] sm:$0xff] %v8094_v10  ;;  %v8108_v60 = vpop.permute.xlu1 %6307  ;;  %v8111_v10 = vsel %vm496_vm0, %v557_v55, %v5979_v24  ;;  %v6030_v24 = vunpack.i.h.bf16 %v7824_v12  ;;  %v6029_v55 = vunpack.i.l.bf16 %v7824_v12  ;;  %10376 = vst [vmem:[#allocation56_spill] sm:$0xff] %v8137_v16  ;;  %v8193_v53 = vld [vmem:[#allocation2 + $0x12e] sm:$0xff]  ;;  %v1920_v34 = vsel %vm1919_vm14, %v8038_v9, %v6024_v45 }
 0x133   : > { %6582 = vrot.lane.b32.xlu0 %v8018_v0, %s7486_s23  ;;  %v8134_v0 = vsel %vm496_vm0, %v561_v28, %v5989_v30  ;;  %v6025_v28 = vunpack.i.h.bf16 %v7833_v19  ;;  %v8158_v30 = vld [vmem:[#allocation2 + $0x125] sm:$0xff]  ;;  %v6044_v18 = vunpack.i.l.bf16 %v7858_v36  ;;  %v1926_v16 = vsel %vm1919_vm14, %v8044_v49, %v6039_v26 }
 0x134   : > { %6597 = vrot.lane.b32.xlu1 %v6596_v25, %s7487_s28  ;;  %v6601_v25 = vpack.i.bf16 %v790_v20, %v789_v43  ;;  %v8169_v19 = vsel %vm1919_vm14, %v8057_v51, %v6029_v55  ;;  %v8173_v43 = vsel %vm1919_vm14, %v8048_v54, %v6030_v24  ;;  %v6035_v20 = vunpack.i.h.bf16 %v7846_v27  ;;  %v8189_v24 = vld [vmem:[#allocation2 + $0x13e] sm:$0x3f] }
 0x135   : > { %v8145_v12 = vpop.permute.xlu0 %6302  ;;  %v6034_v51 = vunpack.i.l.bf16 %v7846_v27  ;;  %v1921_v21 = vsel %vm1919_vm14, %v8032_v7, %v6025_v28  ;;  %v6049_v27 = vunpack.i.l.bf16 %v7851_v32  ;;  %v8205_v54 = vsel %vm1919_vm14, %v8041_v1, %v6040_v46 }
 0x136   : > { %v8155_v29 = vpop.permute.xlu1 %6317  ;;  %v6060_v9 = vunpack.i.h.bf16 %v7863_v41  ;;  %v6059_v32 = vunpack.i.l.bf16 %v7863_v41  ;;  %v6054_v7 = vunpack.i.l.bf16 %v7870_v47  ;;  %v8221_v36 = vsel %vm1919_vm14, %v8026_v38, %v6035_v20 }
 0x137   : > { %6592 = vrot.lane.b32.xlu0 %v6591_v35, %s7487_s28  ;;  %v8180_v35 = vld [vmem:[#allocation2 + $0x136] sm:$0xff]  ;;  %v8225_v28 = vsel %vm1919_vm14, %v8029_v42, %v6034_v51  ;;  %v8229_v41 = vsel %vm1919_vm14, %v8060_v59, %v6050_v3  ;;  %v6055_v45 = vunpack.i.h.bf16 %v7870_v47  ;;  %v8240_v38 = vsel %vm1919_vm14, %v8082_v58, %v6044_v18 }
 0x138   : > { %6607 = vrot.lane.b32.xlu1 %v6606_v61, %s7488_s16  ;;  %v8191_v61 = vld [vmem:[#allocation2 + $0x126] sm:$0xff]  ;;  %v6646_v1 = vpack.i.bf16 %v8189_v24, %v8180_v35  ;;  %v6070_v42 = vunpack.i.h.bf16 %v7872_v48  ;;  %v6069_v46 = vunpack.i.l.bf16 %v7872_v48  ;;  %v8246_v47 = vsel %vm1919_vm14, %v8069_v40, %v6045_v37 }
 0x139   : > { %v8185_v55 = vpop.permute.xlu0 %6312  ;;  %v6641_v49 = vpack.i.bf16 %v8193_v53, %v8191_v61  ;;  %v8250_v59 = vsel %vm1919_vm14, %v8085_v22, %v6060_v9  ;;  %v6119_v35 = vunpack.i.l.bf16 %v7905_v44  ;;  %v8258_v48 = vsel %vm1919_vm14, %v8097_v6, %v6059_v32 }
 0x13a   : > { %v8201_v4 = vpop.permute.xlu1 %6327  ;;  %v8262_v58 = vsel %vm1919_vm14, %v8103_v57, %v6054_v7  ;;  %v6115_v40 = vunpack.i.h.bf16 %v7909_v50  ;;  %v6114_v22 = vunpack.i.l.bf16 %v7909_v50  ;;  %v6205_v37 = vunpack.i.h.bf16 %v7966_v15 }
 0x13b   : > { %6602 = vrot.lane.b32.xlu0 %v6601_v25, %s7488_s16  ;;  %v6204_v6 = vunpack.i.l.bf16 %v7966_v15  ;;  %v8278_v57 = vsel %vm1919_vm14, %v8106_v33, %v6070_v42  ;;  %v8282_v50 = vsel %vm1919_vm14, %v8111_v10, %v6069_v46  ;;  %v1959_v3 = vsel %vm1956_vm15, %v8169_v19, %v6119_v35 }
 0x13c   : > { %6617 = vrot.lane.b32.xlu1 %v6616_v5, %s7485_s14  ;;  %v8236_v5 = vsel %vm1919_vm14, %v8063_v2, %v6049_v27  ;;  %v6120_v2 = vunpack.i.h.bf16 %v7905_v44  ;;  %v8269_v44 = vsel %vm1919_vm14, %v8100_v13, %v6055_v45  ;;  %v10380_v33 = vpack.i.bf16 %v8131_v31, %v8121_v62 }
 0x13d   : > { %v8232_v25 = vpop.permute.xlu0 %6322  ;;  %v1957_v10 = vsel %vm1956_vm15, %v1920_v34, %v6114_v22  ;;  %v1958_v9 = vsel %vm1956_vm15, %v1921_v21, %v6115_v40  ;;  %v10381_v19 = vpack.i.bf16 %v8151_v17, %v8149_v63  ;;  %v10382_v34 = vld [vmem:[#allocation22_spill] sm:$0xff]  ;;  %v10384_v22 = vld [vmem:[#allocation37_spill] sm:$0xff]  ;;  %v6305_v53 = vunpack.i.h.bf16 %v8145_v12 }
 0x13e   : > { %v6338_v26 = vpop.permute.xlu1 %6337  ;;  %v1960_v15 = vsel %vm1956_vm15, %v8173_v43, %v6120_v2  ;;  %v6130_v43 = vunpack.i.h.bf16 %v7911_v52  ;;  %v1994_v42 = vsel %vm1993_vm1, %v1957_v10, %v6204_v6  ;;  %v1995_v62 = vsel %vm1993_vm1, %v1958_v9, %v6205_v37 }
 0x13f   : > { %6612 = vrot.lane.b32.xlu0 %v8054_v11, %s7485_s14  ;;  %v6129_v11 = vunpack.i.l.bf16 %v7911_v52  ;;  %v6340_v24 = vunpack.i.h.bf16 %v6338_v26  ;;  %v6339_v27 = vunpack.i.l.bf16 %v6338_v26  ;;  %v6125_v46 = vunpack.i.h.bf16 %v10382_v34 }
 0x140   : > { %6627 = vrot.lane.b32.xlu1 %v6626_v39, %s7486_s23  ;;  %v10379_v39 = vld [vmem:[#allocation55_spill] sm:$0xff]  ;;  %v6124_v21 = vunpack.i.l.bf16 %v10382_v34  ;;  %v10383_v52 = vpack.i.bf16 %v8160_v56, %v8158_v30  ;;  %v6209_v37 = vunpack.i.l.bf16 %v10384_v22 }
 0x141   : > { %v8274_v18 = vpop.permute.xlu0 %6332  ;;  %v6295_v13 = vunpack.i.h.bf16 %v10379_v39  ;;  %v6294_v20 = vunpack.i.l.bf16 %v10379_v39  ;;  %v8302_v45 = vsel %vm1956_vm15, %v1926_v16, %v6129_v11  ;;  %v6210_v11 = vunpack.i.h.bf16 %v10384_v22 }
 0x142   : > { %v6348_v51 = vpop.permute.xlu1 %6347 }
 0x143   : > { %6622 = vrot.lane.b32.xlu0 %v10380_v33, %s7486_s23  ;;  %v6350_v32 = vunpack.i.h.bf16 %v6348_v51  ;;  %v6349_v7 = vunpack.i.l.bf16 %v6348_v51  ;;  %v2031_v26 = vsel %vm2030_vm2, %v1994_v42, %v6294_v20  ;;  %v2032_v2 = vsel %vm2030_vm2, %v1995_v62, %v6295_v13  ;;  %v10385_v13 = vld [vmem:[#allocation54_spill] sm:$0xff] }
 0x144   : > { %6637 = vrot.lane.b32.xlu1 %v10381_v19, %s7487_s28  ;;  %v2068_v35 = vsel %vm2067_vm3, %v2031_v26, %v6339_v27  ;;  %v2069_v40 = vsel %vm2067_vm3, %v2032_v2, %v6340_v24  ;;  %v6300_v20 = vunpack.i.h.bf16 %v10385_v13  ;;  %v6299_v30 = vunpack.i.l.bf16 %v10385_v13  ;;  %v2588_v24 = vld [vmem:[%s10273_s7 + $0x70] sm:$0xff] }
 0x145   : > { %v6343_v31 = vpop.permute.xlu0 %6342  ;;  %v2105_v6 = vsel %vm2104_vm4, %v2068_v35, %v6349_v7  ;;  %v2106_v39 = vsel %vm2104_vm4, %v2069_v40, %v6350_v32  ;;  %v1961_v7 = vsel %vm1956_vm15, %v8225_v28, %v6124_v21  ;;  %v1962_v19 = vsel %vm1956_vm15, %v8221_v36, %v6125_v46  ;;  %v2587_v36 = vld [vmem:[%s10273_s7 + $0x68] sm:$0xff] }
 0x146   : > { %v6358_v63 = vpop.permute.xlu1 %6357  ;;  %v6345_v33 = vunpack.i.h.bf16 %v6343_v31  ;;  %v6344_v10 = vunpack.i.l.bf16 %v6343_v31  ;;  %v10386_v31 = vld [vmem:[#allocation39_spill] sm:$0xff] }
 0x147   : > { %6632 = vrot.lane.b32.xlu0 %v10383_v52, %s7487_s28  ;;  %v6360_v16 = vunpack.i.h.bf16 %v6358_v63  ;;  %v6359_v17 = vunpack.i.l.bf16 %v6358_v63  ;;  %v6215_v34 = vunpack.i.h.bf16 %v10386_v31  ;;  %v6214_v26 = vunpack.i.l.bf16 %v10386_v31 }
 0x148   : > { %6647 = vrot.lane.b32.xlu1 %v6646_v1, %s7488_s16  ;;  %v8330_v1 = vsel %vm1956_vm15, %v8205_v54, %v6130_v43  ;;  %v1996_v54 = vsel %vm1993_vm1, %v1959_v3, %v6209_v37  ;;  %v1997_v43 = vsel %vm1993_vm1, %v1960_v15, %v6210_v11  ;;  %v2589_v15 = vld [vmem:[%s10273_s7 + $0x78] sm:$0xff] }
 0x149   : > { %v6353_v56 = vpop.permute.xlu0 %6352  ;;  %v2142_v51 = vsel %vm2141_vm5, %v2105_v6, %v6359_v17  ;;  %v2143_v27 = vsel %vm2141_vm5, %v2106_v39, %v6360_v16  ;;  %v2033_v28 = vsel %vm2030_vm2, %v1996_v54, %v6299_v30  ;;  %v2034_v61 = vsel %vm2030_vm2, %v1997_v43, %v6300_v20  ;;  %v2590_v6 = vld [vmem:[%s10273_s7 + $0x80] sm:$0xff]  ;;  %v10389_v43 = vld [vmem:[#allocation38_spill] sm:$0xff] }
 0x14a   : > { %v6368_v9 = vpop.permute.xlu1 %6367  ;;  %v2178_v32 = vpack.c.bf16 %v2143_v27, %v2142_v51  ;;  %v6355_v42 = vunpack.i.h.bf16 %v6353_v56  ;;  %v6354_v62 = vunpack.i.l.bf16 %v6353_v56  ;;  %v2070_v46 = vsel %vm2067_vm3, %v2033_v28, %v6344_v10  ;;  %v10387_v39 = vld [vmem:[#allocation23_spill] sm:$0xff]  ;;  %v2591_v27 = vld [vmem:[%s10273_s7 + $0x88] sm:$0xff]  ;;  %v2592_v28 = vld [vmem:[%s10273_s7 + $0x90] sm:$0xff] }
 0x14b   : > { %6642 = vrot.lane.b32.xlu0 %v6641_v49, %s7488_s16  ;;  %v6304_v49 = vunpack.i.l.bf16 %v8145_v12  ;;  %v2071_v21 = vsel %vm2067_vm3, %v2034_v61, %v6345_v33  ;;  %v6370_v35 = vunpack.i.h.bf16 %v6368_v9  ;;  %v6369_v40 = vunpack.i.l.bf16 %v6368_v9 }
 0x14c   : > { %5623 = vmatprep.mubr.msk.bf16.mxu0 %vm2223_vm6, %v2178_v32  ;;  %2682 = vperm.xlu1 %6652, %v2588_v24   ;;  %v2107_v16 = vsel %vm2104_vm4, %v2070_v46, %v6354_v62  ;;  %v2108_v17 = vsel %vm2104_vm4, %v2071_v21, %v6355_v42  ;;  %v6140_v13 = vunpack.i.h.bf16 %v10387_v39  ;;  %v1998_v20 = vsel %vm1993_vm1, %v1961_v7, %v6214_v26  ;;  %v10388_v24 = vld [vmem:[#allocation24_spill] sm:$0xff]  ;;  %v2593_v46 = vld [vmem:[%s10273_s7 + $0x98] sm:$0xff] }
 0x14d   : > { %v6363_v3 = vpop.permute.xlu0 %6362  ;;  %v1999_v30 = vsel %vm1993_vm1, %v1962_v19, %v6215_v34  ;;  %v6135_v33 = vunpack.i.h.bf16 %v10388_v24  ;;  %v6134_v10 = vunpack.i.l.bf16 %v10388_v24  ;;  %v2035_v9 = vsel %vm2030_vm2, %v1998_v20, %v6304_v49 }
 0x14e   : > { %v6365_v2 = vunpack.i.h.bf16 %v6363_v3  ;;  %v6364_v63 = vunpack.i.l.bf16 %v6363_v3  ;;  %v6378_v52 = vpop.permute.xlu1 %6377  ;;  %v2036_v32 = vsel %vm2030_vm2, %v1999_v30, %v6305_v53  ;;  %v2072_v62 = vsel %vm2067_vm3, %v2035_v9, %v6369_v40 }
 0x14f   : > { %2677 = vperm.xlu0 %6651, %v2587_v36   ;;  %v6380_v11 = vunpack.i.h.bf16 %v6378_v52  ;;  %v6379_v37 = vunpack.i.l.bf16 %v6378_v52  ;;  %v2073_v7 = vsel %vm2067_vm3, %v2036_v32, %v6370_v35  ;;  %v6220_v31 = vunpack.i.h.bf16 %v10389_v43 }
 0x150   : > { %v2144_v12 = vsel %vm2141_vm5, %v2107_v16, %v6364_v63  ;;  %v2145_v22 = vsel %vm2141_vm5, %v2108_v17, %v6365_v2  ;;  %2687 = vperm.xlu1 %6652, %v2589_v15   ;;  %v6219_v34 = vunpack.i.l.bf16 %v10389_v43  ;;  %v6310_v61 = vunpack.i.h.bf16 %v8108_v60  ;;  %v2596_v43 = vld [vmem:[%s10273_s7 + $0xb0] sm:$0xff] }
 0x151   : > { %v6373_v56 = vpop.permute.xlu0 %6372  ;;  %v2179_v51 = vpack.c.bf16 %v2145_v22, %v2144_v12  ;;  %v2109_v26 = vsel %vm2104_vm4, %v2072_v62, %v6379_v37  ;;  %v2110_v36 = vsel %vm2104_vm4, %v2073_v7, %v6380_v11  ;;  %v6309_v53 = vunpack.i.l.bf16 %v8108_v60  ;;  %v10390_v11 = vld [vmem:[#allocation41_spill] sm:$0xff] }
 0x152   : > { %v6388_v42 = vpop.permute.xlu1 %6387  ;;  %v6139_v21 = vunpack.i.l.bf16 %v10387_v39  ;;  %v6375_v2 = vunpack.i.h.bf16 %v6373_v56  ;;  %v6374_v63 = vunpack.i.l.bf16 %v6373_v56  ;;  %v1965_v17 = vsel %vm1956_vm15, %v8240_v38, %v6134_v10  ;;  %v2594_v38 = vld [vmem:[%s10273_s7 + $0xa0] sm:$0xff]  ;;  %v2595_v56 = vld [vmem:[%s10273_s7 + $0xa8] sm:$0xff] }
 0x153   : > { %5624 = vmatmul.mubr.msk.bf16.vlgmr.msra.gmra.mrb[0].mxu0 %vm2223_vm6, %v2179_v51  ;;  %v6390_v19 = vunpack.i.h.bf16 %v6388_v42  ;;  %v6389_v54 = vunpack.i.l.bf16 %v6388_v42  ;;  %2692 = vperm.xlu0 %6651, %v2590_v6   ;;  %v1966_v60 = vsel %vm1956_vm15, %v8246_v47, %v6135_v33  ;;  %v2000_v12 = vsel %vm1993_vm1, %v8302_v45, %v6219_v34 }
 0x154   : > { %2697 = vperm.xlu1 %6652, %v2591_v27   ;;  %v2001_v22 = vsel %vm1993_vm1, %v8330_v1, %v6220_v31  ;;  %v6225_v37 = vunpack.i.h.bf16 %v10390_v11  ;;  %v6224_v6 = vunpack.i.l.bf16 %v10390_v11  ;;  %v2037_v47 = vsel %vm2030_vm2, %v2000_v12, %v6309_v53  ;;  %v10391_v53 = vld [vmem:[#allocation26_spill] sm:$0xff]  ;;  %v2598_v12 = vld [vmem:[%s10273_s7 + $0xc0] sm:$0xff] }
 0x155   : > { %v2146_v49 = vsel %vm2141_vm5, %v2109_v26, %v6389_v54  ;;  %v2147_v3 = vsel %vm2141_vm5, %v2110_v36, %v6390_v19  ;;  %v6383_v15 = vpop.permute.xlu0 %6382  ;;  %v2038_v20 = vsel %vm2030_vm2, %v2001_v22, %v6310_v61  ;;  %v6315_v45 = vunpack.i.h.bf16 %v8185_v55  ;;  %v2597_v61 = vld [vmem:[%s10273_s7 + $0xb8] sm:$0xff] }
 0x156   : > { %v6398_v52 = vpop.permute.xlu1 %6397  ;;  %v2180_v16 = vpack.c.bf16 %v2147_v3, %v2146_v49  ;;  %v6385_v35 = vunpack.i.h.bf16 %v6383_v15  ;;  %v6384_v40 = vunpack.i.l.bf16 %v6383_v15  ;;  %v6314_v30 = vunpack.i.l.bf16 %v8185_v55 }
 0x157   : > { %2702 = vperm.xlu0 %6651, %v2592_v28   ;;  %v2075_v51 = vsel %vm2067_vm3, %v2038_v20, %v6375_v2  ;;  %v2074_v27 = vsel %vm2067_vm3, %v2037_v47, %v6374_v63  ;;  %v6400_v42 = vunpack.i.h.bf16 %v6398_v52  ;;  %v6399_v62 = vunpack.i.l.bf16 %v6398_v52  ;;  %v2599_v47 = vld [vmem:[%s10273_s7 + $0xc8] sm:$0xff] }
 0x158   : > { %5627 = vmatprep.mubr.msk.bf16.mxu0 %vm2223_vm6, %v2180_v16  ;;  %2707 = vperm.xlu1 %6652, %v2593_v46   ;;  %v2111_v9 = vsel %vm2104_vm4, %v2074_v27, %v6384_v40  ;;  %v2112_v32 = vsel %vm2104_vm4, %v2075_v51, %v6385_v35  ;;  %v1967_v31 = vsel %vm1956_vm15, %v8236_v5, %v6139_v21  ;;  %v6145_v49 = vunpack.i.h.bf16 %v10391_v53  ;;  %v10392_v16 = vld [vmem:[#allocation40_spill] sm:$0xff] }
 0x159   : > { %v6393_v1 = vpop.permute.xlu0 %6392  ;;  %v2002_v34 = vsel %vm1993_vm1, %v1965_v17, %v6224_v6  ;;  %v2003_v26 = vsel %vm1993_vm1, %v1966_v60, %v6225_v37  ;;  %v6144_v3 = vunpack.i.l.bf16 %v10391_v53  ;;  %v6230_v17 = vunpack.i.h.bf16 %v10392_v16 }
 0x15a   : > { %v6395_v24 = vunpack.i.h.bf16 %v6393_v1  ;;  %v6394_v33 = vunpack.i.l.bf16 %v6393_v1  ;;  %v6408_v10 = vpop.permute.xlu1 %6407  ;;  %v2039_v15 = vsel %vm2030_vm2, %v2002_v34, %v6314_v30  ;;  %v2040_v46 = vsel %vm2030_vm2, %v2003_v26, %v6315_v45 }
 0x15b   : > { %2712 = vperm.xlu0 %6651, %v2594_v38   ;;  %v6410_v19 = vunpack.i.h.bf16 %v6408_v10  ;;  %v6409_v54 = vunpack.i.l.bf16 %v6408_v10  ;;  %v2076_v5 = vsel %vm2067_vm3, %v2039_v15, %v6399_v62  ;;  %v2077_v21 = vsel %vm2067_vm3, %v2040_v46, %v6400_v42  ;;  %v10393_v10 = vld [vmem:[#allocation43_spill] sm:$0xff]  ;;  %v10394_v15 = vld [vmem:[#allocation13_spill] sm:$0xff] }
 0x15c   : > { %v2148_v55 = vsel %vm2141_vm5, %v2111_v9, %v6394_v33  ;;  %v2149_v7 = vsel %vm2141_vm5, %v2112_v32, %v6395_v24  ;;  %2717 = vperm.xlu1 %6652, %v2595_v56   ;;  %v6229_v60 = vunpack.i.l.bf16 %v10392_v16  ;;  %v6320_v22 = vunpack.i.h.bf16 %v8155_v29  ;;  %v10395_v16 = vld [vmem:[#allocation25_spill] sm:$0xff] }
 0x15d   : > { %v6403_v36 = vpop.permute.xlu0 %6402  ;;  %v2181_v28 = vpack.c.bf16 %v2149_v7, %v2148_v55  ;;  %v2113_v35 = vsel %vm2104_vm4, %v2076_v5, %v6409_v54  ;;  %v2114_v40 = vsel %vm2104_vm4, %v2077_v21, %v6410_v19  ;;  %v6319_v11 = vunpack.i.l.bf16 %v8155_v29  ;;  %v2601_v55 = vld [vmem:[%s10273_s7 + $0xd8] sm:$0xff] }
 0x15e   : > { %v6418_v2 = vpop.permute.xlu1 %6417  ;;  %v1968_v20 = vsel %vm1956_vm15, %v8229_v41, %v6140_v13  ;;  %v6405_v45 = vunpack.i.h.bf16 %v6403_v36  ;;  %v6404_v30 = vunpack.i.l.bf16 %v6403_v36  ;;  %v1969_v29 = vsel %vm1956_vm15, %v8262_v58, %v6144_v3  ;;  %v2600_v58 = vld [vmem:[%s10273_s7 + $0xd0] sm:$0xff]  ;;  %v2602_v3 = vld [vmem:[%s10273_s7 + $0xe0] sm:$0xff] }
 0x15f   : > { %5628 = vmatmul.mubr.msk.bf16.gmra.mrb[4].mxu0 %vm2223_vm6, %v2181_v28  ;;  %v6420_v63 = vunpack.i.h.bf16 %v6418_v2  ;;  %v6419_v52 = vunpack.i.l.bf16 %v6418_v2  ;;  %2722 = vperm.xlu0 %6651, %v2596_v43   ;;  %v1970_v51 = vsel %vm1956_vm15, %v8269_v44, %v6145_v49  ;;  %v2004_v33 = vsel %vm1993_vm1, %v1967_v31, %v6229_v60 }
 0x160   : > { %2727 = vperm.xlu1 %6652, %v2597_v61   ;;  %v2005_v39 = vsel %vm1993_vm1, %v1968_v20, %v6230_v17  ;;  %v6235_v9 = vunpack.i.h.bf16 %v10393_v10  ;;  %v6234_v41 = vunpack.i.l.bf16 %v10393_v10  ;;  %v2041_v44 = vsel %vm2030_vm2, %v2004_v33, %v6319_v11  ;;  %v2605_v33 = vld [vmem:[%s10273_s7 + $0xf8] sm:$0xff] }
 0x161   : > { %v2150_v37 = vsel %vm2141_vm5, %v2113_v35, %v6419_v52  ;;  %v2151_v6 = vsel %vm2141_vm5, %v2114_v40, %v6420_v63  ;;  %v6413_v38 = vpop.permute.xlu0 %6412  ;;  %v2042_v13 = vsel %vm2030_vm2, %v2005_v39, %v6320_v22  ;;  %v6325_v32 = vunpack.i.h.bf16 %v8232_v25  ;;  %v2603_v52 = vld [vmem:[%s10273_s7 + $0xe8] sm:$0xff] }
 0x162   : > { %v6428_v1 = vpop.permute.xlu1 %6427  ;;  %v2182_v56 = vpack.c.bf16 %v2151_v6, %v2150_v37  ;;  %v6415_v27 = vunpack.i.h.bf16 %v6413_v38  ;;  %v6414_v24 = vunpack.i.l.bf16 %v6413_v38  ;;  %v6324_v42 = vunpack.i.l.bf16 %v8232_v25  ;;  %v10396_v38 = vld [vmem:[#allocation42_spill] sm:$0xff] }
 0x163   : > { %2732 = vperm.xlu0 %6651, %v2598_v12   ;;  %v2079_v7 = vsel %vm2067_vm3, %v2042_v13, %v6405_v45  ;;  %v2078_v19 = vsel %vm2067_vm3, %v2041_v44, %v6404_v30  ;;  %v6430_v36 = vunpack.i.h.bf16 %v6428_v1  ;;  %v6429_v28 = vunpack.i.l.bf16 %v6428_v1  ;;  %v2604_v1 = vld [vmem:[%s10273_s7 + $0xf0] sm:$0xff] }
 0x164   : > { %5631 = vmatprep.mubr.msk.bf16.mxu0 %vm2223_vm6, %v2182_v56  ;;  %2737 = vperm.xlu1 %6652, %v2599_v47   ;;  %v2115_v34 = vsel %vm2104_vm4, %v2078_v19, %v6414_v24  ;;  %v2116_v26 = vsel %vm2104_vm4, %v2079_v7, %v6415_v27  ;;  %v6065_v46 = vunpack.i.h.bf16 %v10394_v15  ;;  %v2006_v2 = vsel %vm1993_vm1, %v1969_v29, %v6234_v41 }
 0x165   : > { %v6423_v62 = vpop.permute.xlu0 %6422  ;;  %v2007_v5 = vsel %vm1993_vm1, %v1970_v51, %v6235_v9  ;;  %v6150_v17 = vunpack.i.h.bf16 %v10395_v16  ;;  %v6149_v60 = vunpack.i.l.bf16 %v10395_v16  ;;  %v2043_v35 = vsel %vm2030_vm2, %v2006_v2, %v6324_v42  ;;  %v10397_v42 = vld [vmem:[#allocation27_spill] sm:$0xff] }
 0x166   : > { %v6425_v54 = vunpack.i.h.bf16 %v6423_v62  ;;  %v6424_v43 = vunpack.i.l.bf16 %v6423_v62  ;;  %v6438_v31 = vpop.permute.xlu1 %6437  ;;  %v2044_v40 = vsel %vm2030_vm2, %v2007_v5, %v6325_v32  ;;  %v2080_v22 = vsel %vm2067_vm3, %v2043_v35, %v6429_v28  ;;  %v2608_v35 = vld [vmem:[%s10273_s7 + $0x110] sm:$0xff] }
 0x167   : > { %2742 = vperm.xlu0 %6651, %v2600_v58   ;;  %v6440_v53 = vunpack.i.h.bf16 %v6438_v31  ;;  %v6439_v49 = vunpack.i.l.bf16 %v6438_v31  ;;  %v2081_v11 = vsel %vm2067_vm3, %v2044_v40, %v6430_v36  ;;  %v6240_v47 = vunpack.i.h.bf16 %v10396_v38  ;;  %v2607_v36 = vld [vmem:[%s10273_s7 + $0x108] sm:$0xff] }
 0x168   : > { %v2152_v25 = vsel %vm2141_vm5, %v2115_v34, %v6424_v43  ;;  %v2153_v61 = vsel %vm2141_vm5, %v2116_v26, %v6425_v54  ;;  %2747 = vperm.xlu1 %6652, %v2601_v55   ;;  %v6239_v20 = vunpack.i.l.bf16 %v10396_v38  ;;  %v6330_v56 = vunpack.i.h.bf16 %v8201_v4  ;;  %v10398_v54 = vld [vmem:[#allocation28_spill] sm:$0xff] }
 0x169   : > { %v6433_v21 = vpop.permute.xlu0 %6432  ;;  %v2183_v63 = vpack.c.bf16 %v2153_v61, %v2152_v25  ;;  %v2117_v45 = vsel %vm2104_vm4, %v2080_v22, %v6439_v49  ;;  %v2118_v30 = vsel %vm2104_vm4, %v2081_v11, %v6440_v53  ;;  %v6329_v29 = vunpack.i.l.bf16 %v8201_v4 }
 0x16a   : > { %v6448_v12 = vpop.permute.xlu1 %6447  ;;  %v6064_v39 = vunpack.i.l.bf16 %v10394_v15  ;;  %v6435_v10 = vunpack.i.h.bf16 %v6433_v21  ;;  %v6434_v9 = vunpack.i.l.bf16 %v6433_v21  ;;  %v1971_v44 = vsel %vm1956_vm15, %v8258_v48, %v6149_v60  ;;  %v2606_v48 = vld [vmem:[%s10273_s7 + $0x100] sm:$0xff] }
 0x16b   : > { %5632 = vmatmul.mubr.msk.bf16.gmra.mrb[8].mxu0 %vm2223_vm6, %v2183_v63  ;;  %v6450_v37 = vunpack.i.h.bf16 %v6448_v12  ;;  %v6449_v6 = vunpack.i.l.bf16 %v6448_v12  ;;  %2752 = vperm.xlu0 %6651, %v2602_v3   ;;  %v1972_v4 = vsel %vm1956_vm15, %v8250_v59, %v6150_v17  ;;  %v6160_v62 = vunpack.i.h.bf16 %v10397_v42  ;;  %v10399_v3 = vld [vmem:[#allocation44_spill] sm:$0xff] }
 0x16c   : > { %2757 = vperm.xlu1 %6652, %v2603_v52   ;;  %v6159_v55 = vunpack.i.l.bf16 %v10397_v42  ;;  %v2008_v7 = vsel %vm1993_vm1, %v1971_v44, %v6239_v20  ;;  %v2009_v19 = vsel %vm1993_vm1, %v1972_v4, %v6240_v47  ;;  %v6155_v59 = vunpack.i.h.bf16 %v10398_v54  ;;  %v10400_v47 = vld [vmem:[#allocation7_spill] sm:$0xff] }
 0x16d   : > { %v2154_v51 = vsel %vm2141_vm5, %v2117_v45, %v6449_v6  ;;  %v2155_v27 = vsel %vm2141_vm5, %v2118_v30, %v6450_v37  ;;  %v6443_v24 = vpop.permute.xlu0 %6442  ;;  %v6154_v43 = vunpack.i.l.bf16 %v10398_v54  ;;  %v2045_v31 = vsel %vm2030_vm2, %v2008_v7, %v6329_v29 }
 0x16e   : > { %v8510_v41 = vpop.permute.xlu1 %6457  ;;  %v2184_v58 = vpack.c.bf16 %v2155_v27, %v2154_v51  ;;  %v6445_v13 = vunpack.i.h.bf16 %v6443_v24  ;;  %v6444_v32 = vunpack.i.l.bf16 %v6443_v24  ;;  %v2046_v34 = vsel %vm2030_vm2, %v2009_v19, %v6330_v56  ;;  %v2574_v27 = vld [vmem:[%s10273_s7] sm:$0xff] }
 0x16f   : > { %2762 = vperm.xlu0 %6651, %v2604_v1   ;;  %v2083_v28 = vsel %vm2067_vm3, %v2046_v34, %v6435_v10  ;;  %v2082_v25 = vsel %vm2067_vm3, %v2045_v31, %v6434_v9  ;;  %v6250_v2 = vunpack.i.h.bf16 %v10399_v3  ;;  %v6249_v5 = vunpack.i.l.bf16 %v10399_v3  ;;  %v10401_v1 = vld [vmem:[#allocation45_spill] sm:$0xff] }
 0x170   : > { %5635 = vmatprep.mubr.msk.bf16.mxu0 %vm2223_vm6, %v2184_v58  ;;  %2767 = vperm.xlu1 %6652, %v2605_v33   ;;  %v2119_v21 = vsel %vm2104_vm4, %v2082_v25, %v6444_v32  ;;  %v2120_v63 = vsel %vm2104_vm4, %v2083_v28, %v6445_v13  ;;  %v1936_v52 = vsel %vm1919_vm14, %v8117_v14, %v6064_v39  ;;  %v6460_v12 = vunpack.i.h.bf16 %v8510_v41  ;;  %v2576_v28 = vld [vmem:[%s10273_s7 + $0x10] sm:$0xff] }
 0x171   : > { %v6453_v26 = vpop.permute.xlu0 %6452  ;;  %v1937_v16 = vsel %vm1919_vm14, %v8114_v23, %v6065_v46  ;;  %v1975_v40 = vsel %vm1956_vm15, %v8282_v50, %v6159_v55  ;;  %v6459_v14 = vunpack.i.l.bf16 %v8510_v41  ;;  %v2609_v23 = vld [vmem:[%s10273_s7 + $0x118] sm:$0x3f]  ;;  %v1976_v46 = vsel %vm1956_vm15, %v8278_v57, %v6160_v62  ;;  %v2575_v41 = vld [vmem:[%s10273_s7 + $0x8] sm:$0xff]  ;;  %v565_v25 = vld [vmem:[#allocation2 + $0xd0] sm:$0xff] }
 0x172   : > { %v6455_v61 = vunpack.i.h.bf16 %v6453_v26  ;;  %v6454_v53 = vunpack.i.l.bf16 %v6453_v26  ;;  %v6468_v49 = vpop.permute.xlu1 %6467  ;;  %v1973_v11 = vsel %vm1956_vm15, %v1936_v52, %v6154_v43  ;;  %v5999_v50 = vunpack.i.l.bf16 %v10400_v47 }
 0x173   : > { %2772 = vperm.xlu0 %6651, %v2606_v48   ;;  %v6470_v37 = vunpack.i.h.bf16 %v6468_v49  ;;  %v6469_v6 = vunpack.i.l.bf16 %v6468_v49  ;;  %v1974_v20 = vsel %vm1956_vm15, %v1937_v16, %v6155_v59  ;;  %v2012_v45 = vsel %vm1993_vm1, %v1975_v40, %v6249_v5  ;;  %v2577_v59 = vld [vmem:[%s10273_s7 + $0x18] sm:$0xff]  ;;  %v10402_v5 = vld [vmem:[#allocation8_spill] sm:$0xff] }
 0x174   : > { %v2156_v17 = vsel %vm2141_vm5, %v2119_v21, %v6454_v53  ;;  %v2157_v60 = vsel %vm2141_vm5, %v2120_v63, %v6455_v61  ;;  %2777 = vperm.xlu1 %6652, %v2607_v36   ;;  %v2013_v30 = vsel %vm1993_vm1, %v1976_v46, %v6250_v2  ;;  %v6245_v56 = vunpack.i.h.bf16 %v10401_v1  ;;  %v10403_v63 = vld [vmem:[#allocation14_spill] sm:$0xff] }
 0x175   : > { %v6463_v15 = vpop.permute.xlu0 %6462  ;;  %v2185_v22 = vpack.c.bf16 %v2157_v60, %v2156_v17  ;;  %v6244_v57 = vunpack.i.l.bf16 %v10401_v1  ;;  %v6335_v24 = vunpack.i.h.bf16 %v8274_v18  ;;  %v6334_v33 = vunpack.i.l.bf16 %v8274_v18 }
 0x176   : > { %v6478_v38 = vpop.permute.xlu1 %6477  ;;  %v2049_v39 = vsel %vm2030_vm2, %v2012_v45, %v6459_v14  ;;  %v2050_v10 = vsel %vm2030_vm2, %v2013_v30, %v6460_v12  ;;  %v6465_v4 = vunpack.i.h.bf16 %v6463_v15  ;;  %v6464_v13 = vunpack.i.l.bf16 %v6463_v15  ;;  %v2579_v14 = vld [vmem:[%s10273_s7 + $0x28] sm:$0xff]  ;;  %v10406_v30 = vld [vmem:[#allocation29_spill] sm:$0xff] }
 0x177   : > { %5636 = vmatmul.mubr.msk.bf16.gmra.mrb[12].mxu0 %vm2223_vm6, %v2185_v22  ;;  %2782 = vperm.xlu0 %6651, %v2608_v35   ;;  %v6480_v29 = vunpack.i.h.bf16 %v6478_v38  ;;  %v6479_v51 = vunpack.i.l.bf16 %v6478_v38  ;;  %v2086_v58 = vsel %vm2067_vm3, %v2049_v39, %v6469_v6  ;;  %v2087_v44 = vsel %vm2067_vm3, %v2050_v10, %v6470_v37  ;;  %v564_v22 = vld [vmem:[#allocation2 + $0xc8] sm:$0xff]  ;;  %v2578_v38 = vld [vmem:[%s10273_s7 + $0x20] sm:$0xff] }
 0x178   : > { %2787 = vperm.xlu1 %6652, %v2609_v23   ;;  %v2010_v7 = vsel %vm1993_vm1, %v1973_v11, %v6244_v57  ;;  %v2011_v19 = vsel %vm1993_vm1, %v1974_v20, %v6245_v56  ;;  %v5995_v21 = vunpack.i.h.bf16 %v10402_v5  ;;  %v6080_v52 = vunpack.i.h.bf16 %v10403_v63  ;;  %v10404_v23 = vld [vmem:[#allocation15_spill] sm:$0xff]  ;;  %v10405_v20 = vld [vmem:[#allocation9_spill] sm:$0xff]  ;;  %v10407_v57 = vld [vmem:[#allocation30_spill] sm:$0xff] }
 0x179   : > { %v6473_v9 = vpop.permute.xlu0 %6472  ;;  %v2123_v48 = vsel %vm2104_vm4, %v2086_v58, %v6479_v51  ;;  %v2124_v54 = vsel %vm2104_vm4, %v2087_v44, %v6480_v29  ;;  %v2047_v43 = vsel %vm2030_vm2, %v2010_v7, %v6334_v33  ;;  %v2048_v31 = vsel %vm2030_vm2, %v2011_v19, %v6335_v24  ;;  %v2581_v58 = vld [vmem:[%s10273_s7 + $0x38] sm:$0xff]  ;;  %v10409_v44 = vld [vmem:[#allocation57_spill] sm:$0xff] }
 0x17a   : > { %v6488_v32 = vpop.permute.xlu1 %6487  ;;  %v6475_v42 = vunpack.i.h.bf16 %v6473_v9  ;;  %v6474_v62 = vunpack.i.l.bf16 %v6473_v9  ;;  %v2084_v61 = vsel %vm2067_vm3, %v2047_v43, %v6464_v13  ;;  %v2085_v53 = vsel %vm2067_vm3, %v2048_v31, %v6465_v4  ;;  %v10410_v13 = vld [vmem:[#allocation56_spill] sm:$0xff] }
 0x17b   : > { %v6490_v55 = vunpack.i.h.bf16 %v6488_v32  ;;  %v6489_v18 = vunpack.i.l.bf16 %v6488_v32  ;;  %2612 = vperm.xlu0 %6651, %v2574_v27   ;;  %v6079_v60 = vunpack.i.l.bf16 %v10403_v63  ;;  %v8604_v15 = vsel %vm496_vm0, %v565_v25, %v5999_v50  ;;  %v10408_v27 = vld [vmem:[#allocation46_spill] sm:$0xff]  ;;  %v2582_v63 = vld [vmem:[%s10273_s7 + $0x40] sm:$0xff] }
 0x17c   : > { %2617 = vperm.xlu1 %6652, %v2575_v41   ;;  %v2121_v16 = vsel %vm2104_vm4, %v2084_v61, %v6474_v62  ;;  %v2122_v17 = vsel %vm2104_vm4, %v2085_v53, %v6475_v42  ;;  %v6075_v46 = vunpack.i.h.bf16 %v10404_v23  ;;  %v6074_v11 = vunpack.i.l.bf16 %v10404_v23  ;;  %v2583_v61 = vld [vmem:[%s10273_s7 + $0x48] sm:$0xff]  ;;  %v563_v23 = vld [vmem:[#allocation2 + $0xc0] sm:$0xff] }
 0x17d   : > { %v2160_v34 = vsel %vm2141_vm5, %v2123_v48, %v6489_v18  ;;  %v2161_v26 = vsel %vm2141_vm5, %v2124_v54, %v6490_v55  ;;  %v6483_v36 = vpop.permute.xlu0 %6482  ;;  %v5994_v47 = vunpack.i.l.bf16 %v10402_v5  ;;  %v6010_v45 = vunpack.i.h.bf16 %v10405_v20 }
 0x17e   : > { %v6485_v49 = vunpack.i.h.bf16 %v6483_v36  ;;  %v6484_v3 = vunpack.i.l.bf16 %v6483_v36  ;;  %v6498_v2 = vpop.permute.xlu1 %6497  ;;  %v2187_v12 = vpack.c.bf16 %v2161_v26, %v2160_v34  ;;  %v6170_v1 = vunpack.i.h.bf16 %v10406_v30  ;;  %v10411_v34 = vld [vmem:[#allocation47_spill] sm:$0xff] }
 0x17f   : > { %2627 = vperm.xlu0 %6651, %v2577_v59   ;;  %v6169_v50 = vunpack.i.l.bf16 %v10406_v30  ;;  %v6165_v29 = vunpack.i.h.bf16 %v10407_v57  ;;  %v6164_v51 = vunpack.i.l.bf16 %v10407_v57  ;;  %v6260_v24 = vunpack.i.h.bf16 %v10408_v27  ;;  %v2584_v57 = vld [vmem:[%s10273_s7 + $0x50] sm:$0xff] }
 0x180   : > { %v2158_v35 = vsel %vm2141_vm5, %v2121_v16, %v6484_v3  ;;  %v2159_v40 = vsel %vm2141_vm5, %v2122_v17, %v6485_v49  ;;  %2622 = vperm.xlu1 %6652, %v2576_v28   ;;  %v6259_v33 = vunpack.i.l.bf16 %v10408_v27  ;;  %v8623_v39 = vsel %vm496_vm0, %v564_v22, %v5995_v21 }
 0x181   : > { %v8608_v37 = vpop.permute.xlu0 %6492  ;;  %v2186_v6 = vpack.c.bf16 %v2159_v40, %v2158_v35  ;;  %v6009_v10 = vunpack.i.l.bf16 %v10405_v20  ;;  %v1943_v9 = vsel %vm1919_vm14, %v8124_v8, %v6080_v52  ;;  %v1942_v41 = vsel %vm1919_vm14, %v8134_v0, %v6079_v60  ;;  %v2580_v8 = vld [vmem:[%s10273_s7 + $0x30] sm:$0xff] }
 0x182   : > { %v6508_v56 = vpop.permute.xlu1 %6507  ;;  %v1940_v4 = vsel %vm1919_vm14, %v10409_v44, %v6074_v11  ;;  %v1941_v32 = vsel %vm1919_vm14, %v10410_v13, %v6075_v46  ;;  %v6500_v42 = vunpack.i.h.bf16 %v6498_v2  ;;  %v6499_v62 = vunpack.i.l.bf16 %v6498_v2  ;;  %v10412_v44 = vld [vmem:[#allocation16_spill] sm:$0xff] }
 0x183   : > { %5639 = vmatprep.mubr.msk.bf16.mxu0 %vm2223_vm6, %v2186_v6  ;;  %2637 = vperm.xlu0 %6651, %v2579_v14   ;;  %v1979_v0 = vsel %vm1956_vm15, %v1942_v41, %v6169_v50  ;;  %v1980_v18 = vsel %vm1956_vm15, %v1943_v9, %v6170_v1  ;;  %v6510_v7 = vunpack.i.h.bf16 %v6508_v56  ;;  %v6509_v19 = vunpack.i.l.bf16 %v6508_v56 }
 0x184   : > { %5640 = vmatmul.mubr.msk.bf16.gmra.mrb[16].mxu0 %vm2223_vm6, %v2187_v12  ;;  %2632 = vperm.xlu1 %6652, %v2578_v38   ;;  %v1977_v54 = vsel %vm1956_vm15, %v1940_v4, %v6164_v51  ;;  %v1978_v59 = vsel %vm1956_vm15, %v1941_v32, %v6165_v29  ;;  %v2016_v43 = vsel %vm1993_vm1, %v1979_v0, %v6259_v33  ;;  %v6255_v26 = vunpack.i.h.bf16 %v10411_v34  ;;  %v570_v29 = vld [vmem:[#allocation2 + $0xf8] sm:$0xff] }
 0x185   : > { %v6503_v55 = vpop.permute.xlu0 %6502  ;;  %v2017_v31 = vsel %vm1993_vm1, %v1980_v18, %v6260_v24  ;;  %v6254_v36 = vunpack.i.l.bf16 %v10411_v34  ;;  %v2053_v53 = vsel %vm2030_vm2, %v2016_v43, %v6499_v62  ;;  %v6495_v3 = vunpack.i.h.bf16 %v8608_v37  ;;  %v10415_v43 = vld [vmem:[#allocation31_spill] sm:$0xff] }
 0x186   : > { %v6518_v48 = vpop.permute.xlu1 %6517  ;;  %v2054_v49 = vsel %vm2030_vm2, %v2017_v31, %v6500_v42  ;;  %v6494_v2 = vunpack.i.l.bf16 %v8608_v37  ;;  %v2090_v52 = vsel %vm2067_vm3, %v2053_v53, %v6509_v19  ;;  %v6505_v17 = vunpack.i.h.bf16 %v6503_v55 }
 0x187   : > { %2647 = vperm.xlu0 %6651, %v2581_v58   ;;  %v6520_v28 = vunpack.i.h.bf16 %v6518_v48  ;;  %v6519_v25 = vunpack.i.l.bf16 %v6518_v48  ;;  %v2091_v16 = vsel %vm2067_vm3, %v2054_v49, %v6510_v7  ;;  %v6504_v60 = vunpack.i.l.bf16 %v6503_v55  ;;  %v569_v58 = vld [vmem:[#allocation2 + $0xf0] sm:$0xff] }
 0x188   : > { %2642 = vperm.xlu1 %6652, %v2580_v8   ;;  %v2014_v46 = vsel %vm1993_vm1, %v1977_v54, %v6254_v36  ;;  %v2015_v11 = vsel %vm1993_vm1, %v1978_v59, %v6255_v26  ;;  %v1907_v41 = vsel %vm496_vm0, %v563_v23, %v5994_v47  ;;  %v6090_v4 = vunpack.i.h.bf16 %v10412_v44  ;;  %v10413_v47 = vld [vmem:[#allocation17_spill] sm:$0xff]  ;;  %v10414_v54 = vld [vmem:[#allocation10_spill] sm:$0xff] }
 0x189   : > { %v6513_v21 = vpop.permute.xlu0 %6512  ;;  %v2127_v37 = vsel %vm2104_vm4, %v2090_v52, %v6519_v25  ;;  %v2128_v6 = vsel %vm2104_vm4, %v2091_v16, %v6520_v28  ;;  %v2051_v38 = vsel %vm2030_vm2, %v2014_v46, %v6494_v2  ;;  %v2052_v30 = vsel %vm2030_vm2, %v2015_v11, %v6495_v3  ;;  %v10417_v25 = vld [vmem:[#allocation48_spill] sm:$0xff]  ;;  %v10419_v3 = vld [vmem:[#allocation58_spill] sm:$0xff] }
 0x18a   : > { %v6528_v35 = vpop.permute.xlu1 %6527  ;;  %v6515_v40 = vunpack.i.h.bf16 %v6513_v21  ;;  %v6514_v12 = vunpack.i.l.bf16 %v6513_v21  ;;  %v2088_v51 = vsel %vm2067_vm3, %v2051_v38, %v6504_v60  ;;  %v2089_v27 = vsel %vm2067_vm3, %v2052_v30, %v6505_v17 }
 0x18b   : > { %v6530_v14 = vunpack.i.h.bf16 %v6528_v35  ;;  %v6529_v22 = vunpack.i.l.bf16 %v6528_v35  ;;  %2657 = vperm.xlu0 %6651, %v2583_v61   ;;  %v6089_v42 = vunpack.i.l.bf16 %v10412_v44  ;;  %v8686_v5 = vsel %vm496_vm0, %v570_v29, %v6010_v45  ;;  %v10416_v45 = vld [vmem:[#allocation32_spill] sm:$0xff] }
 0x18c   : > { %2652 = vperm.xlu1 %6652, %v2582_v63   ;;  %v2125_v13 = vsel %vm2104_vm4, %v2088_v51, %v6514_v12  ;;  %v2126_v32 = vsel %vm2104_vm4, %v2089_v27, %v6515_v40  ;;  %v6085_v0 = vunpack.i.h.bf16 %v10413_v47  ;;  %v6084_v18 = vunpack.i.l.bf16 %v10413_v47 }
 0x18d   : > { %v2164_v1 = vsel %vm2141_vm5, %v2127_v37, %v6529_v22  ;;  %v2165_v50 = vsel %vm2141_vm5, %v2128_v6, %v6530_v14  ;;  %v6523_v56 = vpop.permute.xlu0 %6522  ;;  %v8693_v48 = vsel %vm496_vm0, %v569_v58, %v6009_v10  ;;  %v6005_v59 = vunpack.i.h.bf16 %v10414_v54  ;;  %v10418_v10 = vld [vmem:[#allocation11_spill] sm:$0xff]  ;;  %v10420_v37 = vld [vmem:[#allocation49_spill] sm:$0xff] }
 0x18e   : > { %v6525_v24 = vunpack.i.h.bf16 %v6523_v56  ;;  %v6524_v33 = vunpack.i.l.bf16 %v6523_v56  ;;  %v6538_v9 = vpop.permute.xlu1 %6537  ;;  %v2189_v8 = vpack.c.bf16 %v2165_v50, %v2164_v1  ;;  %v6180_v31 = vunpack.i.h.bf16 %v10415_v43 }
 0x18f   : > { %v6179_v34 = vunpack.i.l.bf16 %v10415_v43  ;;  %v6175_v36 = vunpack.i.h.bf16 %v10416_v45  ;;  %v6174_v28 = vunpack.i.l.bf16 %v10416_v45  ;;  %v6270_v61 = vunpack.i.h.bf16 %v10417_v25  ;;  %v567_v45 = vld [vmem:[#allocation2 + $0xe0] sm:$0xff] }
 0x190   : > { %v2162_v62 = vsel %vm2141_vm5, %v2125_v13, %v6524_v33  ;;  %v2163_v55 = vsel %vm2141_vm5, %v2126_v32, %v6525_v24  ;;  %2662 = vperm.xlu1 %6652, %v2584_v57   ;;  %v6269_v53 = vunpack.i.l.bf16 %v10417_v25  ;;  %v6004_v20 = vunpack.i.l.bf16 %v10414_v54 }
 0x191   : > { %v6533_v7 = vpop.permute.xlu0 %6532  ;;  %v2188_v19 = vpack.c.bf16 %v2163_v55, %v2162_v62  ;;  %v6020_v49 = vunpack.i.h.bf16 %v10418_v10  ;;  %v1947_v2 = vsel %vm1919_vm14, %v10419_v3, %v6090_v4  ;;  %v1946_v21 = vsel %vm1919_vm14, %v8604_v15, %v6089_v42 }
 0x192   : > { %v6548_v26 = vpop.permute.xlu1 %6547  ;;  %v1944_v63 = vsel %vm1919_vm14, %v1907_v41, %v6084_v18  ;;  %v1945_v52 = vsel %vm1919_vm14, %v8623_v39, %v6085_v0  ;;  %v6540_v16 = vunpack.i.h.bf16 %v6538_v9  ;;  %v6539_v17 = vunpack.i.l.bf16 %v6538_v9 }
 0x193   : > { %5643 = vmatprep.mubr.msk.bf16.mxu0 %vm2223_vm6, %v2188_v19  ;;  %v1983_v35 = vsel %vm1956_vm15, %v1946_v21, %v6179_v34  ;;  %v1984_v40 = vsel %vm1956_vm15, %v1947_v2, %v6180_v31  ;;  %v6550_v12 = vunpack.i.h.bf16 %v6548_v26  ;;  %v6549_v14 = vunpack.i.l.bf16 %v6548_v26 }
 0x194   : > { %5644 = vmatmul.mubr.msk.bf16.gmra.mrb[20].mxu0 %vm2223_vm6, %v2189_v8  ;;  %v1981_v23 = vsel %vm1956_vm15, %v1944_v63, %v6174_v28  ;;  %v1982_v15 = vsel %vm1956_vm15, %v1945_v52, %v6175_v36  ;;  %v2020_v46 = vsel %vm1993_vm1, %v1983_v35, %v6269_v53  ;;  %v2021_v11 = vsel %vm1993_vm1, %v1984_v40, %v6270_v61  ;;  %v10421_v28 = vld [vmem:[#allocation18_spill] sm:$0xff] }
 0x195   : > { %v6543_v60 = vpop.permute.xlu0 %6542  ;;  %v6265_v39 = vunpack.i.h.bf16 %v10420_v37  ;;  %v6264_v6 = vunpack.i.l.bf16 %v10420_v37  ;;  %v2057_v1 = vsel %vm2030_vm2, %v2020_v46, %v6539_v17  ;;  %v2058_v50 = vsel %vm2030_vm2, %v2021_v11, %v6540_v16  ;;  %v10422_v16 = vld [vmem:[#allocation19_spill] sm:$0xff]  ;;  %v10425_v37 = vld [vmem:[#allocation34_spill] sm:$0xff] }
 0x196   : > { %v6558_v22 = vpop.permute.xlu1 %6557  ;;  %v6535_v56 = vunpack.i.h.bf16 %v6533_v7  ;;  %v6534_v57 = vunpack.i.l.bf16 %v6533_v7  ;;  %v2094_v51 = vsel %vm2067_vm3, %v2057_v1, %v6549_v14  ;;  %v2095_v27 = vsel %vm2067_vm3, %v2058_v50, %v6550_v12  ;;  %v568_v7 = vld [vmem:[#allocation2 + $0xe8] sm:$0xff] }
 0x197   : > { %v6560_v38 = vunpack.i.h.bf16 %v6558_v22  ;;  %v6559_v30 = vunpack.i.l.bf16 %v6558_v22  ;;  %v6545_v24 = vunpack.i.h.bf16 %v6543_v60  ;;  %v6544_v33 = vunpack.i.l.bf16 %v6543_v60  ;;  %v10423_v14 = vld [vmem:[#allocation12_spill] sm:$0xff] }
 0x198   : > { %v2018_v13 = vsel %vm1993_vm1, %v1981_v23, %v6264_v6  ;;  %v2019_v32 = vsel %vm1993_vm1, %v1982_v15, %v6265_v39  ;;  %v6019_v36 = vunpack.i.l.bf16 %v10418_v10  ;;  %v6100_v25 = vunpack.i.h.bf16 %v10421_v28  ;;  %v10424_v23 = vld [vmem:[#allocation33_spill] sm:$0xff]  ;;  %v10426_v6 = vld [vmem:[#allocation50_spill] sm:$0xff]  ;;  %v10427_v50 = vld [vmem:[#allocation20_spill] sm:$0xff] }
 0x199   : > { %v6553_v29 = vpop.permute.xlu0 %6552  ;;  %v2131_v42 = vsel %vm2104_vm4, %v2094_v51, %v6559_v30  ;;  %v2132_v62 = vsel %vm2104_vm4, %v2095_v27, %v6560_v38  ;;  %v2055_v55 = vsel %vm2030_vm2, %v2018_v13, %v6534_v57  ;;  %v2056_v8 = vsel %vm2030_vm2, %v2019_v32, %v6535_v56  ;;  %v10428_v32 = vld [vmem:[#allocation51_spill] sm:$0xff] }
 0x19a   : > { %v6568_v9 = vpop.permute.xlu1 %6567  ;;  %v6555_v41 = vunpack.i.h.bf16 %v6553_v29  ;;  %v6554_v58 = vunpack.i.l.bf16 %v6553_v29  ;;  %v2092_v19 = vsel %vm2067_vm3, %v2055_v55, %v6544_v33  ;;  %v2093_v43 = vsel %vm2067_vm3, %v2056_v8, %v6545_v24 }
 0x19b   : > { %v6570_v44 = vunpack.i.h.bf16 %v6568_v9  ;;  %v6569_v4 = vunpack.i.l.bf16 %v6568_v9  ;;  %v6099_v3 = vunpack.i.l.bf16 %v10421_v28  ;;  %v1912_v52 = vsel %vm496_vm0, %v568_v7, %v6005_v59 }
 0x19c   : > { %v2129_v61 = vsel %vm2104_vm4, %v2092_v19, %v6554_v58  ;;  %v2130_v53 = vsel %vm2104_vm4, %v2093_v43, %v6555_v41  ;;  %v6095_v17 = vunpack.i.h.bf16 %v10422_v16  ;;  %v6094_v60 = vunpack.i.l.bf16 %v10422_v16 }
 0x19d   : > { %v2168_v47 = vsel %vm2141_vm5, %v2131_v42, %v6569_v4  ;;  %v2169_v0 = vsel %vm2141_vm5, %v2132_v62, %v6570_v44  ;;  %v6563_v18 = vpop.permute.xlu0 %6562  ;;  %v1911_v12 = vsel %vm496_vm0, %v567_v45, %v6004_v20  ;;  %v6015_v22 = vunpack.i.h.bf16 %v10423_v14 }
 0x19e   : > { %v6565_v31 = vunpack.i.h.bf16 %v6563_v18  ;;  %v6564_v34 = vunpack.i.l.bf16 %v6563_v18  ;;  %v6578_v26 = vpop.permute.xlu1 %6577  ;;  %v2191_v63 = vpack.c.bf16 %v2169_v0, %v2168_v47  ;;  %v6190_v15 = vunpack.i.h.bf16 %v10424_v23 }
 0x19f   : > { %v6189_v46 = vunpack.i.l.bf16 %v10424_v23  ;;  %v6185_v39 = vunpack.i.h.bf16 %v10425_v37  ;;  %v6184_v59 = vunpack.i.l.bf16 %v10425_v37  ;;  %v6280_v38 = vunpack.i.h.bf16 %v10426_v6  ;;  %v573_v37 = vld [vmem:[#allocation2 + $0x110] sm:$0xff] }
 0x1a0   : > { %v2166_v2 = vsel %vm2141_vm5, %v2129_v61, %v6564_v34  ;;  %v2167_v21 = vsel %vm2141_vm5, %v2130_v53, %v6565_v31  ;;  %v6279_v30 = vunpack.i.l.bf16 %v10426_v6  ;;  %v6014_v54 = vunpack.i.l.bf16 %v10423_v14 }
 0x1a1   : > { %v6573_v35 = vpop.permute.xlu0 %6572  ;;  %v2190_v40 = vpack.c.bf16 %v2167_v21, %v2166_v2  ;;  %v1951_v20 = vsel %vm1919_vm14, %v8686_v5, %v6100_v25  ;;  %v1950_v1 = vsel %vm1919_vm14, %v8693_v48, %v6099_v3  ;;  %v6110_v56 = vunpack.i.h.bf16 %v10427_v50 }
 0x1a2   : > { %v6588_v11 = vpop.permute.xlu1 %6587  ;;  %v1948_v57 = vsel %vm1919_vm14, %v1911_v12, %v6094_v60  ;;  %v1949_v29 = vsel %vm1919_vm14, %v1912_v52, %v6095_v17  ;;  %v6580_v51 = vunpack.i.h.bf16 %v6578_v26  ;;  %v6579_v27 = vunpack.i.l.bf16 %v6578_v26 }
 0x1a3   : > { %5647 = vmatprep.mubr.msk.bf16.mxu0 %vm2223_vm6, %v2190_v40  ;;  %v1987_v33 = vsel %vm1956_vm15, %v1950_v1, %v6189_v46  ;;  %v1988_v9 = vsel %vm1956_vm15, %v1951_v20, %v6190_v15  ;;  %v6590_v41 = vunpack.i.h.bf16 %v6588_v11  ;;  %v6589_v5 = vunpack.i.l.bf16 %v6588_v11  ;;  %v574_v40 = vld [vmem:[#allocation2 + $0x118] sm:$0x3f] }
 0x1a4   : > { %5648 = vmatmul.mubr.msk.bf16.gmra.mrb[24].mxu0 %vm2223_vm6, %v2191_v63  ;;  %v1985_v48 = vsel %vm1956_vm15, %v1948_v57, %v6184_v59  ;;  %v1986_v44 = vsel %vm1956_vm15, %v1949_v29, %v6185_v39  ;;  %v2024_v4 = vsel %vm1993_vm1, %v1987_v33, %v6279_v30  ;;  %v2025_v13 = vsel %vm1993_vm1, %v1988_v9, %v6280_v38  ;;  %v571_v39 = vld [vmem:[#allocation2 + $0x100] sm:$0xff]  ;;  %v572_v59 = vld [vmem:[#allocation2 + $0x108] sm:$0xff]  ;;  %v10429_v38 = vld [vmem:[#allocation21_spill] sm:$0xff] }
 0x1a5   : > { %v6583_v24 = vpop.permute.xlu0 %6582  ;;  %v6275_v42 = vunpack.i.h.bf16 %v10428_v32  ;;  %v6274_v62 = vunpack.i.l.bf16 %v10428_v32  ;;  %v2061_v47 = vsel %vm2030_vm2, %v2024_v4, %v6579_v27  ;;  %v2062_v0 = vsel %vm2030_vm2, %v2025_v13, %v6580_v51  ;;  %v10430_v33 = vld [vmem:[#allocation35_spill] sm:$0xff] }
 0x1a6   : > { %v6598_v58 = vpop.permute.xlu1 %6597  ;;  %v6575_v18 = vunpack.i.h.bf16 %v6573_v35  ;;  %v6574_v7 = vunpack.i.l.bf16 %v6573_v35  ;;  %v2098_v43 = vsel %vm2067_vm3, %v2061_v47, %v6589_v5  ;;  %v2099_v31 = vsel %vm2067_vm3, %v2062_v0, %v6590_v41 }
 0x1a7   : > { %v6600_v55 = vunpack.i.h.bf16 %v6598_v58  ;;  %v6599_v8 = vunpack.i.l.bf16 %v6598_v58  ;;  %v6585_v34 = vunpack.i.h.bf16 %v6583_v24  ;;  %v6584_v26 = vunpack.i.l.bf16 %v6583_v24 }
 0x1a8   : > { %v2022_v3 = vsel %vm1993_vm1, %v1985_v48, %v6274_v62  ;;  %v2023_v2 = vsel %vm1993_vm1, %v1986_v44, %v6275_v42  ;;  %v6109_v6 = vunpack.i.l.bf16 %v10427_v50  ;;  %v6105_v30 = vunpack.i.h.bf16 %v10429_v38  ;;  %v10432_v62 = vld [vmem:[#allocation52_spill] sm:$0xff] }
 0x1a9   : > { %v6593_v19 = vpop.permute.xlu0 %6592  ;;  %v2135_v21 = vsel %vm2104_vm4, %v2098_v43, %v6599_v8  ;;  %v2136_v63 = vsel %vm2104_vm4, %v2099_v31, %v6600_v55  ;;  %v2059_v52 = vsel %vm2030_vm2, %v2022_v3, %v6574_v7  ;;  %v2060_v16 = vsel %vm2030_vm2, %v2023_v2, %v6575_v18 }
 0x1aa   : > { %v6608_v45 = vpop.permute.xlu1 %6607  ;;  %v6595_v28 = vunpack.i.h.bf16 %v6593_v19  ;;  %v6594_v25 = vunpack.i.l.bf16 %v6593_v19  ;;  %v2096_v12 = vsel %vm2067_vm3, %v2059_v52, %v6584_v26  ;;  %v2097_v23 = vsel %vm2067_vm3, %v2060_v16, %v6585_v34 }
 0x1ab   : > { %v6610_v61 = vunpack.i.h.bf16 %v6608_v45  ;;  %v6609_v53 = vunpack.i.l.bf16 %v6608_v45  ;;  %v6104_v57 = vunpack.i.l.bf16 %v10429_v38  ;;  %v1918_v24 = vsel %vm496_vm0, %v574_v40, %v6020_v49  ;;  %v10431_v49 = vld [vmem:[#allocation36_spill] sm:$0xff] }
 0x1ac   : > { %v2133_v20 = vsel %vm2104_vm4, %v2096_v12, %v6594_v25  ;;  %v2134_v1 = vsel %vm2104_vm4, %v2097_v23, %v6595_v28  ;;  %v6199_v9 = vunpack.i.l.bf16 %v10430_v33  ;;  %v1917_v58 = vsel %vm496_vm0, %v573_v37, %v6019_v36  ;;  %v10433_v28 = vld [vmem:[#allocation53_spill] sm:$0xff] }
 0x1ad   : > { %v2172_v17 = vsel %vm2141_vm5, %v2135_v21, %v6609_v53  ;;  %v2173_v60 = vsel %vm2141_vm5, %v2136_v63, %v6610_v61  ;;  %v6603_v35 = vpop.permute.xlu0 %6602  ;;  %v1916_v48 = vsel %vm496_vm0, %v572_v59, %v6015_v22  ;;  %v1915_v44 = vsel %vm496_vm0, %v571_v39, %v6014_v54 }
 0x1ae   : > { %v6605_v15 = vunpack.i.h.bf16 %v6603_v35  ;;  %v6604_v46 = vunpack.i.l.bf16 %v6603_v35  ;;  %v6618_v11 = vpop.permute.xlu1 %6617  ;;  %v2193_v27 = vpack.c.bf16 %v2173_v60, %v2172_v17  ;;  %v6200_v4 = vunpack.i.h.bf16 %v10430_v33 }
 0x1af   : > { %v6195_v32 = vunpack.i.h.bf16 %v10431_v49  ;;  %v6194_v42 = vunpack.i.l.bf16 %v10431_v49  ;;  %v6290_v55 = vunpack.i.h.bf16 %v10432_v62  ;;  %v6289_v10 = vunpack.i.l.bf16 %v10432_v62 }
 0x1b0   : > { %v2170_v29 = vsel %vm2141_vm5, %v2133_v20, %v6604_v46  ;;  %v2171_v51 = vsel %vm2141_vm5, %v2134_v1, %v6605_v15  ;;  %v1955_v36 = vsel %vm1919_vm14, %v1918_v24, %v6110_v56  ;;  %v1954_v14 = vsel %vm1919_vm14, %v1917_v58, %v6109_v6 }
 0x1b1   : > { %v6613_v41 = vpop.permute.xlu0 %6612  ;;  %v2192_v5 = vpack.c.bf16 %v2171_v51, %v2170_v29  ;;  %v1952_v22 = vsel %vm1919_vm14, %v1915_v44, %v6104_v57  ;;  %v1953_v54 = vsel %vm1919_vm14, %v1916_v48, %v6105_v30  ;;  %v1991_v8 = vsel %vm1956_vm15, %v1954_v14, %v6199_v9 }
 0x1b2   : > { %v6628_v13 = vpop.permute.xlu1 %6627  ;;  %v6620_v47 = vunpack.i.h.bf16 %v6618_v11  ;;  %v6619_v0 = vunpack.i.l.bf16 %v6618_v11  ;;  %v1992_v7 = vsel %vm1956_vm15, %v1955_v36, %v6200_v4  ;;  %v7490_v31 = vmov 0.0  }
 0x1b3   : > { %5651 = vmatprep.mubr.msk.bf16.mxu0 %vm2223_vm6, %v2192_v5  ;;  %v6630_v19 = vunpack.i.h.bf16 %v6628_v13  ;;  %v6629_v43 = vunpack.i.l.bf16 %v6628_v13  ;;  %2463 = vst.msk [vmem:[#allocation3 + $0x131] sm:$0xff] %vm1919_vm14, %v7490_v31  ;;  %2459 = vst.msk [vmem:[#allocation3] sm:$0xff] %vm1919_vm14, %v7490_v31  ;;  %v1989_v56 = vsel %vm1956_vm15, %v1952_v22, %v6194_v42  ;;  %v1990_v34 = vsel %vm1956_vm15, %v1953_v54, %v6195_v32 }
 0x1b4   : > { %5652 = vmatmul.mubr.msk.bf16.gmra.mrb[28].mxu0 %vm2223_vm6, %v2193_v27  ;;  %2460 = vst.msk [vmem:[#allocation3 + $0x8] sm:$0xff] %vm1919_vm14, %v7490_v31  ;;  %2464 = vst.msk [vmem:[#allocation3 + $0x139] sm:$0xff] %vm1919_vm14, %v7490_v31  ;;  %v2028_v26 = vsel %vm1993_vm1, %v1991_v8, %v6289_v10  ;;  %v2029_v45 = vsel %vm1993_vm1, %v1992_v7, %v6290_v55  ;;  %v6285_v25 = vunpack.i.h.bf16 %v10433_v28  ;;  %v6284_v61 = vunpack.i.l.bf16 %v10433_v28 }
 0x1b5   : > { %v6623_v18 = vpop.permute.xlu0 %6622  ;;  %2465 = vst.msk [vmem:[#allocation3 + $0x141] sm:$0x7] %vm2461_vm7, %v7490_v31  ;;  %2462 = vst.msk [vmem:[#allocation3 + $0x10] sm:$0x7] %vm2461_vm7, %v7490_v31  ;;  %v2065_v2 = vsel %vm2030_vm2, %v2028_v26, %v6619_v0  ;;  %v2066_v21 = vsel %vm2030_vm2, %v2029_v45, %v6620_v47  ;;  %v6615_v63 = vunpack.i.h.bf16 %v6613_v41  ;;  %v6614_v52 = vunpack.i.l.bf16 %v6613_v41  ;;  %v8909_v45 = vld [vmem:[%s10268_s2] ss:$0 sm:$0xff] }
 0x1b6   : > { %v6638_v50 = vpop.permute.xlu1 %6637  ;;  %v2102_v17 = vsel %vm2067_vm3, %v2065_v2, %v6629_v43  ;;  %v2103_v60 = vsel %vm2067_vm3, %v2066_v21, %v6630_v19  ;;  %v6625_v35 = vunpack.i.h.bf16 %v6623_v18  ;;  %v6624_v40 = vunpack.i.l.bf16 %v6623_v18 }
 0x1b7   : > { %v6640_v53 = vunpack.i.h.bf16 %v6638_v50  ;;  %v6639_v3 = vunpack.i.l.bf16 %v6638_v50  ;;  %v2026_v37 = vsel %vm1993_vm1, %v1989_v56, %v6284_v61  ;;  %v2027_v39 = vsel %vm1993_vm1, %v1990_v34, %v6285_v25 }
 0x1b8   : > { %v2063_v38 = vsel %vm2030_vm2, %v2026_v37, %v6614_v52  ;;  %v2064_v30 = vsel %vm2030_vm2, %v2027_v39, %v6615_v63 }
 0x1b9   : > { %v6633_v16 = vpop.permute.xlu0 %6632  ;;  %v2139_v59 = vsel %vm2104_vm4, %v2102_v17, %v6639_v3  ;;  %v2140_v6 = vsel %vm2104_vm4, %v2103_v60, %v6640_v53  ;;  %v2100_v29 = vsel %vm2067_vm3, %v2063_v38, %v6624_v40  ;;  %v2101_v51 = vsel %vm2067_vm3, %v2064_v30, %v6625_v35 }
 0x1ba   : > { %v6648_v12 = vpop.permute.xlu1 %6647  ;;  %v6635_v23 = vunpack.i.h.bf16 %v6633_v16  ;;  %v6634_v15 = vunpack.i.l.bf16 %v6633_v16 }
 0x1bb   : > { %v6650_v46 = vunpack.i.h.bf16 %v6648_v12  ;;  %v6649_v11 = vunpack.i.l.bf16 %v6648_v12 }
 0x1bc   : > { %v2137_v33 = vsel %vm2104_vm4, %v2100_v29, %v6634_v15  ;;  %v2138_v9 = vsel %vm2104_vm4, %v2101_v51, %v6635_v23 }
 0x1bd   : > { %v2176_v20 = vsel %vm2141_vm5, %v2139_v59, %v6649_v11  ;;  %v2177_v1 = vsel %vm2141_vm5, %v2140_v6, %v6650_v46  ;;  %v6643_v57 = vpop.permute.xlu0 %6642 }
 0x1be   : > { %v6645_v27 = vunpack.i.h.bf16 %v6643_v57  ;;  %v6644_v24 = vunpack.i.l.bf16 %v6643_v57  ;;  %v2195_v58 = vpack.c.bf16 %v2177_v1, %v2176_v20 }
 0x1c0   : > { %v2174_v41 = vsel %vm2141_vm5, %v2137_v33, %v6644_v24  ;;  %v2175_v5 = vsel %vm2141_vm5, %v2138_v9, %v6645_v27 }
 0x1c1   : > { %v2194_v48 = vpack.c.bf16 %v2175_v5, %v2174_v41 }
 0x1c3   : > { %5655 = vmatprep.mubr.msk.bf16.mxu0 %vm2223_vm6, %v2194_v48 }
 0x1c4   : > { %5656 = vmatmul.mubr.msk.bf16.gmra.mrb[32].mxu0 %vm2223_vm6, %v2195_v58 }
 0x1cb   : > { %v8860_v44 = vpop.permute.xlu1 %2682 }
 0x1ce   : > { %v8864_v13 = vpop.permute.xlu0 %2677 }
 0x1cf   : > { %v8862_v4 = vpop.permute.xlu1 %2687 }
 0x1d2   : > { %v8868_v32 = vpop.permute.xlu0 %2692 }
 0x1d3   : > { %v8866_v49 = vpop.permute.xlu1 %2697 }
 0x1d6   : > { %v8872_v62 = vpop.permute.xlu0 %2702 }
 0x1d7   : > { %v8870_v42 = vpop.permute.xlu1 %2707 }
 0x1da   : > { %v8876_v10 = vpop.permute.xlu0 %2712 }
 0x1db   : > { %v8874_v55 = vpop.permute.xlu1 %2717 }
 0x1de   : > { %v8880_v14 = vpop.permute.xlu0 %2722 }
 0x1df   : > { %v8878_v36 = vpop.permute.xlu1 %2727 }
 0x1e2   : > { %v8884_v54 = vpop.permute.xlu0 %2732 }
 0x1e3   : > { %v8882_v22 = vpop.permute.xlu1 %2737 }
 0x1e6   : > { %v8888_v47 = vpop.permute.xlu0 %2742 }
 0x1e7   : > { %v8886_v8 = vpop.permute.xlu1 %2747 }
 0x1ea   : > { %v8892_v18 = vpop.permute.xlu0 %2752 }
 0x1eb   : > { %v8890_v0 = vpop.permute.xlu1 %2757 }
 0x1ee   : > { %v8896_v19 = vpop.permute.xlu0 %2762 }
 0x1ef   : > { %v8894_v7 = vpop.permute.xlu1 %2767 }
 0x1f2   : > { %v8900_v50 = vpop.permute.xlu0 %2772 }
 0x1f3   : > { %v8898_v43 = vpop.permute.xlu1 %2777 }
 0x1f6   : > { %v8904_v34 = vpop.permute.xlu0 %2782 }
 0x1f7   : > { %v8902_v56 = vpop.permute.xlu1 %2787 }
 0x1fa   : > { %v2613_v28 = vpop.permute.xlu0 %2612 }
 0x1fb   : > { %v2618_v26 = vpop.permute.xlu1 %2617 }
 0x1fe   : > { %v2628_v12 = vpop.permute.xlu0 %2627 }
 0x1ff   : > { %v2623_v16 = vpop.permute.xlu1 %2622 }
 0x202   : > { %v2638_v30 = vpop.permute.xlu0 %2637 }
 0x203   : > { %v2633_v38 = vpop.permute.xlu1 %2632 }
 0x207   : > { %v2643_v9 = vpop.permute.xlu1 %2642 }
 0x226   : > { %v5625_v25 = vpop.f32.mrb[0].mxu0 }
 0x227   : > { %v2325_v61 = vadd.f32 %v5625_v25, %v8909_v45  ;;  %v2316_v53 = vpop.f32.mrb[1].mxu0 }
 0x228   : > { %v2317_v3 = vadd.f32 %v8909_v45, %v2316_v53  ;;  %v5626_v2 = vpop.f32.mrb[2].mxu0 }
 0x229   : > { %v2504_v21 = vmul.f32 0.2, %v2325_v61  ;;  %v2328_v63 = vadd.f32 %v5626_v2, %v8909_v45  ;;  %v2319_v52 = vpop.f32.mrb[3].mxu0  ;;  %vm2468_vm8 = vcmp.ge.f32.partialorder %v2325_v61, 0.0 }
 0x22a   : > { %v2502_v17 = vmul.f32 0.2, %v2317_v3  ;;  %vm2466_vm9 = vcmp.ge.f32.partialorder %v2317_v3, 0.0  ;;  %v2320_v60 = vadd.f32 %v8909_v45, %v2319_v52  ;;  %v2653_v52 = vpop.permute.xlu1 %2652 }
 0x22b   : > { %v2505_v35 = vmul.f32 0.2, %v2328_v63  ;;  %v2540_v40 = vsel %vm2468_vm8, %v2325_v61, %v2504_v21  ;;  %vm2469_vm10 = vcmp.ge.f32.partialorder %v2328_v63, 0.0 }
 0x22c   : > { %v2538_v23 = vsel %vm2466_vm9, %v2317_v3, %v2502_v17  ;;  %vm2467_vm11 = vcmp.ge.f32.partialorder %v2320_v60, 0.0  ;;  %v2503_v15 = vmul.f32 0.2, %v2320_v60  ;;  %v2792_v46 = vmul.f32 %v2623_v16, %v2540_v40 }
 0x22d   : > { %v2790_v11 = vmul.f32 %v2613_v28, %v2538_v23  ;;  %v2541_v37 = vsel %vm2469_vm10, %v2328_v63, %v2505_v35 }
 0x22e   : > { %v2539_v39 = vsel %vm2467_vm11, %v2320_v60, %v2503_v15  ;;  %2828 = vst.msk [vmem:[#allocation3 + $0x23] sm:$0xff] %vm1919_vm14, %v2792_v46  ;;  %v2793_v59 = vmul.f32 %v2628_v12, %v2541_v37  ;;  %v2663_v15 = vpop.permute.xlu1 %2662 }
 0x22f   : > { %2826 = vst.msk [vmem:[#allocation3 + $0x13] sm:$0xff] %vm1919_vm14, %v2790_v11  ;;  %v2791_v6 = vmul.f32 %v2618_v26, %v2539_v39  ;;  %v2648_v26 = vpop.permute.xlu0 %2647 }
 0x230   : > { %2829 = vst.msk [vmem:[#allocation3 + $0x2b] sm:$0xff] %vm1919_vm14, %v2793_v59 }
 0x231   : > { %2827 = vst.msk [vmem:[#allocation3 + $0x1b] sm:$0xff] %vm1919_vm14, %v2791_v6 }
 0x232   : > { %v5629_v20 = vpop.f32.mrb[4].mxu0 }
 0x233   : > { %v2341_v1 = vadd.f32 %v5629_v20, %v8909_v45  ;;  %v2332_v57 = vpop.f32.mrb[5].mxu0 }
 0x234   : > { %v2333_v29 = vadd.f32 %v8909_v45, %v2332_v57  ;;  %v5630_v51 = vpop.f32.mrb[6].mxu0 }
 0x235   : > { %v2508_v27 = vmul.f32 0.2, %v2341_v1  ;;  %v2344_v24 = vadd.f32 %v5630_v51, %v8909_v45  ;;  %v2335_v33 = vpop.f32.mrb[7].mxu0  ;;  %vm2472_vm12 = vcmp.ge.f32.partialorder %v2341_v1, 0.0 }
 0x236   : > { %vm2470_vm15 = vcmp.ge.f32.partialorder %v2333_v29, 0.0  ;;  %v2506_v41 = vmul.f32 0.2, %v2333_v29  ;;  %v2336_v5 = vadd.f32 %v8909_v45, %v2335_v33 }
 0x237   : > { %v2509_v58 = vmul.f32 0.2, %v2344_v24  ;;  %v2544_v48 = vsel %vm2472_vm12, %v2341_v1, %v2508_v27  ;;  %vm2473_vm2 = vcmp.ge.f32.partialorder %v2344_v24, 0.0 }
 0x238   : > { %v2542_v28 = vsel %vm2470_vm15, %v2333_v29, %v2506_v41  ;;  %vm2471_vm4 = vcmp.ge.f32.partialorder %v2336_v5, 0.0  ;;  %v2507_v25 = vmul.f32 0.2, %v2336_v5  ;;  %v2796_v61 = vmul.f32 %v2643_v9, %v2544_v48 }
 0x239   : > { %v2794_v53 = vmul.f32 %v2633_v38, %v2542_v28  ;;  %v2545_v3 = vsel %vm2473_vm2, %v2344_v24, %v2509_v58  ;;  %v2658_v38 = vpop.permute.xlu0 %2657 }
 0x23a   : > { %v2543_v2 = vsel %vm2471_vm4, %v2336_v5, %v2507_v25  ;;  %2832 = vst.msk [vmem:[#allocation3 + $0x43] sm:$0xff] %vm1919_vm14, %v2796_v61  ;;  %v2797_v21 = vmul.f32 %v2648_v26, %v2545_v3 }
 0x23b   : > { %2830 = vst.msk [vmem:[#allocation3 + $0x33] sm:$0xff] %vm1919_vm14, %v2794_v53  ;;  %v2795_v63 = vmul.f32 %v2638_v30, %v2543_v2 }
 0x23c   : > { %2833 = vst.msk [vmem:[#allocation3 + $0x4b] sm:$0xff] %vm1919_vm14, %v2797_v21 }
 0x23d   : > { %2831 = vst.msk [vmem:[#allocation3 + $0x3b] sm:$0xff] %vm1919_vm14, %v2795_v63 }
 0x23e   : > { %v5633_v16 = vpop.f32.mrb[8].mxu0 }
 0x23f   : > { %v2357_v17 = vadd.f32 %v5633_v16, %v8909_v45  ;;  %v2348_v60 = vpop.f32.mrb[9].mxu0 }
 0x240   : > { %v2349_v35 = vadd.f32 %v8909_v45, %v2348_v60  ;;  %v8929_v40 = vpop.f32.mrb[10].mxu0 }
 0x241   : > { %v2512_v12 = vmul.f32 0.2, %v2357_v17  ;;  %v2351_v23 = vpop.f32.mrb[11].mxu0  ;;  %vm2476_vm6 = vcmp.ge.f32.partialorder %v2357_v17, 0.0 }
 0x242   : > { %vm2474_vm7 = vcmp.ge.f32.partialorder %v2349_v35, 0.0  ;;  %v2510_v46 = vmul.f32 0.2, %v2349_v35  ;;  %v2352_v11 = vadd.f32 %v8909_v45, %v2351_v23 }
 0x243   : > { %v2548_v37 = vsel %vm2476_vm6, %v2357_v17, %v2512_v12 }
 0x244   : > { %v2546_v39 = vsel %vm2474_vm7, %v2349_v35, %v2510_v46  ;;  %v2511_v59 = vmul.f32 0.2, %v2352_v11  ;;  %v2800_v6 = vmul.f32 %v2663_v15, %v2548_v37  ;;  %vm2475_vm8 = vcmp.ge.f32.partialorder %v2352_v11, 0.0 }
 0x245   : > { %v2798_v30 = vmul.f32 %v2653_v52, %v2546_v39 }
 0x246   : > { %2836 = vst.msk [vmem:[#allocation3 + $0x63] sm:$0xff] %vm1919_vm14, %v2800_v6  ;;  %v2547_v20 = vsel %vm2475_vm8, %v2352_v11, %v2511_v59 }
 0x247   : > { %2834 = vst.msk [vmem:[#allocation3 + $0x53] sm:$0xff] %vm1919_vm14, %v2798_v30  ;;  %v2799_v1 = vmul.f32 %v2658_v38, %v2547_v20 }
 0x249   : > { %2835 = vst.msk [vmem:[#allocation3 + $0x5b] sm:$0xff] %vm1919_vm14, %v2799_v1 }
 0x24a   : > { %v5637_v57 = vpop.f32.mrb[12].mxu0 }
 0x24b   : > { %v2373_v29 = vadd.f32 %v5637_v57, %v8909_v45  ;;  %v8936_v51 = vpop.f32.mrb[13].mxu0 }
 0x24c   : > { %v5638_v27 = vpop.f32.mrb[14].mxu0 }
 0x24d   : > { %vm2480_vm9 = vcmp.ge.f32.partialorder %v2373_v29, 0.0  ;;  %v2516_v24 = vmul.f32 0.2, %v2373_v29  ;;  %v2376_v33 = vadd.f32 %v5638_v27, %v8909_v45  ;;  %v2367_v9 = vpop.f32.mrb[15].mxu0 }
 0x24e   : > { %v2368_v41 = vadd.f32 %v8909_v45, %v2367_v9 }
 0x24f   : > { %v2552_v5 = vsel %vm2480_vm9, %v2373_v29, %v2516_v24  ;;  %vm2481_vm10 = vcmp.ge.f32.partialorder %v2376_v33, 0.0  ;;  %v2517_v58 = vmul.f32 0.2, %v2376_v33 }
 0x250   : > { %v2804_v48 = vmul.f32 %v8860_v44, %v2552_v5  ;;  %vm2479_vm11 = vcmp.ge.f32.partialorder %v2368_v41, 0.0  ;;  %v2515_v26 = vmul.f32 0.2, %v2368_v41 }
 0x251   : > { %v2553_v28 = vsel %vm2481_vm10, %v2376_v33, %v2517_v58 }
 0x252   : > { %2840 = vst.msk [vmem:[#allocation3 + $0x83] sm:$0xff] %vm1919_vm14, %v2804_v48  ;;  %v2805_v25 = vmul.f32 %v8862_v4, %v2553_v28  ;;  %v2551_v61 = vsel %vm2479_vm11, %v2368_v41, %v2515_v26 }
 0x253   : > { %v2803_v53 = vmul.f32 %v8864_v13, %v2551_v61 }
 0x254   : > { %2841 = vst.msk [vmem:[#allocation3 + $0x8b] sm:$0xff] %vm1919_vm14, %v2805_v25 }
 0x255   : > { %2839 = vst.msk [vmem:[#allocation3 + $0x7b] sm:$0xff] %vm1919_vm14, %v2803_v53 }
 0x257   : > { %v5641_v3 = vpop.f32.mrb[16].mxu0 }
 0x258   : > { %v2389_v2 = vadd.f32 %v5641_v3, %v8909_v45  ;;  %v2380_v21 = vpop.f32.mrb[17].mxu0 }
 0x259   : > { %v2381_v44 = vadd.f32 %v8909_v45, %v2380_v21  ;;  %v5642_v63 = vpop.f32.mrb[18].mxu0 }
 0x25a   : > { %vm2484_vm12 = vcmp.ge.f32.partialorder %v2389_v2, 0.0  ;;  %v2520_v52 = vmul.f32 0.2, %v2389_v2  ;;  %v2392_v16 = vadd.f32 %v5642_v63, %v8909_v45  ;;  %v2383_v17 = vpop.f32.mrb[19].mxu0 }
 0x25b   : > { %vm2482_vm15 = vcmp.ge.f32.partialorder %v2381_v44, 0.0  ;;  %v2518_v4 = vmul.f32 0.2, %v2381_v44  ;;  %v2384_v13 = vadd.f32 %v8909_v45, %v2383_v17  ;;  %v2916_v60 = vld [vmem:[#allocation3 + $0x89] sm:$0xff] }
 0x25c   : > { %v2556_v35 = vsel %vm2484_vm12, %v2389_v2, %v2520_v52  ;;  %vm2485_vm2 = vcmp.ge.f32.partialorder %v2392_v16, 0.0  ;;  %v2521_v12 = vmul.f32 0.2, %v2392_v16  ;;  %v2915_v23 = vld [vmem:[#allocation3 + $0x81] sm:$0xff]  ;;  %v2952_v46 = vld [vmem:[#allocation3 + $0x8a] sm:$0xff] }
 0x25d   : > { %v2951_v15 = vld [vmem:[#allocation3 + $0x82] sm:$0xff]  ;;  %v2808_v11 = vmul.f32 %v8872_v62, %v2556_v35  ;;  %v2554_v37 = vsel %vm2482_vm15, %v2381_v44, %v2518_v4  ;;  %vm2483_vm4 = vcmp.ge.f32.partialorder %v2384_v13, 0.0  ;;  %v2519_v39 = vmul.f32 0.2, %v2384_v13 }
 0x25e   : > { %v2806_v59 = vmul.f32 %v8868_v32, %v2554_v37  ;;  %v2557_v6 = vsel %vm2485_vm2, %v2392_v16, %v2521_v12  ;;  %v6653_v38 = vpack.i.bf16 %v2916_v60, %v2915_v23  ;;  %v8954_v1 = vpack.i.bf16 %v2952_v46, %v2951_v15 }
 0x25f   : > { %2844 = vst.msk [vmem:[#allocation3 + $0xa3] sm:$0xff] %vm1919_vm14, %v2808_v11  ;;  %v2809_v30 = vmul.f32 %v8870_v42, %v2557_v6  ;;  %v2555_v20 = vsel %vm2483_vm4, %v2384_v13, %v2519_v39  ;;  %vm4615_vm2 = vcmask 1043456  }
 0x260   : > { %2842 = vst.msk [vmem:[#allocation3 + $0x93] sm:$0xff] %vm1919_vm14, %v2806_v59  ;;  %v2807_v57 = vmul.f32 %v8866_v49, %v2555_v20  ;;  %6654 = vrot.lane.b32.xlu0 %v6653_v38, %s7482_s27 }
 0x261   : > { %2845 = vst.msk [vmem:[#allocation3 + $0xab] sm:$0xff] %vm1919_vm14, %v2809_v30 }
 0x262   : > { %2843 = vst.msk [vmem:[#allocation3 + $0x9b] sm:$0xff] %vm1919_vm14, %v2807_v57 }
 0x264   : > { %6659 = vrot.lane.b32.xlu0 %v8954_v1, %s7484_s29 }
 0x266   : > { %v2992_v29 = vld [vmem:[#allocation3 + $0xa3] sm:$0xff] }
 0x267   : > { %v5645_v32 = vpop.f32.mrb[20].mxu0  ;;  %v2917_v49 = vld [vmem:[#allocation3 + $0x91] sm:$0xff] }
 0x268   : > { %v2405_v62 = vadd.f32 %v5645_v32, %v8909_v45  ;;  %v2396_v42 = vpop.f32.mrb[21].mxu0  ;;  %v2993_v27 = vld [vmem:[#allocation3 + $0xab] sm:$0xff]  ;;  %v2990_v11 = vld [vmem:[#allocation3 + $0x93] sm:$0xff] }
 0x269   : > { %v2397_v24 = vadd.f32 %v8909_v45, %v2396_v42  ;;  %v5646_v33 = vpop.f32.mrb[22].mxu0  ;;  %v6663_v9 = vpack.i.bf16 %v2993_v27, %v2992_v29  ;;  %v2918_v41 = vld [vmem:[#allocation3 + $0x99] sm:$0xff]  ;;  %v2956_v16 = vld [vmem:[#allocation3 + $0xaa] sm:$0xff]  ;;  %v2955_v13 = vld [vmem:[#allocation3 + $0xa2] sm:$0xff] }
 0x26a   : > { %v2954_v5 = vld [vmem:[#allocation3 + $0x9a] sm:$0xff]  ;;  %vm2488_vm6 = vcmp.ge.f32.partialorder %v2405_v62, 0.0  ;;  %v2524_v58 = vmul.f32 0.2, %v2405_v62  ;;  %v2408_v48 = vadd.f32 %v5646_v33, %v8909_v45  ;;  %v2399_v26 = vpop.f32.mrb[23].mxu0  ;;  %v6668_v28 = vpack.i.bf16 %v2918_v41, %v2917_v49  ;;  %v2953_v53 = vld [vmem:[#allocation3 + $0x92] sm:$0xff] }
 0x26b   : > { %vm2486_vm7 = vcmp.ge.f32.partialorder %v2397_v24, 0.0  ;;  %v2522_v25 = vmul.f32 0.2, %v2397_v24  ;;  %v2400_v61 = vadd.f32 %v8909_v45, %v2399_v26  ;;  %6664 = vrot.lane.b32.xlu0 %v6663_v9, %s7488_s16  ;;  %v6678_v21 = vpack.i.bf16 %v2954_v5, %v2953_v53  ;;  %v3026_v60 = vld [vmem:[#allocation3 + $0x94] sm:$0xff]  ;;  %v3027_v35 = vld [vmem:[#allocation3 + $0x9c] sm:$0xff]  ;;  %v2920_v59 = vld [vmem:[#allocation3 + $0xa9] sm:$0xff] }
 0x26c   : > { %v2560_v3 = vsel %vm2488_vm6, %v2405_v62, %v2524_v58  ;;  %vm2489_vm8 = vcmp.ge.f32.partialorder %v2408_v48, 0.0  ;;  %v2525_v2 = vmul.f32 0.2, %v2408_v48  ;;  %6669 = vrot.lane.b32.xlu1 %v6668_v28, %s7482_s27  ;;  %v2991_v15 = vld [vmem:[#allocation3 + $0x9b] sm:$0xff]  ;;  %v6683_v46 = vpack.i.bf16 %v2956_v16, %v2955_v13  ;;  %v3028_v42 = vld [vmem:[#allocation3 + $0xa4] sm:$0xff] }
 0x26d   : > { %v2812_v44 = vmul.f32 %v8880_v14, %v2560_v3  ;;  %v2558_v63 = vsel %vm2486_vm7, %v2397_v24, %v2522_v25  ;;  %vm2487_vm9 = vcmp.ge.f32.partialorder %v2400_v61, 0.0  ;;  %v2523_v52 = vmul.f32 0.2, %v2400_v61  ;;  %v2919_v39 = vld [vmem:[#allocation3 + $0xa1] sm:$0xff] }
 0x26e   : > { %v2810_v17 = vmul.f32 %v8876_v10, %v2558_v63  ;;  %v2561_v4 = vsel %vm2489_vm8, %v2408_v48, %v2525_v2  ;;  %v7411_v10 = vld [vmem:[%s10269_s3] sm:$0xff]   ;;  %v8981_v37 = vpack.i.bf16 %v3027_v35, %v3026_v60  ;;  %v6698_v6 = vpack.i.bf16 %v2920_v59, %v2919_v39  ;;  %v3065_v25 = vld [vmem:[#allocation3 + $0xa5] sm:$0xff] }
 0x26f   : > { %2848 = vst.msk [vmem:[#allocation3 + $0xc3] sm:$0xff] %vm1919_vm14, %v2812_v44  ;;  %v2813_v12 = vmul.f32 %v8878_v36, %v2561_v4  ;;  %v2559_v23 = vsel %vm2487_vm9, %v2400_v61, %v2523_v52  ;;  %6679 = vrot.lane.b32.xlu0 %v6678_v21, %s7486_s23  ;;  %v6688_v36 = vpack.i.bf16 %v2991_v15, %v2990_v11  ;;  %v7414_v52 = vld [vmem:[%s10269_s3 + $0x18] sm:$0xff]  }
 0x270   : > { %2846 = vst.msk [vmem:[#allocation3 + $0xb3] sm:$0xff] %vm1919_vm14, %v2810_v17  ;;  %v2811_v14 = vmul.f32 %v8874_v55, %v2559_v23  ;;  %6674 = vrot.lane.b32.xlu1 %v6678_v21, %s7484_s29  ;;  %5753 = vmatprep.subr.bf16.mxu1 %v7411_v10  ;;  %v7412_v55 = vld [vmem:[%s10269_s3 + $0x8] sm:$0xff]  }
 0x271   : > { %2849 = vst.msk [vmem:[#allocation3 + $0xcb] sm:$0xff] %vm1919_vm14, %v2813_v12  ;;  %5659 = vmatprep.subr.bf16.mxu0 %v7411_v10  ;;  %5758 = vmatpush3.bf16.msra.mxu1 %v7411_v10  ;;  %v3101_v17 = vld [vmem:[#allocation3 + $0xa6] sm:$0xff]  ;;  %v7415_v12 = vld [vmem:[%s10269_s3 + $0x20] ss:$0 sps:$4 sm:$0xff]  }
 0x272   : > { %2847 = vst.msk [vmem:[#allocation3 + $0xbb] sm:$0xff] %vm1919_vm14, %v2811_v14  ;;  %5660 = vmatpush3.bf16.msra.mxu0 %v7411_v10  ;;  %5754 = vmatprep.subr.bf16.mxu1 %v7412_v55 }
 0x273   : > { %6684 = vrot.lane.b32.xlu0 %v6683_v46, %s7486_s23  ;;  %5661 = vmatprep.subr.bf16.mxu0 %v7412_v55 }
 0x274   : > { %6689 = vrot.lane.b32.xlu1 %v6688_v36, %s7488_s16  ;;  %v4617_v36 = vsel %vm4615_vm2, %v7415_v12, 0 }
 0x275   : > { %5759 = vmatpush3.bf16.msra.mxu1 %v7412_v55 }
 0x276   : > { %5662 = vmatpush3.bf16.msra.mxu0 %v7412_v55 }
 0x277   : > { %v5649_v38 = vpop.f32.mrb[24].mxu0  ;;  %6699 = vrot.lane.b32.xlu0 %v6698_v6, %s7482_s27  ;;  %v3029_v30 = vld [vmem:[#allocation3 + $0xac] sm:$0xff] }
 0x278   : > { %v2421_v20 = vadd.f32 %v5649_v38, %v8909_v45  ;;  %v2412_v57 = vpop.f32.mrb[25].mxu0  ;;  %6694 = vrot.lane.b32.xlu1 %v8981_v37, %s7491_s24  ;;  %v6713_v33 = vpack.i.bf16 %v3029_v30, %v3028_v42  ;;  %v3066_v41 = vld [vmem:[#allocation3 + $0xad] sm:$0xff] }
 0x279   : > { %v2413_v32 = vadd.f32 %v8909_v45, %v2412_v57  ;;  %v5650_v62 = vpop.f32.mrb[26].mxu0  ;;  %v6718_v3 = vpack.i.bf16 %v3066_v41, %v3065_v25  ;;  %v2997_v2 = vld [vmem:[#allocation3 + $0xcb] sm:$0xff]  ;;  %v3030_v13 = vld [vmem:[#allocation3 + $0xb4] sm:$0xff]  ;;  %v3031_v60 = vld [vmem:[#allocation3 + $0xbc] sm:$0xff] }
 0x27a   : > { %vm2492_vm10 = vcmp.ge.f32.partialorder %v2421_v20, 0.0  ;;  %v2528_v29 = vmul.f32 0.2, %v2421_v20  ;;  %v2424_v27 = vadd.f32 %v5650_v62, %v8909_v45  ;;  %v2415_v24 = vpop.f32.mrb[27].mxu0  ;;  %v3102_v63 = vld [vmem:[#allocation3 + $0xae] sm:$0xff]  ;;  %v3104_v35 = vld [vmem:[#allocation3 + $0xbe] sm:$0xff]  ;;  %v9019_v23 = vpack.i.bf16 %v3031_v60, %v3030_v13 }
 0x27b   : > { %vm2490_vm11 = vcmp.ge.f32.partialorder %v2413_v32, 0.0  ;;  %v2526_v9 = vmul.f32 0.2, %v2413_v32  ;;  %v2416_v49 = vadd.f32 %v8909_v45, %v2415_v24  ;;  %6704 = vrot.lane.b32.xlu0 %v6683_v46, %s7484_s29  ;;  %v6723_v4 = vpack.i.bf16 %v3102_v63, %v3101_v17  ;;  %v3067_v14 = vld [vmem:[#allocation3 + $0xb5] sm:$0xff]  ;;  %v3068_v10 = vld [vmem:[#allocation3 + $0xbd] sm:$0xff]  ;;  %v2960_v25 = vld [vmem:[#allocation3 + $0xca] sm:$0xff] }
 0x27c   : > { %v2564_v5 = vsel %vm2492_vm10, %v2421_v20, %v2528_v29  ;;  %vm2493_vm12 = vcmp.ge.f32.partialorder %v2424_v27, 0.0  ;;  %v2529_v58 = vmul.f32 0.2, %v2424_v27  ;;  %6714 = vrot.lane.b32.xlu1 %v6713_v33, %s7492_s26  ;;  %v2922_v11 = vld [vmem:[#allocation3 + $0xb9] sm:$0xff]  ;;  %v6738_v38 = vpack.i.bf16 %v3068_v10, %v3067_v14  ;;  %v2921_v30 = vld [vmem:[#allocation3 + $0xb1] sm:$0xff] }
 0x27d   : > { %v2816_v48 = vmul.f32 %v8888_v47, %v2564_v5  ;;  %v2562_v26 = vsel %vm2490_vm11, %v2413_v32, %v2526_v9  ;;  %vm2491_vm15 = vcmp.ge.f32.partialorder %v2416_v49, 0.0  ;;  %v2527_v28 = vmul.f32 0.2, %v2416_v49  ;;  %v7413_v47 = vld [vmem:[%s10269_s3 + $0x10] sm:$0xff]   ;;  %v2958_v20 = vld [vmem:[#allocation3 + $0xba] sm:$0xff]  ;;  %v2957_v24 = vld [vmem:[#allocation3 + $0xb2] sm:$0xff] }
 0x27e   : > { %v2814_v61 = vmul.f32 %v8884_v54, %v2562_v26  ;;  %v2565_v53 = vsel %vm2493_vm12, %v2424_v27, %v2529_v58  ;;  %5755 = vmatprep.subr.bf16.mxu1 %v7413_v47  ;;  %5663 = vmatprep.subr.bf16.mxu0 %v7413_v47  ;;  %v6748_v42 = vpack.i.bf16 %v2922_v11, %v2921_v30 }
 0x27f   : > { %2852 = vst.msk [vmem:[#allocation3 + $0xe3] sm:$0xff] %vm1919_vm14, %v2816_v48  ;;  %v2817_v21 = vmul.f32 %v8886_v8, %v2565_v53  ;;  %v2563_v44 = vsel %vm2491_vm15, %v2416_v49, %v2527_v28  ;;  %6709 = vrot.lane.b32.xlu0 %v6713_v33, %s7491_s24  ;;  %v2996_v8 = vld [vmem:[#allocation3 + $0xc3] sm:$0xff]  ;;  %5760 = vmatpush3.bf16.msra.mxu1 %v7413_v47  ;;  %vm2861_vm15 = vcmask 62464  }
 0x280   : > { %2850 = vst.msk [vmem:[#allocation3 + $0xd3] sm:$0xff] %vm1919_vm14, %v2814_v61  ;;  %v2815_v54 = vmul.f32 %v8882_v22, %v2563_v44  ;;  %6719 = vrot.lane.b32.xlu1 %v6718_v3, %s7493_s22  ;;  %v6728_v16 = vpack.i.bf16 %v2997_v2, %v2996_v8  ;;  %5664 = vmatpush3.bf16.msra.mxu0 %v7413_v47  ;;  %v3103_v22 = vld [vmem:[#allocation3 + $0xb6] sm:$0xff]  ;;  %v2959_v28 = vld [vmem:[#allocation3 + $0xc2] sm:$0xff] }
 0x281   : > { %2853 = vst.msk [vmem:[#allocation3 + $0xeb] sm:$0xff] %vm1919_vm14, %v2817_v21  ;;  %5756 = vmatprep.subr.bf16.mxu1 %v7414_v52  ;;  %5665 = vmatprep.subr.bf16.mxu0 %v7414_v52  ;;  %v6743_v15 = vpack.i.bf16 %v3104_v35, %v3103_v22  ;;  %v6758_v49 = vpack.i.bf16 %v2958_v20, %v2957_v24  ;;  %v2995_v3 = vld [vmem:[#allocation3 + $0xbb] sm:$0xff]  ;;  %v2994_v2 = vld [vmem:[#allocation3 + $0xb3] sm:$0xff]  ;;  %v3032_v8 = vld [vmem:[#allocation3 + $0xc4] sm:$0xff] }
 0x282   : > { %2851 = vst.msk [vmem:[#allocation3 + $0xdb] sm:$0xff] %vm1919_vm14, %v2815_v54  ;;  %v6768_v21 = vpack.i.bf16 %v2995_v3, %v2994_v2  ;;  %v2923_v44 = vld [vmem:[#allocation3 + $0xc1] sm:$0xff]  ;;  %v2585_v24 = vld [vmem:[%s10273_s7 + $0x58] sm:$0xff] }
 0x283   : > { %6729 = vrot.lane.b32.xlu0 %v6728_v16, %s7488_s16  ;;  %5761 = vmatpush3.bf16.msra.mxu1 %v7414_v52 }
 0x284   : > { %6724 = vrot.lane.b32.xlu1 %v6723_v4, %s7494_s17  ;;  %5666 = vmatpush3.bf16.msra.mxu0 %v7414_v52 }
 0x285   : > { %5873 = vmatprep.subr.msk.bf16.mxu1 %vm4615_vm2, %v7415_v12  ;;  %5872 = vmatprep.subr.msk.bf16.mxu0 %vm4615_vm2, %v7415_v12 }
 0x286   : > { %v3000_v3 = vld [vmem:[#allocation3 + $0xe3] sm:$0xff] }
 0x287   : > { %v5653_v46 = vpop.f32.mrb[28].mxu0  ;;  %6734 = vrot.lane.b32.xlu0 %v9019_v23, %s7492_s26  ;;  %5762 = vmatpush3.bf16.msra.mxu1 %v4617_v36  ;;  %v3033_v47 = vld [vmem:[#allocation3 + $0xcc] sm:$0xff] }
 0x288   : > { %v2437_v39 = vadd.f32 %v5653_v46, %v8909_v45  ;;  %v2428_v59 = vpop.f32.mrb[29].mxu0  ;;  %6744 = vrot.lane.b32.xlu1 %v6743_v15, %s7494_s17  ;;  %5668 = vmatpush3.bf16.msra.mxu0 %v4617_v36  ;;  %v6783_v4 = vpack.i.bf16 %v3033_v47, %v3032_v8  ;;  %v3070_v10 = vld [vmem:[#allocation3 + $0xcd] sm:$0xff] }
 0x289   : > { %v2429_v55 = vadd.f32 %v8909_v45, %v2428_v59  ;;  %v5654_v6 = vpop.f32.mrb[30].mxu0  ;;  %v3034_v13 = vld [vmem:[#allocation3 + $0xd4] sm:$0xff]  ;;  %v3035_v60 = vld [vmem:[#allocation3 + $0xdc] sm:$0xff] }
 0x28a   : > { %vm2496_vm4 = vcmp.ge.f32.partialorder %v2437_v39, 0.0  ;;  %v2532_v57 = vmul.f32 0.2, %v2437_v39  ;;  %v2440_v32 = vadd.f32 %v5654_v6, %v8909_v45  ;;  %v2431_v62 = vpop.f32.mrb[31].mxu0  ;;  %v6803_v11 = vpack.i.bf16 %v3035_v60, %v3034_v13  ;;  %v3071_v30 = vld [vmem:[#allocation3 + $0xd5] sm:$0xff]  ;;  %v3072_v20 = vld [vmem:[#allocation3 + $0xdd] sm:$0xff] }
 0x28b   : > { %vm2494_vm6 = vcmp.ge.f32.partialorder %v2429_v55, 0.0  ;;  %v2530_v29 = vmul.f32 0.2, %v2429_v55  ;;  %v2432_v27 = vadd.f32 %v8909_v45, %v2431_v62  ;;  %6739 = vrot.lane.b32.xlu0 %v6738_v38, %s7493_s22  ;;  %v3106_v62 = vld [vmem:[#allocation3 + $0xce] sm:$0xff]  ;;  %v2927_v13 = vld [vmem:[#allocation3 + $0xe1] sm:$0xff] }
 0x28c   : > { %v2568_v33 = vsel %vm2496_vm4, %v2437_v39, %v2532_v57  ;;  %vm2497_vm7 = vcmp.ge.f32.partialorder %v2440_v32, 0.0  ;;  %v2533_v9 = vmul.f32 0.2, %v2440_v32  ;;  %6749 = vrot.lane.b32.xlu1 %v6748_v42, %s7482_s27  ;;  %v3105_v42 = vld [vmem:[#allocation3 + $0xc6] sm:$0xff]  ;;  %vm4351_vm4 = vcmask 326656  }
 0x28d   : > { %v2820_v41 = vmul.f32 %v8896_v19, %v2568_v33  ;;  %v2566_v5 = vsel %vm2494_vm6, %v2429_v55, %v2530_v29  ;;  %vm2495_vm8 = vcmp.ge.f32.partialorder %v2432_v27, 0.0  ;;  %v2531_v58 = vmul.f32 0.2, %v2432_v27  ;;  %v3069_v55 = vld [vmem:[#allocation3 + $0xc5] sm:$0xff] }
 0x28e   : > { %v2818_v48 = vmul.f32 %v8892_v18, %v2566_v5  ;;  %v2569_v26 = vsel %vm2497_vm7, %v2440_v32, %v2533_v9  ;;  %v9042_v18 = vpack.i.bf16 %v2960_v25, %v2959_v28  ;;  %v6798_v29 = vpack.i.bf16 %v3106_v62, %v3105_v42  ;;  %v2925_v9 = vld [vmem:[#allocation3 + $0xd1] sm:$0xff]  ;;  %v2928_v60 = vld [vmem:[#allocation3 + $0xe9] sm:$0xff] }
 0x28f   : > { %2856 = vst.msk [vmem:[#allocation3 + $0x103] sm:$0xff] %vm1919_vm14, %v2820_v41  ;;  %v2821_v61 = vmul.f32 %v8894_v7, %v2569_v26  ;;  %v2567_v53 = vsel %vm2495_vm8, %v2432_v27, %v2531_v58  ;;  %6759 = vrot.lane.b32.xlu0 %v6758_v49, %s7486_s23  ;;  %v2924_v7 = vld [vmem:[#allocation3 + $0xc9] sm:$0xff]  ;;  %v3107_v27 = vld [vmem:[#allocation3 + $0xd6] sm:$0xff]  ;;  %vm4388_vm6 = vcmask 392192   ;;  %vm4425_vm7 = vcmask 457728  }
 0x290   : > { %2854 = vst.msk [vmem:[#allocation3 + $0xf3] sm:$0xff] %vm1919_vm14, %v2818_v48  ;;  %v2819_v19 = vmul.f32 %v8890_v0, %v2567_v53  ;;  %6754 = vrot.lane.b32.xlu1 %v6758_v49, %s7484_s29  ;;  %v6778_v63 = vpack.i.bf16 %v2924_v7, %v2923_v44  ;;  %v2962_v41 = vld [vmem:[#allocation3 + $0xda] sm:$0xff]  ;;  %v2961_v5 = vld [vmem:[#allocation3 + $0xd2] sm:$0xff]  ;;  %v2963_v48 = vld [vmem:[#allocation3 + $0xe2] sm:$0xff]  ;;  %vm4462_vm8 = vcmask 523264  }
 0x291   : > { %2857 = vst.msk [vmem:[#allocation3 + $0x10b] sm:$0xff] %vm1919_vm14, %v2821_v61  ;;  %v6833_v58 = vpack.i.bf16 %v2962_v41, %v2961_v5  ;;  %v2964_v26 = vld [vmem:[#allocation3 + $0xea] sm:$0xff]  ;;  %v2586_v25 = vld [vmem:[%s10273_s7 + $0x60] sm:$0xff] }
 0x292   : > { %2855 = vst.msk [vmem:[#allocation3 + $0xfb] sm:$0xff] %vm1919_vm14, %v2819_v19  ;;  %v6838_v28 = vpack.i.bf16 %v2964_v26, %v2963_v48  ;;  %v3001_v61 = vld [vmem:[#allocation3 + $0xeb] sm:$0xff]  ;;  %v2999_v53 = vld [vmem:[#allocation3 + $0xdb] sm:$0xff] }
 0x293   : > { %6764 = vrot.lane.b32.xlu0 %v9042_v18, %s7486_s23  ;;  %v6848_v19 = vpack.i.bf16 %v3001_v61, %v3000_v3  ;;  %v3036_v44 = vld [vmem:[#allocation3 + $0xe4] sm:$0xff] }
 0x294   : > { %6769 = vrot.lane.b32.xlu1 %v6768_v21, %s7488_s16 }
 0x297   : > { %v5657_v0 = vpop.f32.mrb[32].mxu0  ;;  %6779 = vrot.lane.b32.xlu0 %v6778_v63, %s7482_s27  ;;  %v3037_v21 = vld [vmem:[#allocation3 + $0xec] sm:$0xff] }
 0x298   : > { %v2453_v52 = vadd.f32 %v5657_v0, %v8909_v45  ;;  %v2444_v54 = vpop.f32.mrb[33].mxu0  ;;  %6774 = vrot.lane.b32.xlu1 %v9019_v23, %s7491_s24  ;;  %v6858_v7 = vpack.i.bf16 %v3037_v21, %v3036_v44  ;;  %v3074_v8 = vld [vmem:[#allocation3 + $0xed] sm:$0xff] }
 0x299   : > { %v2445_v16 = vadd.f32 %v8909_v45, %v2444_v54  ;;  %v5658_v17 = vpop.f32.mrb[34].mxu0  ;;  %v3038_v63 = vld [vmem:[#allocation3 + $0xf4] sm:$0xff]  ;;  %v3039_v47 = vld [vmem:[#allocation3 + $0xfc] sm:$0xff]  ;;  %v2932_v3 = vld [vmem:[#allocation3 + $0x109] sm:$0xff] }
 0x29a   : > { %vm2500_vm9 = vcmp.ge.f32.partialorder %v2453_v52, 0.0  ;;  %v2536_v22 = vmul.f32 0.2, %v2453_v52  ;;  %v2456_v35 = vadd.f32 %v5658_v17, %v8909_v45  ;;  %v2447_v12 = vpop.f32.mrb[35].mxu0  ;;  %v6868_v0 = vpack.i.bf16 %v3039_v47, %v3038_v63  ;;  %v3076_v54 = vld [vmem:[#allocation3 + $0xfd] sm:$0xff]  ;;  %v3073_v17 = vld [vmem:[#allocation3 + $0xe5] sm:$0xff] }
 0x29b   : > { %vm2498_vm10 = vcmp.ge.f32.partialorder %v2445_v16, 0.0  ;;  %v2534_v15 = vmul.f32 0.2, %v2445_v16  ;;  %v2448_v14 = vadd.f32 %v8909_v45, %v2447_v12  ;;  %6784 = vrot.lane.b32.xlu0 %v6783_v4, %s7491_s24  ;;  %v6793_v45 = vpack.i.bf16 %v3070_v10, %v3069_v55  ;;  %v3109_v12 = vld [vmem:[#allocation3 + $0xe6] sm:$0xff]  ;;  %v3111_v10 = vld [vmem:[#allocation3 + $0xf6] sm:$0xff] }
 0x29c   : > { %v2572_v23 = vsel %vm2500_vm9, %v2453_v52, %v2536_v22  ;;  %vm2501_vm11 = vcmp.ge.f32.partialorder %v2456_v35, 0.0  ;;  %v2537_v46 = vmul.f32 0.2, %v2456_v35  ;;  %6789 = vrot.lane.b32.xlu1 %v6783_v4, %s7492_s26  ;;  %v3075_v52 = vld [vmem:[#allocation3 + $0xf5] sm:$0xff]  ;;  %v6873_v4 = vpack.i.bf16 %v3074_v8, %v3073_v17  ;;  %v3113_v21 = vld [vmem:[#allocation3 + $0x106] sm:$0xff] }
 0x29d   : > { %v2824_v36 = vmul.f32 %v8904_v34, %v2572_v23  ;;  %v2570_v39 = vsel %vm2498_vm10, %v2445_v16, %v2534_v15  ;;  %vm2499_vm12 = vcmp.ge.f32.partialorder %v2448_v14, 0.0  ;;  %v2535_v59 = vmul.f32 0.2, %v2448_v14  ;;  %v3110_v22 = vld [vmem:[#allocation3 + $0xee] sm:$0xff]  ;;  %v3112_v23 = vld [vmem:[#allocation3 + $0xfe] sm:$0xff] }
 0x29e   : > { %v2822_v6 = vmul.f32 %v8900_v50, %v2570_v39  ;;  %v2573_v38 = vsel %vm2501_vm11, %v2456_v35, %v2537_v46  ;;  %v6808_v50 = vpack.i.bf16 %v3072_v20, %v3071_v30  ;;  %v6878_v16 = vpack.i.bf16 %v3076_v54, %v3075_v52  ;;  %v2929_v46 = vld [vmem:[#allocation3 + $0xf1] sm:$0xff]  ;;  %v2966_v39 = vld [vmem:[#allocation3 + $0xfa] sm:$0xff] }
 0x29f   : > { %2860 = vst.msk [vmem:[#allocation3 + $0x123] sm:$0xff] %vm1919_vm14, %v2824_v36  ;;  %v2825_v57 = vmul.f32 %v8902_v56, %v2573_v38  ;;  %v2571_v32 = vsel %vm2499_vm12, %v2448_v14, %v2535_v59  ;;  %6804 = vrot.lane.b32.xlu0 %v6803_v11, %s7492_s26  ;;  %v3108_v56 = vld [vmem:[#allocation3 + $0xde] sm:$0xff]  ;;  %v6888_v35 = vpack.i.bf16 %v2928_v60, %v2927_v13  ;;  %v2965_v59 = vld [vmem:[#allocation3 + $0xf2] sm:$0xff]  ;;  %v2968_v38 = vld [vmem:[#allocation3 + $0x10a] sm:$0xff]  ;;  %vm4560_vm9 = vcmask 588800  }
 0x2a0   : > { %2858 = vst.msk [vmem:[#allocation3 + $0x113] sm:$0xff] %vm1919_vm14, %v2822_v6  ;;  %v2823_v34 = vmul.f32 %v8898_v43, %v2571_v32  ;;  %6794 = vrot.lane.b32.xlu1 %v6793_v45, %s7493_s22  ;;  %v6813_v33 = vpack.i.bf16 %v3108_v56, %v3107_v27  ;;  %v2926_v43 = vld [vmem:[#allocation3 + $0xd9] sm:$0xff]  ;;  %v6883_v15 = vpack.i.bf16 %v3110_v22, %v3109_v12  ;;  %v2967_v6 = vld [vmem:[#allocation3 + $0x102] sm:$0xff]  ;;  %v3005_v30 = vld [vmem:[#allocation3 + $0x10b] sm:$0xff]  ;;  %vm7496_vm11 = vmmov 0  }
 0x2a1   : > { %2862 = vst.msk [vmem:[#allocation3 + $0x12b] sm:$0x3f] %vm2861_vm15, %v2825_v57  ;;  %v6818_v49 = vpack.i.bf16 %v2926_v43, %v2925_v9  ;;  %v2930_v14 = vld [vmem:[#allocation3 + $0xf9] sm:$0xff]  ;;  %v6893_v36 = vpack.i.bf16 %v3112_v23, %v3111_v10  ;;  %v6908_v55 = vpack.i.bf16 %v2966_v39, %v2965_v59  ;;  %v9095_v45 = vpack.i.bf16 %v2968_v38, %v2967_v6  ;;  %v3004_v32 = vld [vmem:[#allocation3 + $0x103] sm:$0xff] }
 0x2a2   : > { %2859 = vst.msk [vmem:[#allocation3 + $0x11b] sm:$0xff] %vm1919_vm14, %v2823_v34  ;;  %v3003_v57 = vld [vmem:[#allocation3 + $0xfb] sm:$0xff]  ;;  %v6928_v62 = vpack.i.bf16 %v3005_v30, %v3004_v32  ;;  %v3002_v34 = vld [vmem:[#allocation3 + $0xf3] sm:$0xff] }
 0x2a3   : > { %6809 = vrot.lane.b32.xlu0 %v6808_v50, %s7493_s22  ;;  %v6923_v50 = vpack.i.bf16 %v3003_v57, %v3002_v34  ;;  %v9133_v13 = vld [vmem:[#allocation3 + $0x134] sm:$0xff]  ;;  %v9135_v60 = vld [vmem:[#allocation3 + $0x13c] sm:$0x3f] }
 0x2a4   : > { %6799 = vrot.lane.b32.xlu1 %v6798_v29, %s7494_s17  ;;  %v3040_v29 = vld [vmem:[#allocation3 + $0x104] sm:$0xff]  ;;  %v7028_v32 = vpack.i.bf16 %v9135_v60, %v9133_v13 }
 0x2a6   : > { %v3008_v30 = vld [vmem:[#allocation3 + $0x123] sm:$0xff] }
 0x2a7   : > { %2667 = vperm.xlu0 %6651, %v2585_v24   ;;  %v3041_v42 = vld [vmem:[#allocation3 + $0x10c] sm:$0xff] }
 0x2a8   : > { %6814 = vrot.lane.b32.xlu1 %v6813_v33, %s7494_s17  ;;  %v6938_v56 = vpack.i.bf16 %v3041_v42, %v3040_v29  ;;  %v2933_v52 = vld [vmem:[#allocation3 + $0x111] sm:$0xff]  ;;  %v2973_v12 = vld [vmem:[#allocation3 + $0x12a] sm:$0x3f] }
 0x2a9   : > { %v3042_v24 = vld [vmem:[#allocation3 + $0x114] sm:$0xff]  ;;  %v3043_v33 = vld [vmem:[#allocation3 + $0x11c] sm:$0xff]  ;;  %v9140_v10 = vld [vmem:[#allocation3 + $0x12b] sm:$0x3f] }
 0x2aa   : > { %v9110_v9 = vpack.i.bf16 %v3043_v33, %v3042_v24  ;;  %v3079_v41 = vld [vmem:[#allocation3 + $0x115] sm:$0xff]  ;;  %v3080_v5 = vld [vmem:[#allocation3 + $0x11d] sm:$0xff]  ;;  %v2880_v29 = vld [vmem:[#allocation3 + $0x88] sm:$0xff] }
 0x2ab   : > { %6824 = vrot.lane.b32.xlu0 %v9042_v18, %s7484_s29  ;;  %v2998_v18 = vld [vmem:[#allocation3 + $0xd3] sm:$0xff]  ;;  %v6958_v26 = vpack.i.bf16 %v3080_v5, %v3079_v41  ;;  %v9142_v23 = vld [vmem:[#allocation3 + $0x11b] sm:$0xff]  ;;  %v9148_v59 = vld [vmem:[#allocation3 + $0x124] sm:$0xff] }
 0x2ac   : > { %6819 = vrot.lane.b32.xlu1 %v6818_v49, %s7482_s27  ;;  %v6843_v2 = vpack.i.bf16 %v2999_v53, %v2998_v18  ;;  %v2931_v53 = vld [vmem:[#allocation3 + $0x101] sm:$0xff]  ;;  %v2934_v63 = vld [vmem:[#allocation3 + $0x119] sm:$0x3f] }
 0x2ad   : > { %v3115_v47 = vld [vmem:[#allocation3 + $0x116] sm:$0xff]  ;;  %v6978_v8 = vpack.i.bf16 %v2934_v63, %v2933_v52 }
 0x2ae   : > { %v2969_v22 = vld [vmem:[#allocation3 + $0x112] sm:$0xff] }
 0x2af   : > { %6834 = vrot.lane.b32.xlu0 %v6833_v58, %s7486_s23  ;;  %v3006_v57 = vld [vmem:[#allocation3 + $0x113] sm:$0xff] }
 0x2b0   : > { %6829 = vrot.lane.b32.xlu1 %v6833_v58, %s7484_s29  ;;  %v3078_v58 = vld [vmem:[#allocation3 + $0x10d] sm:$0xff]  ;;  %v7003_v42 = vpack.i.bf16 %v9142_v23, %v3006_v57  ;;  %v2882_v52 = vld [vmem:[#allocation3 + $0x98] sm:$0xff] }
 0x2b3   : > { %6839 = vrot.lane.b32.xlu0 %v6838_v28, %s7486_s23 }
 0x2b4   : > { %2672 = vperm.xlu1 %6652, %v2586_v25  }
 0x2b7   : > { %6849 = vrot.lane.b32.xlu0 %v6848_v19, %s7488_s16  ;;  %v3114_v19 = vld [vmem:[#allocation3 + $0x10e] sm:$0xff] }
 0x2b8   : > { %6844 = vrot.lane.b32.xlu1 %v6843_v2, %s7488_s16  ;;  %v6968_v2 = vpack.i.bf16 %v2932_v3, %v2931_v53 }
 0x2bb   : > { %6859 = vrot.lane.b32.xlu0 %v6858_v7, %s7491_s24 }
 0x2bc   : > { %6854 = vrot.lane.b32.xlu1 %v6803_v11, %s7491_s24  ;;  %v6898_v11 = vpack.i.bf16 %v2930_v14, %v2929_v46  ;;  %v2971_v14 = vld [vmem:[#allocation3 + $0x11a] sm:$0xff] }
 0x2bd   : > { %v6993_v34 = vpack.i.bf16 %v2971_v14, %v2969_v22 }
 0x2bf   : > { %6869 = vrot.lane.b32.xlu0 %v6868_v0, %s7492_s26 }
 0x2c0   : > { %6864 = vrot.lane.b32.xlu1 %v6858_v7, %s7492_s26  ;;  %v6963_v7 = vpack.i.bf16 %v3114_v19, %v3113_v21 }
 0x2c3   : > { %6879 = vrot.lane.b32.xlu0 %v6878_v16, %s7493_s22 }
 0x2c4   : > { %6874 = vrot.lane.b32.xlu1 %v6873_v4, %s7493_s22  ;;  %v2970_v4 = vld [vmem:[#allocation3 + $0x11a] sm:$0x3f] }
 0x2c5   : > { %v6988_v39 = vpack.i.bf16 %v2970_v4, %v2969_v22 }
 0x2c7   : > { %6889 = vrot.lane.b32.xlu0 %v6888_v35, %s7482_s27  ;;  %v2972_v35 = vld [vmem:[#allocation3 + $0x122] sm:$0xff] }
 0x2c8   : > { %6884 = vrot.lane.b32.xlu1 %v6883_v15, %s7494_s17 }
 0x2cb   : > { %6899 = vrot.lane.b32.xlu0 %v6898_v11, %s7482_s27 }
 0x2cc   : > { %6894 = vrot.lane.b32.xlu1 %v6893_v36, %s7494_s17 }
 0x2cf   : > { %6909 = vrot.lane.b32.xlu0 %v6908_v55, %s7484_s29 }
 0x2d0   : > { %6904 = vrot.lane.b32.xlu1 %v6838_v28, %s7484_s29  ;;  %v3077_v28 = vld [vmem:[#allocation3 + $0x105] sm:$0xff] }
 0x2d1   : > { %v6953_v61 = vpack.i.bf16 %v3078_v58, %v3077_v28 }
 0x2d2   : > { %v9097_v20 = vpop.permute.xlu0 %6654 }
 0x2d3   : > { %6919 = vrot.lane.b32.xlu0 %v9095_v45, %s7486_s23  ;;  %v6656_v15 = vunpack.i.l.bf16 %v9097_v20  ;;  %v6657_v46 = vunpack.i.h.bf16 %v9097_v20  ;;  %v2879_v20 = vld [vmem:[#allocation3 + $0x80] sm:$0xff] }
 0x2d4   : > { %6914 = vrot.lane.b32.xlu1 %v6908_v55, %s7486_s23  ;;  %v9150_v55 = vld [vmem:[#allocation3 + $0x12c] sm:$0x3f] }
 0x2d5   : > { %v7018_v33 = vpack.i.bf16 %v9150_v55, %v9148_v59  ;;  %v4224_v41 = vsel %vm1919_vm14, %v2880_v29, %v6657_v46 }
 0x2d6   : > { %v9104_v27 = vpop.permute.xlu0 %6659 }
 0x2d7   : > { %6929 = vrot.lane.b32.xlu0 %v6928_v62, %s7488_s16  ;;  %v6661_v11 = vunpack.i.l.bf16 %v9104_v27  ;;  %v6662_v6 = vunpack.i.h.bf16 %v9104_v27  ;;  %v6998_v62 = vpack.i.bf16 %v2973_v12, %v2972_v35 }
 0x2d8   : > { %6924 = vrot.lane.b32.xlu1 %v6923_v50, %s7488_s16  ;;  %v7008_v50 = vpack.i.bf16 %v9140_v10, %v3008_v30  ;;  %v2881_v10 = vld [vmem:[#allocation3 + $0x90] sm:$0xff] }
 0x2db   : > { %6939 = vrot.lane.b32.xlu0 %v6938_v56, %s7491_s24 }
 0x2dc   : > { %6934 = vrot.lane.b32.xlu1 %v6868_v0, %s7491_s24  ;;  %v3116_v0 = vld [vmem:[#allocation3 + $0x11e] sm:$0xff] }
 0x2dd   : > { %v9108_v43 = vpop.permute.xlu0 %6664  ;;  %v6973_v17 = vpack.i.bf16 %v3116_v0, %v3115_v47 }
 0x2de   : > { %v9112_v49 = vpop.permute.xlu1 %6669 }
 0x2df   : > { %6949 = vrot.lane.b32.xlu0 %v9110_v9, %s7492_s26  ;;  %v6671_v19 = vunpack.i.l.bf16 %v9112_v49 }
 0x2e0   : > { %6944 = vrot.lane.b32.xlu1 %v6938_v56, %s7492_s26  ;;  %v4223_v56 = vsel %vm1919_vm14, %v2879_v20, %v6656_v15 }
 0x2e1   : > { %v9117_v48 = vpop.permute.xlu0 %6679  ;;  %v4259_v5 = vsel %vm1993_vm1, %v4223_v56, %v6661_v11 }
 0x2e2   : > { %v9119_v25 = vpop.permute.xlu1 %6674  ;;  %v6682_v27 = vunpack.i.h.bf16 %v9117_v48  ;;  %v6681_v24 = vunpack.i.l.bf16 %v9117_v48  ;;  %v6672_v48 = vunpack.i.h.bf16 %v9112_v49 }
 0x2e3   : > { %6959 = vrot.lane.b32.xlu0 %v6958_v26, %s7493_s22 }
 0x2e4   : > { %6954 = vrot.lane.b32.xlu1 %v6953_v61, %s7493_s22  ;;  %v4260_v61 = vsel %vm1993_vm1, %v4224_v41, %v6662_v6  ;;  %v4226_v22 = vsel %vm1919_vm14, %v2882_v52, %v6672_v48  ;;  %v3084_v41 = vld [vmem:[#allocation3 + $0x13d] sm:$0x3f] }
 0x2e5   : > { %v9123_v18 = vpop.permute.xlu0 %6684  ;;  %v4296_v63 = vsel %vm2067_vm3, %v4260_v61, %v6682_v27  ;;  %v3046_v27 = vld [vmem:[#allocation3 + $0x12c] sm:$0xff] }
 0x2e6   : > { %v9125_v44 = vpop.permute.xlu1 %6689  ;;  %v6686_v35 = vunpack.i.l.bf16 %v9123_v18 }
 0x2e7   : > { %6969 = vrot.lane.b32.xlu0 %v6968_v2, %s7482_s27  ;;  %v6692_v58 = vunpack.i.h.bf16 %v9125_v44  ;;  %v6691_v26 = vunpack.i.l.bf16 %v9125_v44  ;;  %v6677_v2 = vunpack.i.h.bf16 %v9119_v25  ;;  %v4295_v44 = vsel %vm2067_vm3, %v4259_v5, %v6681_v24  ;;  %v3083_v24 = vld [vmem:[#allocation3 + $0x135] sm:$0xff] }
 0x2e8   : > { %6964 = vrot.lane.b32.xlu1 %v6963_v7, %s7494_s17  ;;  %v6667_v5 = vunpack.i.h.bf16 %v9108_v43 }
 0x2e9   : > { %v9129_v54 = vpop.permute.xlu0 %6699  ;;  %v4331_v49 = vsel %vm2141_vm5, %v4295_v44, %v6691_v26  ;;  %v4262_v55 = vsel %vm1993_vm1, %v4226_v22, %v6677_v2 }
 0x2ea   : > { %v9131_v16 = vpop.permute.xlu1 %6694 }
 0x2eb   : > { %6979 = vrot.lane.b32.xlu0 %v6978_v8, %s7482_s27  ;;  %v6696_v53 = vunpack.i.l.bf16 %v9131_v16  ;;  %v6676_v8 = vunpack.i.l.bf16 %v9119_v25 }
 0x2ec   : > { %6974 = vrot.lane.b32.xlu1 %v6973_v17, %s7494_s17  ;;  %v4332_v17 = vsel %vm2141_vm5, %v4296_v63, %v6692_v58  ;;  %v6666_v58 = vunpack.i.l.bf16 %v9108_v43 }
 0x2ed   : > { %v9146_v36 = vpop.permute.xlu0 %6704  ;;  %v4368_v12 = vsel %vm4351_vm4, %v4331_v49, %v6696_v53  ;;  %v7023_v53 = vpack.i.bf16 %v3046_v27, %v9148_v59  ;;  %v3081_v59 = vld [vmem:[#allocation3 + $0x125] sm:$0xff]  ;;  %v2937_v27 = vld [vmem:[#allocation3 + $0x12] sm:$0xff] }
 0x2ee   : > { %v6715_v38 = vpop.permute.xlu1 %6714 }
 0x2ef   : > { %6989 = vrot.lane.b32.xlu0 %v6988_v39, %s7484_s29  ;;  %v6717_v21 = vunpack.i.h.bf16 %v6715_v38  ;;  %v6716_v7 = vunpack.i.l.bf16 %v6715_v38  ;;  %v4225_v39 = vsel %vm1919_vm14, %v2881_v10, %v6671_v19  ;;  %v2899_v10 = vld [vmem:[#allocation3 + $0x1] sm:$0xff] }
 0x2f0   : > { %6984 = vrot.lane.b32.xlu1 %v9095_v45, %s7484_s29  ;;  %v6697_v45 = vunpack.i.h.bf16 %v9131_v16  ;;  %v6687_v16 = vunpack.i.h.bf16 %v9123_v18  ;;  %v4261_v38 = vsel %vm1993_vm1, %v4225_v39, %v6676_v8  ;;  %v3119_v8 = vld [vmem:[#allocation3 + $0x136] sm:$0xff] }
 0x2f1   : > { %v9169_v28 = vpop.permute.xlu0 %6709  ;;  %v4405_v46 = vsel %vm4388_vm6, %v4368_v12, %v6716_v7  ;;  %v3117_v12 = vld [vmem:[#allocation3 + $0x126] sm:$0xff]  ;;  %v2901_v39 = vld [vmem:[#allocation3 + $0x11] sm:$0xff] }
 0x2f2   : > { %v6720_v3 = vpop.permute.xlu1 %6719  ;;  %v4369_v15 = vsel %vm4351_vm4, %v4332_v17, %v6697_v45  ;;  %v4298_v30 = vsel %vm2067_vm3, %v4262_v55, %v6687_v16  ;;  %v6711_v29 = vunpack.i.l.bf16 %v9169_v28  ;;  %v3120_v16 = vld [vmem:[#allocation3 + $0x13e] sm:$0x3f] }
 0x2f3   : > { %6999 = vrot.lane.b32.xlu0 %v6998_v62, %s7486_s23  ;;  %v6722_v47 = vunpack.i.h.bf16 %v6720_v3  ;;  %v6721_v0 = vunpack.i.l.bf16 %v6720_v3  ;;  %v4406_v11 = vsel %vm4388_vm6, %v4369_v15, %v6717_v21  ;;  %v4334_v48 = vsel %vm2141_vm5, %v4298_v30, %v6667_v5  ;;  %v3118_v15 = vld [vmem:[#allocation3 + $0x12e] sm:$0xff] }
 0x2f4   : > { %6994 = vrot.lane.b32.xlu1 %v6993_v34, %s7486_s23  ;;  %v4297_v34 = vsel %vm2067_vm3, %v4261_v38, %v6686_v35  ;;  %v7038_v3 = vpack.i.bf16 %v3084_v41, %v3083_v24  ;;  %v2940_v38 = vld [vmem:[#allocation3 + $0x2a] sm:$0xff]  ;;  %v6701_v30 = vunpack.i.l.bf16 %v9129_v54  ;;  %v9252_v24 = vld [vmem:[#allocation3 + $0x1b] sm:$0xff]  ;;  %v6707_v5 = vunpack.i.h.bf16 %v9146_v36 }
 0x2f5   : > { %v9185_v4 = vpop.permute.xlu0 %6729  ;;  %v4442_v18 = vsel %vm4425_vm7, %v4405_v46, %v6721_v0  ;;  %v4443_v6 = vsel %vm4425_vm7, %v4406_v11, %v6722_v47  ;;  %v3082_v47 = vld [vmem:[#allocation3 + $0x12d] sm:$0xff]  ;;  %v7043_v46 = vpack.i.bf16 %v3118_v15, %v3117_v12  ;;  %v2902_v11 = vld [vmem:[#allocation3 + $0x19] sm:$0xff] }
 0x2f6   : > { %v6725_v14 = vpop.permute.xlu1 %6724  ;;  %v7033_v13 = vpack.i.bf16 %v3082_v47, %v3081_v59  ;;  %v3013_v41 = vld [vmem:[#allocation3 + $0x2c] sm:$0xff] }
 0x2f7   : > { %v6727_v23 = vunpack.i.h.bf16 %v6725_v14  ;;  %v6726_v25 = vunpack.i.l.bf16 %v6725_v14  ;;  %7009 = vrot.lane.b32.xlu0 %v7008_v50, %s7488_s16  ;;  %v6712_v50 = vunpack.i.h.bf16 %v9169_v28  ;;  %v4333_v28 = vsel %vm2141_vm5, %v4297_v34, %v6666_v58  ;;  %v2936_v34 = vld [vmem:[#allocation3 + $0xa] sm:$0xff] }
 0x2f8   : > { %7004 = vrot.lane.b32.xlu1 %v7003_v42, %s7488_s16  ;;  %v4370_v19 = vsel %vm4351_vm4, %v4333_v28, %v6711_v29  ;;  %v6702_v29 = vunpack.i.h.bf16 %v9129_v54  ;;  %v2883_v28 = vld [vmem:[#allocation3 + $0xa0] sm:$0xff] }
 0x2f9   : > { %v6735_v57 = vpop.permute.xlu0 %6734  ;;  %v4479_v20 = vsel %vm4462_vm8, %v4442_v18, %v6726_v25  ;;  %v4480_v62 = vsel %vm4462_vm8, %v4443_v6, %v6727_v23  ;;  %v4371_v43 = vsel %vm4351_vm4, %v4334_v48, %v6712_v50  ;;  %v2900_v23 = vld [vmem:[#allocation3 + $0x9] sm:$0xff]  ;;  %v2938_v18 = vld [vmem:[#allocation3 + $0x1a] sm:$0xff] }
 0x2fa   : > { %v6745_v42 = vpop.permute.xlu1 %6744  ;;  %v4507_v56 = vpack.c.bf16 %v4480_v62, %v4479_v20  ;;  %v6737_v26 = vunpack.i.h.bf16 %v6735_v57  ;;  %v6736_v61 = vunpack.i.l.bf16 %v6735_v57  ;;  %v7053_v55 = vpack.i.bf16 %v2900_v23, %v2899_v10  ;;  %v2939_v6 = vld [vmem:[#allocation3 + $0x22] sm:$0xff]  ;;  %v9246_v50 = vld [vmem:[#allocation3 + $0x2b] sm:$0xff] }
 0x2fb   : > { %7019 = vrot.lane.b32.xlu0 %v7018_v33, %s7491_s24  ;;  %v6747_v44 = vunpack.i.h.bf16 %v6745_v42  ;;  %v6746_v63 = vunpack.i.l.bf16 %v6745_v42  ;;  %v7058_v20 = vpack.i.bf16 %v2902_v11, %v2901_v39  ;;  %v2935_v62 = vld [vmem:[#allocation3 + $0x2] sm:$0xff]  ;;  %v6706_v42 = vunpack.i.l.bf16 %v9146_v36 }
 0x2fc   : > { %7014 = vrot.lane.b32.xlu1 %v9110_v9, %s7491_s24  ;;  %5685 = vmatprep.mubr.msk.bf16.mxu1 %vm4560_vm9, %v4507_v56  ;;  %v4407_v9 = vsel %vm4388_vm6, %v4370_v19, %v6736_v61  ;;  %v4408_v7 = vsel %vm4388_vm6, %v4371_v43, %v6737_v26  ;;  %v7068_v58 = vpack.i.bf16 %v2938_v18, %v2937_v27  ;;  %v9258_v61 = vld [vmem:[#allocation3 + $0x23] sm:$0xff]  ;;  %v6731_v18 = vunpack.i.l.bf16 %v9185_v4 }
 0x2fd   : > { %v6740_v45 = vpop.permute.xlu0 %6739  ;;  %v9256_v26 = vpack.i.bf16 %v2940_v38, %v2939_v6  ;;  %v7063_v48 = vpack.i.bf16 %v2936_v34, %v2935_v62  ;;  %v2884_v36 = vld [vmem:[#allocation3 + $0xa8] sm:$0xff]  ;;  %v4227_v19 = vsel %vm1919_vm14, %v2883_v28, %v6701_v30 }
 0x2fe   : > { %v6742_v2 = vunpack.i.h.bf16 %v6740_v45  ;;  %v6741_v21 = vunpack.i.l.bf16 %v6740_v45  ;;  %v9217_v33 = vpop.permute.xlu1 %6749  ;;  %v7088_v45 = vpack.i.bf16 %v9246_v50, %v9258_v61 }
 0x2ff   : > { %7029 = vrot.lane.b32.xlu0 %v7028_v32, %s7492_s26  ;;  %v7048_v32 = vpack.i.bf16 %v3120_v16, %v3119_v8  ;;  %v6752_v54 = vunpack.i.h.bf16 %v9217_v33  ;;  %v6751_v43 = vunpack.i.l.bf16 %v9217_v33 }
 0x300   : > { %v4444_v0 = vsel %vm4425_vm7, %v4407_v9, %v6741_v21  ;;  %v4445_v52 = vsel %vm4425_vm7, %v4408_v7, %v6742_v2  ;;  %7024 = vrot.lane.b32.xlu1 %v7023_v53, %s7492_s26  ;;  %v9264_v53 = vld [vmem:[#allocation3 + $0x13] sm:$0xff]  ;;  %v4228_v7 = vsel %vm1919_vm14, %v2884_v36, %v6702_v29 }
 0x301   : > { %v9228_v49 = vpop.permute.xlu0 %6759  ;;  %v4481_v17 = vsel %vm4462_vm8, %v4444_v0, %v6746_v63  ;;  %v4482_v22 = vsel %vm4462_vm8, %v4445_v52, %v6747_v44  ;;  %v7083_v21 = vpack.i.bf16 %v9252_v24, %v9264_v53  ;;  %v4263_v44 = vsel %vm1993_vm1, %v4227_v19, %v6706_v42  ;;  %v2886_v52 = vld [vmem:[#allocation3 + $0xb8] sm:$0xff] }
 0x302   : > { %v9232_v35 = vpop.permute.xlu1 %6754  ;;  %v4508_v60 = vpack.c.bf16 %v4482_v22, %v4481_v17  ;;  %v6761_v63 = vunpack.i.l.bf16 %v9228_v49  ;;  %v4264_v0 = vsel %vm1993_vm1, %v4228_v7, %v6707_v5  ;;  %v6762_v33 = vunpack.i.h.bf16 %v9228_v49  ;;  %v2885_v22 = vld [vmem:[#allocation3 + $0xb0] sm:$0xff] }
 0x303   : > { %7039 = vrot.lane.b32.xlu0 %v7038_v3, %s7493_s22  ;;  %v3012_v3 = vld [vmem:[#allocation3 + $0x24] sm:$0xff]  ;;  %v6757_v59 = vunpack.i.h.bf16 %v9232_v35  ;;  %v6756_v8 = vunpack.i.l.bf16 %v9232_v35  ;;  %v6732_v17 = vunpack.i.h.bf16 %v9185_v4  ;;  %v4229_v12 = vsel %vm1919_vm14, %v2885_v22, %v6751_v43  ;;  %v3010_v53 = vld [vmem:[#allocation3 + $0x14] sm:$0xff] }
 0x304   : > { %7034 = vrot.lane.b32.xlu1 %v7033_v13, %s7493_s22  ;;  %5686 = vmatmul.mubr.msk.bf16.vlgmr.msra.gmra.mrb[0].mxu1 %vm4560_vm9, %v4508_v60  ;;  %v9272_v9 = vpack.i.bf16 %v3013_v41, %v3012_v3  ;;  %v4230_v13 = vsel %vm1919_vm14, %v2886_v52, %v6752_v54  ;;  %v4299_v23 = vsel %vm2067_vm3, %v4263_v44, %v6761_v63  ;;  %v3011_v3 = vld [vmem:[#allocation3 + $0x1c] sm:$0xff] }
 0x305   : > { %v9237_v14 = vpop.permute.xlu0 %6764  ;;  %v4265_v6 = vsel %vm1993_vm1, %v4229_v12, %v6756_v8  ;;  %v3014_v8 = vld [vmem:[#allocation3 + $0x34] sm:$0xff] }
 0x306   : > { %v9239_v25 = vpop.permute.xlu1 %6769  ;;  %v6767_v16 = vunpack.i.h.bf16 %v9237_v14  ;;  %v6766_v49 = vunpack.i.l.bf16 %v9237_v14  ;;  %v4300_v14 = vsel %vm2067_vm3, %v4264_v0, %v6762_v33  ;;  %v7093_v33 = vpack.i.bf16 %v3011_v3, %v3010_v53  ;;  %v2943_v53 = vld [vmem:[#allocation3 + $0x42] sm:$0xff]  ;;  %v2944_v3 = vld [vmem:[#allocation3 + $0x4a] sm:$0xff] }
 0x307   : > { %7049 = vrot.lane.b32.xlu0 %v7048_v32, %s7494_s17  ;;  %v6772_v60 = vunpack.i.h.bf16 %v9239_v25  ;;  %v6771_v32 = vunpack.i.l.bf16 %v9239_v25  ;;  %v4850_v25 = vld [vmem:[%s10271_s5] sm:$0x3] }
 0x308   : > { %7044 = vrot.lane.b32.xlu1 %v7043_v46, %s7494_s17  ;;  %v4266_v46 = vsel %vm1993_vm1, %v4230_v13, %v6757_v59  ;;  %5874 = vmatprep.subr.msk.bf16.mxu1 %vm2278_vm13, %v4850_v25  ;;  %v4301_v4 = vsel %vm2067_vm3, %v4265_v6, %v6766_v49  ;;  %v2903_v6 = vld [vmem:[#allocation3 + $0x21] sm:$0xff] }
 0x309   : > { %v9244_v57 = vpop.permute.xlu0 %6779  ;;  %v4302_v38 = vsel %vm2067_vm3, %v4266_v46, %v6767_v16  ;;  %v4335_v30 = vsel %vm2141_vm5, %v4299_v23, %v6771_v32  ;;  %v4337_v7 = vsel %vm2141_vm5, %v4301_v4, %v6731_v18  ;;  %v3015_v16 = vld [vmem:[#allocation3 + $0x3c] sm:$0xff] }
 0x30a   : > { %v9250_v56 = vpop.permute.xlu1 %6774  ;;  %v4338_v44 = vsel %vm2141_vm5, %v4302_v38, %v6732_v17  ;;  %v3051_v46 = vld [vmem:[#allocation3 + $0x35] sm:$0xff]  ;;  %v2904_v38 = vld [vmem:[#allocation3 + $0x29] sm:$0xff] }
 0x30b   : > { %7059 = vrot.lane.b32.xlu0 %v7058_v20, %s7482_s27  ;;  %v6777_v35 = vunpack.i.h.bf16 %v9250_v56  ;;  %v6776_v15 = vunpack.i.l.bf16 %v9250_v56  ;;  %v4336_v20 = vsel %vm2141_vm5, %v4300_v14, %v6772_v60  ;;  %v4913_v56 = vsel %vm2278_vm13, %v4850_v25, 0  ;;  %v3049_v25 = vld [vmem:[#allocation3 + $0x25] sm:$0xff] }
 0x30c   : > { %7054 = vrot.lane.b32.xlu1 %v7053_v55, %s7482_s27  ;;  %5706 = vmatpush3.bf16.msra.mxu1 %v4913_v56  ;;  %v2905_v56 = vld [vmem:[#allocation3 + $0x31] sm:$0xff] }
 0x30d   : > { %v9268_v2 = vpop.permute.xlu0 %6784  ;;  %v4372_v50 = vsel %vm4351_vm4, %v4335_v30, %v6776_v15  ;;  %v4373_v29 = vsel %vm4351_vm4, %v4336_v20, %v6777_v35  ;;  %v9335_v35 = vpack.i.bf16 %v3015_v16, %v3014_v8  ;;  %v7416_v15 = vld [vmem:[%s10268_s2] ss:$0 sm:$0xff]  ;;  %v7128_v30 = vpack.i.bf16 %v2904_v38, %v2903_v6  ;;  %v3085_v20 = vld [vmem:[#allocation3 + $0x26] sm:$0xff]  ;;  %v9402_v38 = vld [vmem:[#allocation3 + $0x5e] sm:$0xff] }
 0x30e   : > { %v6790_v47 = vpop.permute.xlu1 %6789  ;;  %v6787_v27 = vunpack.i.h.bf16 %v9268_v2  ;;  %v6786_v24 = vunpack.i.l.bf16 %v9268_v2  ;;  %v3016_v16 = vld [vmem:[#allocation3 + $0x44] sm:$0xff]  ;;  %v9400_v6 = vld [vmem:[#allocation3 + $0x56] sm:$0xff] }
 0x30f   : > { %7069 = vrot.lane.b32.xlu0 %v7068_v58, %s7484_s29  ;;  %v6792_v11 = vunpack.i.h.bf16 %v6790_v47  ;;  %v6791_v39 = vunpack.i.l.bf16 %v6790_v47 }
 0x310   : > { %7064 = vrot.lane.b32.xlu1 %v7063_v48, %s7484_s29  ;;  %v4375_v47 = vsel %vm4351_vm4, %v4338_v44, %v6787_v27 }
 0x311   : > { %v6805_v10 = vpop.permute.xlu0 %6804  ;;  %v4409_v41 = vsel %vm4388_vm6, %v4372_v50, %v6791_v39  ;;  %v4410_v5 = vsel %vm4388_vm6, %v4373_v29, %v6792_v11  ;;  %v3052_v11 = vld [vmem:[#allocation3 + $0x3d] sm:$0xff]  ;;  %v3050_v39 = vld [vmem:[#allocation3 + $0x2d] sm:$0xff] }
 0x312   : > { %v6795_v55 = vpop.permute.xlu1 %6794  ;;  %v6806_v28 = vunpack.i.l.bf16 %v6805_v10  ;;  %v7113_v14 = vpack.i.bf16 %v3050_v39, %v3049_v25  ;;  %v2906_v50 = vld [vmem:[#allocation3 + $0x39] sm:$0xff]  ;;  %v9392_v39 = vld [vmem:[#allocation3 + $0x4e] sm:$0xff] }
 0x313   : > { %7079 = vrot.lane.b32.xlu0 %v9256_v26, %s7486_s23  ;;  %v6797_v62 = vunpack.i.h.bf16 %v6795_v55  ;;  %v6796_v34 = vunpack.i.l.bf16 %v6795_v55  ;;  %v7118_v55 = vpack.i.bf16 %v3052_v11, %v3051_v46  ;;  %v3056_v46 = vld [vmem:[#allocation3 + $0x5d] sm:$0xff] }
 0x314   : > { %7074 = vrot.lane.b32.xlu1 %v7068_v58, %s7486_s23  ;;  %v6807_v58 = vunpack.i.h.bf16 %v6805_v10  ;;  %v2360_v10 = vadd.f32 %v7416_v15, %v8929_v40  ;;  %v3086_v40 = vld [vmem:[#allocation3 + $0x2e] sm:$0xff] }
 0x315   : > { %v6810_v42 = vpop.permute.xlu0 %6809  ;;  %v4446_v36 = vsel %vm4425_vm7, %v4409_v41, %v6796_v34  ;;  %v4447_v19 = vsel %vm4425_vm7, %v4410_v5, %v6797_v62  ;;  %v7123_v4 = vpack.i.bf16 %v3086_v40, %v3085_v20  ;;  %v6782_v40 = vunpack.i.h.bf16 %v9244_v57 }
 0x316   : > { %v6800_v61 = vpop.permute.xlu1 %6799  ;;  %v6812_v43 = vunpack.i.h.bf16 %v6810_v42  ;;  %v6811_v2 = vunpack.i.l.bf16 %v6810_v42  ;;  %v2513_v18 = vmul.f32 0.2, %v2360_v10  ;;  %vm2477_vm13 = vcmp.ge.f32.partialorder %v2360_v10, 0.0  ;;  %v3088_v42 = vld [vmem:[#allocation3 + $0x3e] sm:$0xff] }
 0x317   : > { %v6802_v54 = vunpack.i.h.bf16 %v6800_v61  ;;  %v6801_v48 = vunpack.i.l.bf16 %v6800_v61  ;;  %7089 = vrot.lane.b32.xlu0 %v7088_v45, %s7488_s16  ;;  %v4374_v45 = vsel %vm4351_vm4, %v4337_v7, %v6786_v24  ;;  %v7138_v24 = vpack.i.bf16 %v2906_v50, %v2905_v56  ;;  %v2942_v61 = vld [vmem:[#allocation3 + $0x3a] sm:$0xff]  ;;  %v2889_v56 = vld [vmem:[#allocation3 + $0xd0] sm:$0xff] }
 0x318   : > { %7084 = vrot.lane.b32.xlu1 %v7083_v21, %s7488_s16  ;;  %v4411_v22 = vsel %vm4388_vm6, %v4374_v45, %v6806_v28  ;;  %v4412_v21 = vsel %vm4388_vm6, %v4375_v47, %v6807_v58  ;;  %v2549_v62 = vsel %vm2477_vm13, %v2360_v10, %v2513_v18  ;;  %v2365_v58 = vadd.f32 %v7416_v15, %v8936_v51  ;;  %v2941_v28 = vld [vmem:[#allocation3 + $0x32] sm:$0xff]  ;;  %v2980_v45 = vld [vmem:[#allocation3 + $0x43] sm:$0xff] }
 0x319   : > { %v4483_v63 = vsel %vm4462_vm8, %v4446_v36, %v6801_v48  ;;  %v4484_v59 = vsel %vm4462_vm8, %v4447_v19, %v6802_v54  ;;  %v4448_v17 = vsel %vm4425_vm7, %v4411_v22, %v6811_v2  ;;  %v4449_v32 = vsel %vm4425_vm7, %v4412_v21, %v6812_v43  ;;  %v2981_v2 = vld [vmem:[#allocation3 + $0x4b] sm:$0xff]  ;;  %v9378_v22 = vld [vmem:[#allocation3 + $0x41] sm:$0xff]  ;;  %v3018_v21 = vld [vmem:[#allocation3 + $0x54] sm:$0xff] }
 0x31a   : > { %v6815_v0 = vpop.permute.xlu1 %6814  ;;  %v4509_v52 = vpack.c.bf16 %v4484_v59, %v4483_v63  ;;  %v7148_v54 = vpack.i.bf16 %v2942_v61, %v2941_v28  ;;  %v2514_v36 = vmul.f32 0.2, %v2365_v58  ;;  %vm2478_vm10 = vcmp.ge.f32.partialorder %v2365_v58, 0.0  ;;  %v2979_v63 = vld [vmem:[#allocation3 + $0x3b] sm:$0xff]  ;;  %v2888_v28 = vld [vmem:[#allocation3 + $0xc8] sm:$0xff] }
 0x31b   : > { %v6817_v13 = vunpack.i.h.bf16 %v6815_v0  ;;  %v6816_v60 = vunpack.i.l.bf16 %v6815_v0  ;;  %7099 = vrot.lane.b32.xlu0 %v9272_v9, %s7491_s24  ;;  %v9365_v51 = vpack.i.bf16 %v2944_v3, %v2943_v53  ;;  %v7168_v47 = vpack.i.bf16 %v2981_v2, %v2980_v45  ;;  %v2978_v0 = vld [vmem:[#allocation3 + $0x33] sm:$0xff] }
 0x31c   : > { %5689 = vmatprep.mubr.msk.bf16.mxu1 %vm4560_vm9, %v4509_v52  ;;  %7094 = vrot.lane.b32.xlu1 %v7093_v33, %s7491_s24  ;;  %v2550_v44 = vsel %vm2478_vm10, %v2365_v58, %v2514_v36  ;;  %v7163_v52 = vpack.i.bf16 %v2979_v63, %v2978_v0  ;;  %v3017_v33 = vld [vmem:[#allocation3 + $0x4c] sm:$0xff]  ;;  %v7213_v61 = vpack.i.bf16 %v9402_v38, %v9400_v6  ;;  %v2887_v58 = vld [vmem:[#allocation3 + $0xc0] sm:$0xff] }
 0x31d   : > { %v4485_v12 = vsel %vm4462_vm8, %v4448_v17, %v6816_v60  ;;  %v4486_v49 = vsel %vm4462_vm8, %v4449_v32, %v6817_v13  ;;  %v3019_v13 = vld [vmem:[#allocation3 + $0x5c] sm:$0xff]  ;;  %v9381_v60 = vld [vmem:[#allocation3 + $0x49] sm:$0xff]  ;;  %v7178_v17 = vpack.i.bf16 %v3017_v33, %v3016_v16  ;;  %v4232_v36 = vsel %vm1919_vm14, %v2888_v28, %v6782_v40 }
 0x31e   : > { %v4510_v23 = vpack.c.bf16 %v4486_v49, %v4485_v12  ;;  %v9350_v27 = vpop.permute.xlu1 %6819  ;;  %v3054_v32 = vld [vmem:[#allocation3 + $0x4d] sm:$0xff]  ;;  %v3053_v49 = vld [vmem:[#allocation3 + $0x45] sm:$0xff]  ;;  %v9388_v10 = vpack.i.bf16 %v3019_v13, %v3018_v21  ;;  %v7208_v11 = vpack.i.bf16 %v9381_v60, %v9378_v22 }
 0x31f   : > { %7109 = vrot.lane.b32.xlu0 %v9335_v35, %s7492_s26  ;;  %v6821_v25 = vunpack.i.l.bf16 %v9350_v27  ;;  %v7193_v18 = vpack.i.bf16 %v3054_v32, %v3053_v49  ;;  %v2947_v38 = vld [vmem:[#allocation3 + $0x62] sm:$0xff] }
 0x320   : > { %5690 = vmatmul.mubr.msk.bf16.gmra.mrb[4].mxu1 %vm4560_vm9, %v4510_v23  ;;  %7104 = vrot.lane.b32.xlu1 %v9272_v9, %s7492_s26  ;;  %v3087_v9 = vld [vmem:[#allocation3 + $0x36] sm:$0xff] }
 0x321   : > { %v7133_v5 = vpack.i.bf16 %v3088_v42, %v3087_v9  ;;  %v3055_v23 = vld [vmem:[#allocation3 + $0x55] sm:$0xff]  ;;  %v4233_v53 = vsel %vm1919_vm14, %v2889_v56, %v6821_v25 }
 0x322   : > { %v9360_v19 = vpop.permute.xlu1 %6829  ;;  %v9413_v42 = vld [vmem:[#allocation3 + $0x51] sm:$0xff] }
 0x323   : > { %7119 = vrot.lane.b32.xlu0 %v7118_v55, %s7493_s22  ;;  %v6822_v55 = vunpack.i.h.bf16 %v9350_v27  ;;  %v6832_v20 = vunpack.i.h.bf16 %v9360_v19  ;;  %v2890_v27 = vld [vmem:[#allocation3 + $0xd8] sm:$0xff] }
 0x324   : > { %7114 = vrot.lane.b32.xlu1 %v7113_v14, %s7493_s22  ;;  %v9398_v14 = vld [vmem:[#allocation3 + $0x59] sm:$0xff] }
 0x326   : > { %v2668_v34 = vpop.permute.xlu0 %2667 }
 0x327   : > { %v2801_v29 = vmul.f32 %v2668_v34, %v2549_v62  ;;  %7129 = vrot.lane.b32.xlu0 %v7128_v30, %s7482_s27  ;;  %v6781_v30 = vunpack.i.l.bf16 %v9244_v57  ;;  %v6831_v62 = vunpack.i.l.bf16 %v9360_v19  ;;  %v3089_v34 = vld [vmem:[#allocation3 + $0x46] sm:$0xff] }
 0x328   : > { %7124 = vrot.lane.b32.xlu1 %v7123_v4, %s7494_s17  ;;  %v7203_v9 = vpack.i.bf16 %v9392_v39, %v3089_v34 }
 0x329   : > { %2837 = vst.msk [vmem:[#allocation3 + $0x6b] sm:$0xff] %vm1919_vm14, %v2801_v29  ;;  %v7198_v29 = vpack.i.bf16 %v3056_v46, %v3055_v23  ;;  %v4231_v19 = vsel %vm1919_vm14, %v2887_v58, %v6781_v30  ;;  %v4269_v2 = vsel %vm1993_vm1, %v4233_v53, %v6831_v62 }
 0x32a   : > { %v9353_v41 = vpop.permute.xlu0 %6824 }
 0x32b   : > { %7139 = vrot.lane.b32.xlu0 %v7138_v24, %s7482_s27  ;;  %v6827_v4 = vunpack.i.h.bf16 %v9353_v41 }
 0x32c   : > { %7134 = vrot.lane.b32.xlu1 %v7133_v5, %s7494_s17 }
 0x32d   : > { %v4268_v63 = vsel %vm1993_vm1, %v4232_v36, %v6827_v4 }
 0x32e   : > { %v9358_v48 = vpop.permute.xlu0 %6834 }
 0x32f   : > { %7149 = vrot.lane.b32.xlu0 %v7148_v54, %s7484_s29  ;;  %v6837_v57 = vunpack.i.h.bf16 %v9358_v48  ;;  %v6836_v24 = vunpack.i.l.bf16 %v9358_v48 }
 0x330   : > { %7144 = vrot.lane.b32.xlu1 %v9256_v26, %s7484_s29 }
 0x331   : > { %v4304_v0 = vsel %vm2067_vm3, %v4268_v63, %v6837_v57  ;;  %v2946_v57 = vld [vmem:[#allocation3 + $0x5a] sm:$0xff]  ;;  %v2948_v63 = vld [vmem:[#allocation3 + $0x6a] sm:$0xff] }
 0x332   : > { %v9367_v43 = vpop.permute.xlu0 %6839 }
 0x333   : > { %v2673_v7 = vpop.permute.xlu1 %2672  ;;  %7159 = vrot.lane.b32.xlu0 %v9365_v51, %s7486_s23  ;;  %v6842_v3 = vunpack.i.h.bf16 %v9367_v43  ;;  %v6841_v48 = vunpack.i.l.bf16 %v9367_v43 }
 0x334   : > { %v2802_v59 = vmul.f32 %v2673_v7, %v2550_v44  ;;  %7154 = vrot.lane.b32.xlu1 %v7148_v54, %s7486_s23  ;;  %v4234_v54 = vsel %vm1919_vm14, %v2890_v27, %v6822_v55 }
 0x335   : > { %v4270_v7 = vsel %vm1993_vm1, %v4234_v54, %v6832_v20  ;;  %v4305_v13 = vsel %vm2067_vm3, %v4269_v2, %v6841_v48  ;;  %v2945_v48 = vld [vmem:[#allocation3 + $0x52] sm:$0xff] }
 0x336   : > { %2838 = vst.msk [vmem:[#allocation3 + $0x73] sm:$0xff] %vm1919_vm14, %v2802_v59  ;;  %v9373_v26 = vpop.permute.xlu0 %6849  ;;  %v4306_v21 = vsel %vm2067_vm3, %v4270_v7, %v6842_v3 }
 0x337   : > { %v9375_v8 = vpop.permute.xlu1 %6844  ;;  %7169 = vrot.lane.b32.xlu0 %v7168_v47, %s7488_s16  ;;  %v6851_v49 = vunpack.i.l.bf16 %v9373_v26 }
 0x338   : > { %7164 = vrot.lane.b32.xlu1 %v7163_v52, %s7488_s16  ;;  %v6847_v59 = vunpack.i.h.bf16 %v9375_v8  ;;  %v6846_v45 = vunpack.i.l.bf16 %v9375_v8  ;;  %v6852_v8 = vunpack.i.h.bf16 %v9373_v26 }
 0x339   : > { %v4341_v56 = vsel %vm2141_vm5, %v4305_v13, %v6851_v49  ;;  %v9508_v49 = vld [vmem:[#allocation3 + $0x69] sm:$0xff] }
 0x33a   : > { %v9383_v12 = vpop.permute.xlu0 %6859  ;;  %v4342_v27 = vsel %vm2141_vm5, %v4306_v21, %v6852_v8 }
 0x33b   : > { %v9385_v15 = vpop.permute.xlu1 %6854  ;;  %7179 = vrot.lane.b32.xlu0 %v7178_v17, %s7491_s24  ;;  %v6862_v55 = vunpack.i.h.bf16 %v9383_v12  ;;  %v6861_v25 = vunpack.i.l.bf16 %v9383_v12 }
 0x33c   : > { %7174 = vrot.lane.b32.xlu1 %v9335_v35, %s7491_s24  ;;  %v6826_v35 = vunpack.i.l.bf16 %v9353_v41  ;;  %v7218_v41 = vpack.i.bf16 %v9398_v14, %v9413_v42  ;;  %v6857_v52 = vunpack.i.h.bf16 %v9385_v15  ;;  %v6856_v33 = vunpack.i.l.bf16 %v9385_v15 }
 0x33d   : > { %v4340_v15 = vsel %vm2141_vm5, %v4304_v0, %v6847_v59  ;;  %v2983_v0 = vld [vmem:[#allocation3 + $0x5b] sm:$0xff]  ;;  %v3021_v13 = vld [vmem:[#allocation3 + $0x6c] sm:$0xff] }
 0x33e   : > { %v9410_v50 = vpop.permute.xlu0 %6869  ;;  %v4267_v44 = vsel %vm1993_vm1, %v4231_v19, %v6826_v35  ;;  %v3022_v8 = vld [vmem:[#allocation3 + $0x74] sm:$0xff] }
 0x33f   : > { %v6865_v5 = vpop.permute.xlu1 %6864  ;;  %7189 = vrot.lane.b32.xlu0 %v9388_v10, %s7492_s26  ;;  %v4303_v43 = vsel %vm2067_vm3, %v4267_v44, %v6836_v24  ;;  %v6872_v30 = vunpack.i.h.bf16 %v9410_v50  ;;  %v6871_v26 = vunpack.i.l.bf16 %v9410_v50  ;;  %v4378_v24 = vsel %vm4351_vm4, %v4341_v56, %v6861_v25 }
 0x340   : > { %7184 = vrot.lane.b32.xlu1 %v7178_v17, %s7492_s26  ;;  %v6867_v17 = vunpack.i.h.bf16 %v6865_v5  ;;  %v6866_v32 = vunpack.i.l.bf16 %v6865_v5  ;;  %v4339_v39 = vsel %vm2141_vm5, %v4303_v43, %v6846_v45 }
 0x341   : > { %v4376_v40 = vsel %vm4351_vm4, %v4339_v39, %v6856_v33  ;;  %v4415_v28 = vsel %vm4388_vm6, %v4378_v24, %v6871_v26 }
 0x342   : > { %v6880_v47 = vpop.permute.xlu0 %6879  ;;  %v4413_v62 = vsel %vm4388_vm6, %v4376_v40, %v6866_v32  ;;  %v3020_v32 = vld [vmem:[#allocation3 + $0x64] sm:$0xff] }
 0x343   : > { %v6875_v16 = vpop.permute.xlu1 %6874  ;;  %7199 = vrot.lane.b32.xlu0 %v7198_v29, %s7493_s22  ;;  %v6882_v35 = vunpack.i.h.bf16 %v6880_v47  ;;  %v6881_v29 = vunpack.i.l.bf16 %v6880_v47  ;;  %v2985_v47 = vld [vmem:[#allocation3 + $0x6b] sm:$0xff] }
 0x344   : > { %7194 = vrot.lane.b32.xlu1 %v7193_v18, %s7493_s22  ;;  %v6877_v23 = vunpack.i.h.bf16 %v6875_v16  ;;  %v6876_v46 = vunpack.i.l.bf16 %v6875_v16  ;;  %v4377_v18 = vsel %vm4351_vm4, %v4340_v15, %v6857_v52  ;;  %v2984_v52 = vld [vmem:[#allocation3 + $0x63] sm:$0xff]  ;;  %v2982_v16 = vld [vmem:[#allocation3 + $0x53] sm:$0xff] }
 0x345   : > { %v4414_v12 = vsel %vm4388_vm6, %v4377_v18, %v6867_v17  ;;  %v4452_v36 = vsel %vm4425_vm7, %v4415_v28, %v6881_v29  ;;  %v7248_v33 = vpack.i.bf16 %v2985_v47, %v2984_v52  ;;  %v7243_v21 = vpack.i.bf16 %v2983_v0, %v2982_v16  ;;  %v3023_v15 = vld [vmem:[#allocation3 + $0x7c] sm:$0xff] }
 0x346   : > { %v9450_v14 = vpop.permute.xlu0 %6889  ;;  %v4450_v42 = vsel %vm4425_vm7, %v4413_v62, %v6876_v46  ;;  %v4451_v50 = vsel %vm4425_vm7, %v4414_v12, %v6877_v23  ;;  %v7258_v23 = vpack.i.bf16 %v3021_v13, %v3020_v32  ;;  %v3059_v46 = vld [vmem:[#allocation3 + $0x75] sm:$0xff]  ;;  %v9517_v40 = vpack.i.bf16 %v3023_v15, %v3022_v8  ;;  %v3060_v18 = vld [vmem:[#allocation3 + $0x7d] sm:$0xff] }
 0x347   : > { %v6885_v20 = vpop.permute.xlu1 %6884  ;;  %7209 = vrot.lane.b32.xlu0 %v7208_v11, %s7482_s27  ;;  %v9531_v29 = vld [vmem:[#allocation3 + $0x76] sm:$0xff] }
 0x348   : > { %v6887_v34 = vunpack.i.h.bf16 %v6885_v20  ;;  %v6886_v4 = vunpack.i.l.bf16 %v6885_v20  ;;  %7204 = vrot.lane.b32.xlu1 %v7203_v9, %s7494_s17  ;;  %v4379_v9 = vsel %vm4351_vm4, %v4342_v27, %v6862_v55  ;;  %v9512_v55 = vld [vmem:[#allocation3 + $0x61] sm:$0xff]  ;;  %v9521_v20 = vld [vmem:[#allocation3 + $0x6e] sm:$0xff]  ;;  %v2894_v28 = vld [vmem:[#allocation3 + $0xf8] sm:$0xff] }
 0x349   : > { %v4416_v54 = vsel %vm4388_vm6, %v4379_v9, %v6872_v30  ;;  %v3058_v30 = vld [vmem:[#allocation3 + $0x6d] sm:$0xff]  ;;  %v7288_v26 = vpack.i.bf16 %v9508_v49, %v9512_v55 }
 0x34a   : > { %v4487_v22 = vsel %vm4462_vm8, %v4450_v42, %v6886_v4  ;;  %v4488_v60 = vsel %vm4462_vm8, %v4451_v50, %v6887_v34  ;;  %v9469_v11 = vpop.permute.xlu0 %6899  ;;  %v4453_v19 = vsel %vm4425_vm7, %v4416_v54, %v6882_v35  ;;  %v7278_v34 = vpack.i.bf16 %v3060_v18, %v3059_v46  ;;  %v9527_v4 = vld [vmem:[#allocation3 + $0x71] sm:$0xff]  ;;  %v9529_v35 = vld [vmem:[#allocation3 + $0x79] sm:$0xff] }
 0x34b   : > { %v6895_v5 = vpop.permute.xlu1 %6894  ;;  %7219 = vrot.lane.b32.xlu0 %v7218_v41, %s7482_s27  ;;  %v4511_v58 = vpack.c.bf16 %v4488_v60, %v4487_v22  ;;  %v7228_v41 = vpack.i.bf16 %v2946_v57, %v2945_v48  ;;  %v6902_v62 = vunpack.i.h.bf16 %v9469_v11  ;;  %v6901_v12 = vunpack.i.l.bf16 %v9469_v11  ;;  %v3057_v22 = vld [vmem:[#allocation3 + $0x65] sm:$0xff] }
 0x34c   : > { %v6897_v53 = vunpack.i.h.bf16 %v6895_v5  ;;  %v6896_v3 = vunpack.i.l.bf16 %v6895_v5  ;;  %7214 = vrot.lane.b32.xlu1 %v7213_v61, %s7494_s17  ;;  %v9493_v61 = vpack.i.bf16 %v2948_v63, %v2947_v38  ;;  %v6892_v42 = vunpack.i.h.bf16 %v9450_v14  ;;  %v3093_v60 = vld [vmem:[#allocation3 + $0x66] sm:$0xff]  ;;  %v9542_v5 = vld [vmem:[#allocation3 + $0x7e] sm:$0xff] }
 0x34d   : > { %5693 = vmatprep.mubr.msk.bf16.mxu1 %vm4560_vm9, %v4511_v58  ;;  %v6891_v50 = vunpack.i.l.bf16 %v9450_v14  ;;  %v7273_v24 = vpack.i.bf16 %v3058_v30, %v3057_v22  ;;  %v7283_v9 = vpack.i.bf16 %v9521_v20, %v3093_v60  ;;  %v2893_v58 = vld [vmem:[#allocation3 + $0xf0] sm:$0xff]  ;;  %v7293_v48 = vpack.i.bf16 %v9542_v5, %v9531_v29 }
 0x34e   : > { %v4489_v2 = vsel %vm4462_vm8, %v4452_v36, %v6896_v3  ;;  %v4490_v7 = vsel %vm4462_vm8, %v4453_v19, %v6897_v53  ;;  %v9485_v44 = vpop.permute.xlu0 %6909  ;;  %v7298_v3 = vpack.i.bf16 %v9529_v35, %v9527_v4  ;;  %v2891_v36 = vld [vmem:[#allocation3 + $0xe0] sm:$0xff]  ;;  %v2892_v19 = vld [vmem:[#allocation3 + $0xe8] sm:$0xff] }
 0x34f   : > { %v9487_v59 = vpop.permute.xlu1 %6904  ;;  %7229 = vrot.lane.b32.xlu0 %v7228_v41, %s7484_s29  ;;  %v4512_v6 = vpack.c.bf16 %v4490_v7, %v4489_v2  ;;  %v6912_v56 = vunpack.i.h.bf16 %v9485_v44  ;;  %v6911_v27 = vunpack.i.l.bf16 %v9485_v44  ;;  %v4237_v2 = vsel %vm1919_vm14, %v2893_v58, %v6901_v12  ;;  %v2989_v5 = vld [vmem:[#allocation3 + $0x8b] sm:$0xff] }
 0x350   : > { %7224 = vrot.lane.b32.xlu1 %v9365_v51, %s7484_s29  ;;  %v6907_v11 = vunpack.i.h.bf16 %v9487_v59  ;;  %v4236_v63 = vsel %vm1919_vm14, %v2892_v19, %v6892_v42 }
 0x351   : > { %5694 = vmatmul.mubr.msk.bf16.gmra.mrb[8].mxu1 %vm4560_vm9, %v4512_v6  ;;  %v4273_v6 = vsel %vm1993_vm1, %v4237_v2, %v6911_v27 }
 0x352   : > { %v9495_v45 = vpop.permute.xlu0 %6919  ;;  %v4272_v47 = vsel %vm1993_vm1, %v4236_v63, %v6907_v11 }
 0x353   : > { %v9497_v43 = vpop.permute.xlu1 %6914  ;;  %7239 = vrot.lane.b32.xlu0 %v9493_v61, %s7486_s23  ;;  %v6922_v14 = vunpack.i.h.bf16 %v9495_v45  ;;  %v6921_v54 = vunpack.i.l.bf16 %v9495_v45 }
 0x354   : > { %7234 = vrot.lane.b32.xlu1 %v7228_v41, %s7486_s23  ;;  %v4238_v41 = vsel %vm1919_vm14, %v2894_v28, %v6902_v62  ;;  %v6917_v7 = vunpack.i.h.bf16 %v9497_v43  ;;  %v6916_v44 = vunpack.i.l.bf16 %v9497_v43 }
 0x355   : > { %v4274_v38 = vsel %vm1993_vm1, %v4238_v41, %v6912_v56  ;;  %v4309_v43 = vsel %vm2067_vm3, %v4273_v6, %v6921_v54 }
 0x356   : > { %v9502_v51 = vpop.permute.xlu0 %6929  ;;  %v4310_v16 = vsel %vm2067_vm3, %v4274_v38, %v6922_v14 }
 0x357   : > { %v9504_v17 = vpop.permute.xlu1 %6924  ;;  %7249 = vrot.lane.b32.xlu0 %v7248_v33, %s7488_s16  ;;  %v6931_v18 = vunpack.i.l.bf16 %v9502_v51 }
 0x358   : > { %7244 = vrot.lane.b32.xlu1 %v7243_v21, %s7488_s16  ;;  %v6927_v0 = vunpack.i.h.bf16 %v9504_v17  ;;  %v6926_v52 = vunpack.i.l.bf16 %v9504_v17  ;;  %v6932_v17 = vunpack.i.h.bf16 %v9502_v51 }
 0x359   : > { %v4345_v14 = vsel %vm2141_vm5, %v4309_v43, %v6931_v18 }
 0x35a   : > { %v9510_v39 = vpop.permute.xlu0 %6939  ;;  %v4346_v54 = vsel %vm2141_vm5, %v4310_v16, %v6932_v17  ;;  %v2987_v16 = vld [vmem:[#allocation3 + $0x7b] sm:$0xff] }
 0x35b   : > { %v9514_v25 = vpop.permute.xlu1 %6934  ;;  %7259 = vrot.lane.b32.xlu0 %v7258_v23, %s7491_s24  ;;  %v6942_v12 = vunpack.i.h.bf16 %v9510_v39 }
 0x35c   : > { %7254 = vrot.lane.b32.xlu1 %v9388_v10, %s7491_s24  ;;  %v6906_v10 = vunpack.i.l.bf16 %v9487_v59  ;;  %v4235_v59 = vsel %vm1919_vm14, %v2891_v36, %v6891_v50  ;;  %v6937_v21 = vunpack.i.h.bf16 %v9514_v25  ;;  %v6936_v13 = vunpack.i.l.bf16 %v9514_v25  ;;  %v2950_v36 = vld [vmem:[#allocation3 + $0x7a] sm:$0xff] }
 0x35d   : > { %v4383_v19 = vsel %vm4351_vm4, %v4346_v54, %v6942_v12  ;;  %v2895_v54 = vld [vmem:[#allocation3 + $0x100] sm:$0xff] }
 0x35e   : > { %v9539_v57 = vpop.permute.xlu0 %6949  ;;  %v4271_v45 = vsel %vm1993_vm1, %v4235_v59, %v6906_v10 }
 0x35f   : > { %v6945_v53 = vpop.permute.xlu1 %6944  ;;  %7269 = vrot.lane.b32.xlu0 %v9517_v40, %s7492_s26  ;;  %v4307_v8 = vsel %vm2067_vm3, %v4271_v45, %v6916_v44  ;;  %v6952_v27 = vunpack.i.h.bf16 %v9539_v57  ;;  %v6951_v51 = vunpack.i.l.bf16 %v9539_v57 }
 0x360   : > { %7264 = vrot.lane.b32.xlu1 %v7258_v23, %s7492_s26  ;;  %v4308_v23 = vsel %vm2067_vm3, %v4272_v47, %v6917_v7  ;;  %v6947_v46 = vunpack.i.h.bf16 %v6945_v53  ;;  %v6946_v15 = vunpack.i.l.bf16 %v6945_v53  ;;  %v4343_v62 = vsel %vm2141_vm5, %v4307_v8, %v6926_v52  ;;  %v2949_v53 = vld [vmem:[#allocation3 + $0x72] sm:$0xff]  ;;  %v3024_v8 = vld [vmem:[#allocation3 + $0x84] sm:$0xff] }
 0x361   : > { %v4344_v25 = vsel %vm2141_vm5, %v4308_v23, %v6927_v0  ;;  %v4380_v50 = vsel %vm4351_vm4, %v4343_v62, %v6936_v13  ;;  %v4420_v44 = vsel %vm4388_vm6, %v4383_v19, %v6952_v27  ;;  %v7308_v45 = vpack.i.bf16 %v2950_v36, %v2949_v53  ;;  %v2986_v52 = vld [vmem:[#allocation3 + $0x73] sm:$0xff]  ;;  %v3061_v27 = vld [vmem:[#allocation3 + $0x85] sm:$0xff] }
 0x362   : > { %v6960_v33 = vpop.permute.xlu0 %6959  ;;  %v4381_v56 = vsel %vm4351_vm4, %v4344_v25, %v6937_v21  ;;  %v4417_v60 = vsel %vm4388_vm6, %v4380_v50, %v6946_v15  ;;  %v3025_v21 = vld [vmem:[#allocation3 + $0x8c] sm:$0xff] }
 0x363   : > { %v6955_v32 = vpop.permute.xlu1 %6954  ;;  %7279 = vrot.lane.b32.xlu0 %v7278_v34, %s7493_s22  ;;  %v6941_v34 = vunpack.i.l.bf16 %v9510_v39  ;;  %v4418_v39 = vsel %vm4388_vm6, %v4381_v56, %v6947_v46  ;;  %v6961_v58 = vunpack.i.l.bf16 %v6960_v33  ;;  %v7338_v23 = vpack.i.bf16 %v3025_v21, %v3024_v8  ;;  %v9636_v46 = vld [vmem:[#allocation3 + $0x95] sm:$0xff]  ;;  %v9640_v15 = vld [vmem:[#allocation3 + $0x8d] sm:$0xff] }
 0x364   : > { %7274 = vrot.lane.b32.xlu1 %v7273_v24, %s7493_s22  ;;  %v6957_v30 = vunpack.i.h.bf16 %v6955_v32  ;;  %v6956_v20 = vunpack.i.l.bf16 %v6955_v32  ;;  %v6962_v24 = vunpack.i.h.bf16 %v6960_v33  ;;  %v2988_v33 = vld [vmem:[#allocation3 + $0x83] sm:$0xff]  ;;  %v9648_v62 = vld [vmem:[#allocation3 + $0x8e] sm:$0xff] }
 0x365   : > { %v7328_v43 = vpack.i.bf16 %v2989_v5, %v2988_v33 }
 0x366   : > { %v9579_v42 = vpop.permute.xlu0 %6969  ;;  %v4454_v28 = vsel %vm4425_vm7, %v4417_v60, %v6956_v20  ;;  %v4455_v57 = vsel %vm4425_vm7, %v4418_v39, %v6957_v30  ;;  %v4457_v38 = vsel %vm4425_vm7, %v4420_v44, %v6962_v24  ;;  %v9644_v30 = vld [vmem:[#allocation3 + $0x96] sm:$0xff]  ;;  %v9646_v20 = vld [vmem:[#allocation3 + $0x9e] sm:$0xff] }
 0x367   : > { %v6965_v22 = vpop.permute.xlu1 %6964  ;;  %7289 = vrot.lane.b32.xlu0 %v7288_v26, %s7482_s27  ;;  %v6972_v25 = vunpack.i.h.bf16 %v9579_v42  ;;  %v6971_v12 = vunpack.i.l.bf16 %v9579_v42  ;;  %v2897_v24 = vld [vmem:[#allocation3 + $0x110] sm:$0xff]  ;;  %v2898_v42 = vld [vmem:[#allocation3 + $0x118] sm:$0x3f] }
 0x368   : > { %v6967_v11 = vunpack.i.h.bf16 %v6965_v22  ;;  %v6966_v10 = vunpack.i.l.bf16 %v6965_v22  ;;  %7284 = vrot.lane.b32.xlu1 %v7283_v9, %s7494_s17  ;;  %v4382_v9 = vsel %vm4351_vm4, %v4345_v14, %v6941_v34 }
 0x369   : > { %v4419_v7 = vsel %vm4388_vm6, %v4382_v9, %v6951_v51 }
 0x36a   : > { %v4491_v49 = vsel %vm4462_vm8, %v4454_v28, %v6966_v10  ;;  %v4492_v55 = vsel %vm4462_vm8, %v4455_v57, %v6967_v11  ;;  %v9598_v26 = vpop.permute.xlu0 %6979  ;;  %v4456_v6 = vsel %vm4425_vm7, %v4419_v7, %v6961_v58  ;;  %v7353_v11 = vpack.i.bf16 %v9640_v15, %v3061_v27  ;;  %v9658_v10 = vld [vmem:[#allocation3 + $0x86] sm:$0xff] }
 0x36b   : > { %v4513_v41 = vpack.c.bf16 %v4492_v55, %v4491_v49  ;;  %v6975_v2 = vpop.permute.xlu1 %6974  ;;  %7299 = vrot.lane.b32.xlu0 %v7298_v3, %s7482_s27  ;;  %v6982_v17 = vunpack.i.h.bf16 %v9598_v26  ;;  %v6981_v18 = vunpack.i.l.bf16 %v9598_v26  ;;  %v7368_v57 = vpack.i.bf16 %v9646_v20, %v9644_v30  ;;  %v2896_v49 = vld [vmem:[#allocation3 + $0x108] sm:$0xff] }
 0x36c   : > { %v6977_v63 = vunpack.i.h.bf16 %v6975_v2  ;;  %v6976_v59 = vunpack.i.l.bf16 %v6975_v2  ;;  %7294 = vrot.lane.b32.xlu1 %v7293_v48, %s7494_s17  ;;  %v7363_v14 = vpack.i.bf16 %v9648_v62, %v9658_v10  ;;  %v4240_v9 = vsel %vm1919_vm14, %v2896_v49, %v6972_v25  ;;  %v4796_v10 = vld [vmem:[%s7601_s25 + $0x13] sm:$0xff] }
 0x36d   : > { %5697 = vmatprep.mubr.msk.bf16.mxu1 %vm4560_vm9, %v4513_v41  ;;  %v4242_v55 = vsel %vm1919_vm14, %v2898_v42, %v6982_v17  ;;  %v4241_v26 = vsel %vm1919_vm14, %v2897_v24, %v6981_v18  ;;  %v4797_v24 = vld [vmem:[%s7601_s25 + $0x1b] sm:$0xff] }
 0x36e   : > { %v4493_v4 = vsel %vm4462_vm8, %v4456_v6, %v6976_v59  ;;  %v4494_v35 = vsel %vm4462_vm8, %v4457_v38, %v6977_v63  ;;  %v6990_v3 = vpop.permute.xlu0 %6989 }
 0x36f   : > { %v4514_v47 = vpack.c.bf16 %v4494_v35, %v4493_v4  ;;  %v9617_v0 = vpop.permute.xlu1 %6984  ;;  %7309 = vrot.lane.b32.xlu0 %v7308_v45, %s7484_s29  ;;  %v6992_v34 = vunpack.i.h.bf16 %v6990_v3  ;;  %v6991_v50 = vunpack.i.l.bf16 %v6990_v3 }
 0x370   : > { %7304 = vrot.lane.b32.xlu1 %v9493_v61, %s7484_s29  ;;  %v7323_v61 = vpack.i.bf16 %v2987_v16, %v2986_v52  ;;  %v6987_v51 = vunpack.i.h.bf16 %v9617_v0  ;;  %v6986_v22 = vunpack.i.l.bf16 %v9617_v0 }
 0x371   : > { %5698 = vmatmul.mubr.msk.bf16.gmra.mrb[12].mxu1 %vm4560_vm9, %v4514_v47  ;;  %v4277_v19 = vsel %vm1993_vm1, %v4241_v26, %v6991_v50  ;;  %v4278_v41 = vsel %vm1993_vm1, %v4242_v55, %v6992_v34 }
 0x372   : > { %v9623_v29 = vpop.permute.xlu0 %6999  ;;  %v4276_v44 = vsel %vm1993_vm1, %v4240_v9, %v6987_v51 }
 0x373   : > { %v9625_v48 = vpop.permute.xlu1 %6994  ;;  %7319 = vrot.lane.b32.xlu0 %v8954_v1, %s7486_s23  ;;  %v9638_v1 = vld [vmem:[#allocation3 + $0x9d] sm:$0xff]  ;;  %v7002_v58 = vunpack.i.h.bf16 %v9623_v29  ;;  %v7001_v28 = vunpack.i.l.bf16 %v9623_v29 }
 0x374   : > { %7314 = vrot.lane.b32.xlu1 %v7308_v45, %s7486_s23  ;;  %v7358_v39 = vpack.i.bf16 %v9638_v1, %v9636_v46  ;;  %v6997_v53 = vunpack.i.h.bf16 %v9625_v48  ;;  %v6996_v36 = vunpack.i.l.bf16 %v9625_v48 }
 0x375   : > { %v4313_v38 = vsel %vm2067_vm3, %v4277_v19, %v7001_v28  ;;  %v4314_v45 = vsel %vm2067_vm3, %v4278_v41, %v7002_v58  ;;  %v4798_v19 = vld [vmem:[%s7601_s25 + $0x23] sm:$0xff]  ;;  %v4799_v41 = vld [vmem:[%s7601_s25 + $0x2b] sm:$0xff] }
 0x376   : > { %v9630_v13 = vpop.permute.xlu0 %7009  ;;  %v4312_v47 = vsel %vm2067_vm3, %v4276_v44, %v6997_v53  ;;  %v4832_v53 = vpack.c.bf16 %v4797_v24, %v4796_v10 }
 0x377   : > { %v9632_v32 = vpop.permute.xlu1 %7004  ;;  %7329 = vrot.lane.b32.xlu0 %v7328_v43, %s7488_s16  ;;  %v7012_v63 = vunpack.i.h.bf16 %v9630_v13  ;;  %v7011_v59 = vunpack.i.l.bf16 %v9630_v13 }
 0x378   : > { %7324 = vrot.lane.b32.xlu1 %v7323_v61, %s7488_s16  ;;  %v7007_v4 = vunpack.i.h.bf16 %v9632_v32  ;;  %v7006_v35 = vunpack.i.l.bf16 %v9632_v32 }
 0x379   : > { %v4349_v43 = vsel %vm2141_vm5, %v4313_v38, %v7011_v59  ;;  %v4350_v16 = vsel %vm2141_vm5, %v4314_v45, %v7012_v63  ;;  %v4833_v63 = vpack.c.bf16 %v4799_v41, %v4798_v19 }
 0x37a   : > { %v7020_v56 = vpop.permute.xlu0 %7019  ;;  %v4348_v8 = vsel %vm2141_vm5, %v4312_v47, %v7007_v4  ;;  %v4802_v4 = vld [vmem:[%s7601_s25 + $0x43] sm:$0xff]  ;;  %v4805_v47 = vld [vmem:[%s7601_s25 + $0x5b] sm:$0xff] }
 0x37b   : > { %v7015_v60 = vpop.permute.xlu1 %7014  ;;  %7339 = vrot.lane.b32.xlu0 %v7338_v23, %s7491_s24  ;;  %v7022_v0 = vunpack.i.h.bf16 %v7020_v56  ;;  %v7021_v29 = vunpack.i.l.bf16 %v7020_v56 }
 0x37c   : > { %7334 = vrot.lane.b32.xlu1 %v9517_v40, %s7491_s24  ;;  %v4239_v40 = vsel %vm1919_vm14, %v2895_v54, %v6971_v12  ;;  %v7017_v5 = vunpack.i.h.bf16 %v7015_v60  ;;  %v7016_v48 = vunpack.i.l.bf16 %v7015_v60 }
 0x37d   : > { %v4275_v7 = vsel %vm1993_vm1, %v4239_v40, %v6986_v22  ;;  %v4386_v1 = vsel %vm4351_vm4, %v4349_v43, %v7021_v29  ;;  %v4387_v15 = vsel %vm4351_vm4, %v4350_v16, %v7022_v0 }
 0x37e   : > { %v7030_v2 = vpop.permute.xlu0 %7029  ;;  %v4311_v3 = vsel %vm2067_vm3, %v4275_v7, %v6996_v36  ;;  %v4385_v20 = vsel %vm4351_vm4, %v4348_v8, %v7017_v5  ;;  %v4801_v7 = vld [vmem:[%s7601_s25 + $0x3b] sm:$0xff] }
 0x37f   : > { %v7025_v6 = vpop.permute.xlu1 %7024  ;;  %7349 = vrot.lane.b32.xlu0 %v8981_v37, %s7492_s26  ;;  %v7032_v52 = vunpack.i.h.bf16 %v7030_v2  ;;  %v7031_v37 = vunpack.i.l.bf16 %v7030_v2  ;;  %v4347_v32 = vsel %vm2141_vm5, %v4311_v3, %v7006_v35  ;;  %v4800_v2 = vld [vmem:[%s7601_s25 + $0x33] sm:$0xff]  ;;  %v4803_v35 = vld [vmem:[%s7601_s25 + $0x4b] sm:$0xff] }
 0x380   : > { %7344 = vrot.lane.b32.xlu1 %v7338_v23, %s7492_s26  ;;  %v7027_v21 = vunpack.i.h.bf16 %v7025_v6  ;;  %v7026_v13 = vunpack.i.l.bf16 %v7025_v6  ;;  %v4384_v30 = vsel %vm4351_vm4, %v4347_v32, %v7016_v48  ;;  %v4834_v6 = vpack.c.bf16 %v4801_v7, %v4800_v2  ;;  %v4804_v3 = vld [vmem:[%s7601_s25 + $0x53] sm:$0xff] }
 0x381   : > { %v4423_v62 = vsel %vm4388_vm6, %v4386_v1, %v7031_v37  ;;  %v4424_v25 = vsel %vm4388_vm6, %v4387_v15, %v7032_v52  ;;  %v4835_v29 = vpack.c.bf16 %v4803_v35, %v4802_v4  ;;  %v4836_v48 = vpack.c.bf16 %v4805_v47, %v4804_v3  ;;  %v4806_v52 = vld [vmem:[%s7601_s25 + $0x63] sm:$0xff]  ;;  %v4807_v37 = vld [vmem:[%s7601_s25 + $0x6b] sm:$0xff] }
 0x382   : > { %v7040_v33 = vpop.permute.xlu0 %7039  ;;  %v4421_v34 = vsel %vm4388_vm6, %v4384_v30, %v7026_v13  ;;  %v4422_v50 = vsel %vm4388_vm6, %v4385_v20, %v7027_v21  ;;  %v4809_v21 = vld [vmem:[%s7601_s25 + $0x7b] sm:$0xff]  ;;  %v9743_v13 = vld [vmem:[%s7601_s25 + $0x83] sm:$0xff]  ;;  %v2864_v15 = vld [vmem:[#allocation3 + $0x8] sm:$0xff]  ;;  %v4837_v20 = vpack.c.bf16 %v4807_v37, %v4806_v52 }
 0x383   : > { %v7035_v61 = vpop.permute.xlu1 %7034  ;;  %7359 = vrot.lane.b32.xlu0 %v7358_v39, %s7493_s22  ;;  %v7042_v23 = vunpack.i.h.bf16 %v7040_v33  ;;  %v7041_v46 = vunpack.i.l.bf16 %v7040_v33  ;;  %v9739_v33 = vld [vmem:[%s7601_s25 + $0x73] sm:$0xff]  ;;  %v2863_v1 = vld [vmem:[#allocation3] sm:$0xff] }
 0x384   : > { %7354 = vrot.lane.b32.xlu1 %v7353_v11, %s7493_s22  ;;  %v7037_v17 = vunpack.i.h.bf16 %v7035_v61  ;;  %v7036_v18 = vunpack.i.l.bf16 %v7035_v61  ;;  %v9746_v61 = vld [vmem:[%s7601_s25 + $0x8b] sm:$0xff] }
 0x385   : > { %v4460_v22 = vsel %vm4425_vm7, %v4423_v62, %v7041_v46  ;;  %v4461_v60 = vsel %vm4425_vm7, %v4424_v25, %v7042_v23  ;;  %v2865_v62 = vld [vmem:[#allocation3 + $0x10] sm:$0xff]  ;;  %v2866_v25 = vld [vmem:[#allocation3 + $0x18] sm:$0xff] }
 0x386   : > { %v7050_v12 = vpop.permute.xlu0 %7049  ;;  %v4458_v42 = vsel %vm4425_vm7, %v4421_v34, %v7036_v18  ;;  %v4459_v58 = vsel %vm4425_vm7, %v4422_v50, %v7037_v17 }
 0x387   : > { %v7052_v56 = vunpack.i.h.bf16 %v7050_v12  ;;  %v7051_v27 = vunpack.i.l.bf16 %v7050_v12  ;;  %v7045_v51 = vpop.permute.xlu1 %7044  ;;  %7369 = vrot.lane.b32.xlu0 %v7368_v57, %s7494_s17 }
 0x388   : > { %v7047_v39 = vunpack.i.h.bf16 %v7045_v51  ;;  %v7046_v11 = vunpack.i.l.bf16 %v7045_v51  ;;  %7364 = vrot.lane.b32.xlu1 %v7363_v14, %s7494_s17 }
 0x389   : > { %v4497_v28 = vsel %vm4462_vm8, %v4460_v22, %v7051_v27  ;;  %v4498_v57 = vsel %vm4462_vm8, %v4461_v60, %v7052_v56  ;;  %v4838_v56 = vpack.c.bf16 %v4809_v21, %v9739_v33  ;;  %v4839_v27 = vpack.c.bf16 %v9746_v61, %v9743_v13  ;;  %v4812_v33 = vld [vmem:[%s7601_s25 + $0x93] sm:$0xff] }
 0x38a   : > { %v4495_v54 = vsel %vm4462_vm8, %v4458_v42, %v7046_v11  ;;  %v4496_v49 = vsel %vm4462_vm8, %v4459_v58, %v7047_v39  ;;  %v7060_v55 = vpop.permute.xlu0 %7059  ;;  %v4516_v36 = vpack.c.bf16 %v4498_v57, %v4497_v28 }
 0x38b   : > { %v4515_v14 = vpack.c.bf16 %v4496_v49, %v4495_v54  ;;  %v7055_v26 = vpop.permute.xlu1 %7054  ;;  %v7062_v43 = vunpack.i.h.bf16 %v7060_v55  ;;  %v7061_v16 = vunpack.i.l.bf16 %v7060_v55 }
 0x38c   : > { %v7057_v32 = vunpack.i.h.bf16 %v7055_v26  ;;  %v7056_v8 = vunpack.i.l.bf16 %v7055_v26 }
 0x38d   : > { %5701 = vmatprep.mubr.msk.bf16.mxu1 %vm4560_vm9, %v4515_v14  ;;  %v4209_v51 = vsel %vm1919_vm14, %v2865_v62, %v7061_v16  ;;  %v4210_v22 = vsel %vm1919_vm14, %v2866_v25, %v7062_v43  ;;  %v4813_v43 = vld [vmem:[%s7601_s25 + $0x9b] sm:$0xff] }
 0x38e   : > { %5702 = vmatmul.mubr.msk.bf16.gmra.mrb[16].mxu1 %vm4560_vm9, %v4516_v36  ;;  %v7070_v9 = vpop.permute.xlu0 %7069  ;;  %v4208_v11 = vsel %vm1919_vm14, %v2864_v15, %v7057_v32  ;;  %v4207_v10 = vsel %vm1919_vm14, %v2863_v1, %v7056_v8  ;;  %v4840_v25 = vpack.c.bf16 %v4813_v43, %v4812_v33  ;;  %v2870_v33 = vld [vmem:[#allocation3 + $0x38] sm:$0xff] }
 0x38f   : > { %v7065_v40 = vpop.permute.xlu1 %7064  ;;  %5707 = vmatprep.mubr.msk.bf16.mxu1 %vm496_vm0, %v4832_v53  ;;  %v7072_v23 = vunpack.i.h.bf16 %v7070_v9  ;;  %v7071_v46 = vunpack.i.l.bf16 %v7070_v9 }
 0x390   : > { %v7067_v17 = vunpack.i.h.bf16 %v7065_v40  ;;  %v7066_v18 = vunpack.i.l.bf16 %v7065_v40 }
 0x391   : > { %v4245_v24 = vsel %vm1993_vm1, %v4209_v51, %v7071_v46  ;;  %v4246_v42 = vsel %vm1993_vm1, %v4210_v22, %v7072_v23 }
 0x392   : > { %v7080_v44 = vpop.permute.xlu0 %7079  ;;  %v4243_v58 = vsel %vm1993_vm1, %v4207_v10, %v7066_v18  ;;  %v4244_v28 = vsel %vm1993_vm1, %v4208_v11, %v7067_v17 }
 0x393   : > { %v7075_v59 = vpop.permute.xlu1 %7074  ;;  %v7082_v12 = vunpack.i.h.bf16 %v7080_v44  ;;  %v7081_v34 = vunpack.i.l.bf16 %v7080_v44 }
 0x394   : > { %v7077_v60 = vunpack.i.h.bf16 %v7075_v59  ;;  %v7076_v39 = vunpack.i.l.bf16 %v7075_v59 }
 0x395   : > { %v4281_v55 = vsel %vm2067_vm3, %v4245_v24, %v7081_v34  ;;  %v4282_v14 = vsel %vm2067_vm3, %v4246_v42, %v7082_v12  ;;  %v4814_v42 = vld [vmem:[%s7601_s25 + $0xa3] sm:$0xff] }
 0x396   : > { %5708 = vmatmul.mubr.msk.bf16.vlgmr.msra.gmra.mrb[20].mxu1 %vm496_vm0, %v4833_v63  ;;  %v9723_v38 = vpop.permute.xlu0 %7089  ;;  %v4280_v9 = vsel %vm2067_vm3, %v4244_v28, %v7077_v60  ;;  %v4279_v40 = vsel %vm2067_vm3, %v4243_v58, %v7076_v39  ;;  %v4815_v58 = vld [vmem:[%s7601_s25 + $0xab] sm:$0xff]  ;;  %v4816_v28 = vld [vmem:[%s7601_s25 + $0xb3] sm:$0xff] }
 0x397   : > { %v9725_v45 = vpop.permute.xlu1 %7084  ;;  %5711 = vmatprep.mubr.msk.bf16.mxu1 %vm496_vm0, %v4834_v6  ;;  %v7092_v2 = vunpack.i.h.bf16 %v9723_v38  ;;  %v7091_v7 = vunpack.i.l.bf16 %v9723_v38  ;;  %v4841_v13 = vpack.c.bf16 %v4815_v58, %v4814_v42 }
 0x398   : > { %v7087_v57 = vunpack.i.h.bf16 %v9725_v45  ;;  %v7086_v54 = vunpack.i.l.bf16 %v9725_v45 }
 0x399   : > { %v4317_v23 = vsel %vm2141_vm5, %v4281_v55, %v7091_v7  ;;  %v4318_v46 = vsel %vm2141_vm5, %v4282_v14, %v7092_v2  ;;  %v4818_v14 = vld [vmem:[%s7601_s25 + $0xc3] sm:$0xff]  ;;  %v4823_v7 = vld [vmem:[%s7601_s25 + $0xeb] sm:$0xff] }
 0x39a   : > { %v9732_v0 = vpop.permute.xlu0 %7099  ;;  %v4315_v59 = vsel %vm2141_vm5, %v4279_v40, %v7086_v54  ;;  %v4316_v6 = vsel %vm2141_vm5, %v4280_v9, %v7087_v57  ;;  %v4817_v57 = vld [vmem:[%s7601_s25 + $0xbb] sm:$0xff]  ;;  %v4822_v2 = vld [vmem:[%s7601_s25 + $0xe3] sm:$0xff] }
 0x39b   : > { %v9734_v5 = vpop.permute.xlu1 %7094  ;;  %v7102_v45 = vunpack.i.h.bf16 %v9732_v0  ;;  %v7101_v4 = vunpack.i.l.bf16 %v9732_v0 }
 0x39c   : > { %v7097_v26 = vunpack.i.h.bf16 %v9734_v5  ;;  %v7096_v53 = vunpack.i.l.bf16 %v9734_v5 }
 0x39d   : > { %v4354_v18 = vsel %vm4351_vm4, %v4317_v23, %v7101_v4  ;;  %v9842_v4 = vld [vmem:[%s7601_s25 + $0x10b] sm:$0xff] }
 0x39e   : > { %5712 = vmatmul.mubr.msk.bf16.gmra.mrb[24].mxu1 %vm496_vm0, %v4835_v29  ;;  %v9749_v30 = vpop.permute.xlu0 %7109  ;;  %v4352_v3 = vsel %vm4351_vm4, %v4315_v59, %v7096_v53  ;;  %v4353_v38 = vsel %vm4351_vm4, %v4316_v6, %v7097_v26  ;;  %v4819_v26 = vld [vmem:[%s7601_s25 + $0xcb] sm:$0xff]  ;;  %v4820_v53 = vld [vmem:[%s7601_s25 + $0xd3] sm:$0xff]  ;;  %v4825_v6 = vld [vmem:[%s7601_s25 + $0xfb] sm:$0xff] }
 0x39f   : > { %v7105_v50 = vpop.permute.xlu1 %7104  ;;  %5715 = vmatprep.mubr.msk.bf16.mxu1 %vm496_vm0, %v4836_v48  ;;  %v7112_v47 = vunpack.i.h.bf16 %v9749_v30  ;;  %v7111_v29 = vunpack.i.l.bf16 %v9749_v30  ;;  %v4355_v30 = vsel %vm4351_vm4, %v4318_v46, %v7102_v45  ;;  %v4843_v40 = vpack.c.bf16 %v4819_v26, %v4818_v14  ;;  %v9839_v45 = vld [vmem:[%s7601_s25 + $0x103] sm:$0xff]  ;;  %v2868_v23 = vld [vmem:[#allocation3 + $0x28] sm:$0xff] }
 0x3a0   : > { %v7107_v19 = vunpack.i.h.bf16 %v7105_v50  ;;  %v7106_v41 = vunpack.i.l.bf16 %v7105_v50 }
 0x3a1   : > { %v4391_v12 = vsel %vm4388_vm6, %v4354_v18, %v7111_v29  ;;  %v4392_v34 = vsel %vm4388_vm6, %v4355_v30, %v7112_v47 }
 0x3a2   : > { %v7120_v49 = vpop.permute.xlu0 %7119  ;;  %v4389_v48 = vsel %vm4388_vm6, %v4352_v3, %v7106_v41  ;;  %v4390_v52 = vsel %vm4388_vm6, %v4353_v38, %v7107_v19 }
 0x3a3   : > { %v7115_v36 = vpop.permute.xlu1 %7114  ;;  %v7122_v16 = vunpack.i.h.bf16 %v7120_v49  ;;  %v7121_v21 = vunpack.i.l.bf16 %v7120_v49 }
 0x3a4   : > { %v7117_v44 = vunpack.i.h.bf16 %v7115_v36  ;;  %v7116_v63 = vunpack.i.l.bf16 %v7115_v36  ;;  %v4821_v36 = vld [vmem:[%s7601_s25 + $0xdb] sm:$0xff] }
 0x3a5   : > { %v4428_v51 = vsel %vm4425_vm7, %v4391_v12, %v7121_v21  ;;  %v4429_v22 = vsel %vm4425_vm7, %v4392_v34, %v7122_v16  ;;  %v4844_v41 = vpack.c.bf16 %v4821_v36, %v4820_v53 }
 0x3a6   : > { %5716 = vmatmul.mubr.msk.bf16.gmra.mrb[28].mxu1 %vm496_vm0, %v4837_v20  ;;  %v9778_v35 = vpop.permute.xlu0 %7129  ;;  %v4426_v32 = vsel %vm4425_vm7, %v4389_v48, %v7116_v63  ;;  %v4427_v8 = vsel %vm4425_vm7, %v4390_v52, %v7117_v44  ;;  %v9833_v44 = vld [vmem:[%s7601_s25 + $0xf3] sm:$0xff] }
 0x3a7   : > { %v7125_v5 = vpop.permute.xlu1 %7124  ;;  %5719 = vmatprep.mubr.msk.bf16.mxu1 %vm496_vm0, %v4838_v56  ;;  %v7132_v3 = vunpack.i.h.bf16 %v9778_v35  ;;  %v7131_v38 = vunpack.i.l.bf16 %v9778_v35  ;;  %v4847_v35 = vpack.c.bf16 %v9842_v4, %v9839_v45 }
 0x3a8   : > { %v7127_v0 = vunpack.i.h.bf16 %v7125_v5  ;;  %v7126_v37 = vunpack.i.l.bf16 %v7125_v5 }
 0x3a9   : > { %v4212_v18 = vsel %vm1919_vm14, %v2868_v23, %v7132_v3 }
 0x3aa   : > { %v4463_v1 = vsel %vm4462_vm8, %v4426_v32, %v7126_v37  ;;  %v4464_v15 = vsel %vm4462_vm8, %v4427_v8, %v7127_v0  ;;  %v9795_v17 = vpop.permute.xlu0 %7139  ;;  %v4845_v0 = vpack.c.bf16 %v4823_v7, %v4822_v2  ;;  %v2869_v37 = vld [vmem:[#allocation3 + $0x30] sm:$0xff]  ;;  %v4846_v32 = vpack.c.bf16 %v4825_v6, %v9833_v44  ;;  %v2867_v8 = vld [vmem:[#allocation3 + $0x20] sm:$0xff] }
 0x3ab   : > { %v4499_v20 = vpack.c.bf16 %v4464_v15, %v4463_v1  ;;  %v7135_v62 = vpop.permute.xlu1 %7134  ;;  %v7142_v63 = vunpack.i.h.bf16 %v9795_v17  ;;  %v7141_v59 = vunpack.i.l.bf16 %v9795_v17  ;;  %v4211_v30 = vsel %vm1919_vm14, %v2867_v8, %v7131_v38  ;;  %v4828_v44 = vld [vmem:[%s7601_s25 + $0x113] sm:$0xff] }
 0x3ac   : > { %v7137_v50 = vunpack.i.h.bf16 %v7135_v62  ;;  %v7136_v56 = vunpack.i.l.bf16 %v7135_v62 }
 0x3ad   : > { %5669 = vmatprep.mubr.msk.bf16.mxu0 %vm4560_vm9, %v4499_v20  ;;  %v4214_v46 = vsel %vm1919_vm14, %v2870_v33, %v7142_v63  ;;  %v4213_v1 = vsel %vm1919_vm14, %v2869_v37, %v7141_v59  ;;  %v4829_v63 = vld [vmem:[%s7601_s25 + $0x11b] sm:$0xff] }
 0x3ae   : > { %v4465_v60 = vsel %vm4462_vm8, %v4428_v51, %v7136_v56  ;;  %v4466_v39 = vsel %vm4462_vm8, %v4429_v22, %v7137_v50  ;;  %5720 = vmatmul.mubr.msk.bf16.gmra.mrb[32].mxu1 %vm496_vm0, %v4839_v27  ;;  %v7150_v11 = vpop.permute.xlu0 %7149  ;;  %v4842_v27 = vpack.c.bf16 %v4817_v57, %v4816_v28 }
 0x3af   : > { %v4500_v10 = vpack.c.bf16 %v4466_v39, %v4465_v60  ;;  %v7145_v24 = vpop.permute.xlu1 %7144  ;;  %5723 = vmatprep.mubr.msk.bf16.mxu1 %vm496_vm0, %v4840_v25  ;;  %v7152_v47 = vunpack.i.h.bf16 %v7150_v11  ;;  %v7151_v29 = vunpack.i.l.bf16 %v7150_v11 }
 0x3b0   : > { %v7147_v5 = vunpack.i.h.bf16 %v7145_v24  ;;  %v7146_v48 = vunpack.i.l.bf16 %v7145_v24 }
 0x3b1   : > { %5670 = vmatmul.mubr.msk.bf16.vlgmr.msra.gmra.mrb[36].mxu0 %vm4560_vm9, %v4500_v10  ;;  %v4249_v20 = vsel %vm1993_vm1, %v4213_v1, %v7151_v29  ;;  %v4250_v62 = vsel %vm1993_vm1, %v4214_v46, %v7152_v47 }
 0x3b2   : > { %v7160_v54 = vpop.permute.xlu0 %7159  ;;  %v4247_v25 = vsel %vm1993_vm1, %v4211_v30, %v7146_v48  ;;  %v4248_v12 = vsel %vm1993_vm1, %v4212_v18, %v7147_v5 }
 0x3b3   : > { %v7155_v61 = vpop.permute.xlu1 %7154  ;;  %v7162_v43 = vunpack.i.h.bf16 %v7160_v54  ;;  %v7161_v16 = vunpack.i.l.bf16 %v7160_v54 }
 0x3b4   : > { %v7157_v15 = vunpack.i.h.bf16 %v7155_v61  ;;  %v7156_v17 = vunpack.i.l.bf16 %v7155_v61 }
 0x3b5   : > { %v4285_v51 = vsel %vm2067_vm3, %v4249_v20, %v7161_v16  ;;  %v4286_v22 = vsel %vm2067_vm3, %v4250_v62, %v7162_v43  ;;  %v4848_v16 = vpack.c.bf16 %v4829_v63, %v4828_v44  ;;  %v4830_v62 = vld [vmem:[%s7601_s25 + $0x123] sm:$0xff] }
 0x3b6   : > { %5724 = vmatmul.mubr.msk.bf16.gmra.mrb[0].mxu1 %vm496_vm0, %v4841_v13  ;;  %v9817_v49 = vpop.permute.xlu0 %7169  ;;  %v4283_v10 = vsel %vm2067_vm3, %v4247_v25, %v7156_v17  ;;  %v4284_v24 = vsel %vm2067_vm3, %v4248_v12, %v7157_v15  ;;  %v4831_v25 = vld [vmem:[%s7601_s25 + $0x12b] sm:$0x3f] }
 0x3b7   : > { %v9819_v55 = vpop.permute.xlu1 %7164  ;;  %5727 = vmatprep.mubr.msk.bf16.mxu1 %vm496_vm0, %v4842_v27  ;;  %v7172_v28 = vunpack.i.h.bf16 %v9817_v49  ;;  %v7171_v57 = vunpack.i.l.bf16 %v9817_v49 }
 0x3b8   : > { %v7167_v34 = vunpack.i.h.bf16 %v9819_v55  ;;  %v7166_v50 = vunpack.i.l.bf16 %v9819_v55 }
 0x3b9   : > { %v4321_v47 = vsel %vm2141_vm5, %v4285_v51, %v7171_v57  ;;  %v4322_v29 = vsel %vm2141_vm5, %v4286_v22, %v7172_v28  ;;  %v2873_v28 = vld [vmem:[#allocation3 + $0x50] sm:$0xff]  ;;  %v2874_v57 = vld [vmem:[#allocation3 + $0x58] sm:$0xff] }
 0x3ba   : > { %v9826_v9 = vpop.permute.xlu0 %7179  ;;  %v4319_v61 = vsel %vm2141_vm5, %v4283_v10, %v7166_v50  ;;  %v4320_v27 = vsel %vm2141_vm5, %v4284_v24, %v7167_v34  ;;  %v4849_v34 = vpack.c.bf16 %v4831_v25, %v4830_v62 }
 0x3bb   : > { %v9828_v19 = vpop.permute.xlu1 %7174  ;;  %v7182_v55 = vunpack.i.h.bf16 %v9826_v9  ;;  %v7181_v14 = vunpack.i.l.bf16 %v9826_v9 }
 0x3bc   : > { %v7177_v60 = vunpack.i.h.bf16 %v9828_v19  ;;  %v7176_v39 = vunpack.i.l.bf16 %v9828_v19 }
 0x3bd   : > { %v4359_v37 = vsel %vm4351_vm4, %v4322_v29, %v7182_v55  ;;  %v2872_v55 = vld [vmem:[#allocation3 + $0x48] sm:$0xff] }
 0x3be   : > { %5728 = vmatmul.mubr.msk.bf16.gmra.mrb[4].mxu1 %vm496_vm0, %v4843_v40  ;;  %v9847_v52 = vpop.permute.xlu0 %7189  ;;  %v4356_v53 = vsel %vm4351_vm4, %v4319_v61, %v7176_v39  ;;  %v4357_v49 = vsel %vm4351_vm4, %v4320_v27, %v7177_v60  ;;  %v2871_v27 = vld [vmem:[#allocation3 + $0x40] sm:$0xff] }
 0x3bf   : > { %v7185_v21 = vpop.permute.xlu1 %7184  ;;  %5731 = vmatprep.mubr.msk.bf16.mxu1 %vm496_vm0, %v4844_v41  ;;  %v7192_v36 = vunpack.i.h.bf16 %v9847_v52  ;;  %v7191_v40 = vunpack.i.l.bf16 %v9847_v52 }
 0x3c0   : > { %v7187_v42 = vunpack.i.h.bf16 %v7185_v21  ;;  %v7186_v58 = vunpack.i.l.bf16 %v7185_v21 }
 0x3c2   : > { %v7200_v56 = vpop.permute.xlu0 %7199  ;;  %v4393_v41 = vsel %vm4388_vm6, %v4356_v53, %v7186_v58  ;;  %v4394_v2 = vsel %vm4388_vm6, %v4357_v49, %v7187_v42 }
 0x3c3   : > { %v7195_v11 = vpop.permute.xlu1 %7194  ;;  %v7202_v59 = vunpack.i.h.bf16 %v7200_v56  ;;  %v7201_v6 = vunpack.i.l.bf16 %v7200_v56 }
 0x3c4   : > { %v7197_v54 = vunpack.i.h.bf16 %v7195_v11  ;;  %v7196_v13 = vunpack.i.l.bf16 %v7195_v11 }
 0x3c6   : > { %5732 = vmatmul.mubr.msk.bf16.gmra.mrb[8].mxu1 %vm496_vm0, %v4845_v0  ;;  %v9876_v26 = vpop.permute.xlu0 %7209  ;;  %v4430_v3 = vsel %vm4425_vm7, %v4393_v41, %v7196_v13  ;;  %v4431_v38 = vsel %vm4425_vm7, %v4394_v2, %v7197_v54  ;;  %v4358_v0 = vsel %vm4351_vm4, %v4321_v47, %v7181_v14 }
 0x3c7   : > { %v7205_v19 = vpop.permute.xlu1 %7204  ;;  %5735 = vmatprep.mubr.msk.bf16.mxu1 %vm496_vm0, %v4846_v32  ;;  %v4395_v21 = vsel %vm4388_vm6, %v4358_v0, %v7191_v40  ;;  %v4396_v32 = vsel %vm4388_vm6, %v4359_v37, %v7192_v36  ;;  %v7212_v60 = vunpack.i.h.bf16 %v9876_v26  ;;  %v7211_v39 = vunpack.i.l.bf16 %v9876_v26 }
 0x3c8   : > { %v7207_v9 = vunpack.i.h.bf16 %v7205_v19  ;;  %v7206_v7 = vunpack.i.l.bf16 %v7205_v19  ;;  %v4432_v46 = vsel %vm4425_vm7, %v4395_v21, %v7201_v6  ;;  %v4433_v1 = vsel %vm4425_vm7, %v4396_v32, %v7202_v59 }
 0x3c9   : > { %v4216_v26 = vsel %vm1919_vm14, %v2872_v55, %v7212_v60  ;;  %v4215_v40 = vsel %vm1919_vm14, %v2871_v27, %v7211_v39 }
 0x3ca   : > { %v4467_v5 = vsel %vm4462_vm8, %v4430_v3, %v7206_v7  ;;  %v4468_v48 = vsel %vm4462_vm8, %v4431_v38, %v7207_v9  ;;  %v7220_v52 = vpop.permute.xlu0 %7219 }
 0x3cb   : > { %v4501_v33 = vpack.c.bf16 %v4468_v48, %v4467_v5  ;;  %v7215_v43 = vpop.permute.xlu1 %7214  ;;  %v7221_v22 = vunpack.i.l.bf16 %v7220_v52 }
 0x3cc   : > { %v7217_v8 = vunpack.i.h.bf16 %v7215_v43  ;;  %v7216_v23 = vunpack.i.l.bf16 %v7215_v43 }
 0x3cd   : > { %5673 = vmatprep.mubr.msk.bf16.mxu0 %vm4560_vm9, %v4501_v33  ;;  %v4217_v53 = vsel %vm1919_vm14, %v2873_v28, %v7221_v22 }
 0x3ce   : > { %v4469_v15 = vsel %vm4462_vm8, %v4432_v46, %v7216_v23  ;;  %v4470_v17 = vsel %vm4462_vm8, %v4433_v1, %v7217_v8  ;;  %5736 = vmatmul.mubr.msk.bf16.gmra.mrb[12].mxu1 %vm496_vm0, %v4847_v35  ;;  %v7230_v18 = vpop.permute.xlu0 %7229  ;;  %v7222_v35 = vunpack.i.h.bf16 %v7220_v52 }
 0x3cf   : > { %v4502_v30 = vpack.c.bf16 %v4470_v17, %v4469_v15  ;;  %v7225_v20 = vpop.permute.xlu1 %7224  ;;  %5739 = vmatprep.mubr.msk.bf16.mxu1 %vm496_vm0, %v4848_v16  ;;  %v7232_v11 = vunpack.i.h.bf16 %v7230_v18  ;;  %v7231_v10 = vunpack.i.l.bf16 %v7230_v18 }
 0x3d0   : > { %v7227_v24 = vunpack.i.h.bf16 %v7225_v20  ;;  %v7226_v42 = vunpack.i.l.bf16 %v7225_v20  ;;  %v4218_v14 = vsel %vm1919_vm14, %v2874_v57, %v7222_v35 }
 0x3d1   : > { %5674 = vmatmul.mubr.msk.bf16.gmra.mrb[40].mxu0 %vm4560_vm9, %v4502_v30  ;;  %v4253_v19 = vsel %vm1993_vm1, %v4217_v53, %v7231_v10  ;;  %v4254_v41 = vsel %vm1993_vm1, %v4218_v14, %v7232_v11 }
 0x3d2   : > { %v7240_v12 = vpop.permute.xlu0 %7239  ;;  %v4251_v2 = vsel %vm1993_vm1, %v4215_v40, %v7226_v42  ;;  %v4252_v9 = vsel %vm1993_vm1, %v4216_v26, %v7227_v24 }
 0x3d3   : > { %v7235_v50 = vpop.permute.xlu1 %7234  ;;  %v7242_v54 = vunpack.i.h.bf16 %v7240_v12  ;;  %v7241_v13 = vunpack.i.l.bf16 %v7240_v12 }
 0x3d4   : > { %v7237_v49 = vunpack.i.h.bf16 %v7235_v50  ;;  %v7236_v36 = vunpack.i.l.bf16 %v7235_v50 }
 0x3d5   : > { %v4289_v59 = vsel %vm2067_vm3, %v4253_v19, %v7241_v13  ;;  %v4290_v6 = vsel %vm2067_vm3, %v4254_v41, %v7242_v54 }
 0x3d6   : > { %5740 = vmatmul.mubr.msk.bf16.gmra.mrb[16].mxu1 %vm496_vm0, %v4849_v34  ;;  %v9911_v56 = vpop.permute.xlu0 %7249  ;;  %v4287_v29 = vsel %vm2067_vm3, %v4251_v2, %v7236_v36  ;;  %v4288_v5 = vsel %vm2067_vm3, %v4252_v9, %v7237_v49  ;;  %vm5131_vm0 = vcmask 1045504  }
 0x3d7   : > { %v7245_v51 = vpop.permute.xlu1 %7244  ;;  %v7252_v0 = vunpack.i.h.bf16 %v9911_v56  ;;  %v7251_v37 = vunpack.i.l.bf16 %v9911_v56 }
 0x3d8   : > { %v7247_v7 = vunpack.i.h.bf16 %v7245_v51  ;;  %v7246_v44 = vunpack.i.l.bf16 %v7245_v51 }
 0x3d9   : > { %v4325_v51 = vsel %vm2141_vm5, %v4289_v59, %v7251_v37 }
 0x3da   : > { %v9913_v45 = vpop.permute.xlu0 %7259  ;;  %v4323_v16 = vsel %vm2141_vm5, %v4287_v29, %v7246_v44  ;;  %v4324_v21 = vsel %vm2141_vm5, %v4288_v5, %v7247_v7  ;;  %v2875_v5 = vld [vmem:[#allocation3 + $0x60] sm:$0xff] }
 0x3db   : > { %v7255_v4 = vpop.permute.xlu1 %7254  ;;  %v7262_v32 = vunpack.i.h.bf16 %v9913_v45  ;;  %v7261_v8 = vunpack.i.l.bf16 %v9913_v45  ;;  %v4326_v45 = vsel %vm2141_vm5, %v4290_v6, %v7252_v0 }
 0x3dc   : > { %v7257_v3 = vunpack.i.h.bf16 %v7255_v4  ;;  %v7256_v38 = vunpack.i.l.bf16 %v7255_v4 }
 0x3dd   : > { %v4362_v60 = vsel %vm4351_vm4, %v4325_v51, %v7261_v8  ;;  %v4363_v39 = vsel %vm4351_vm4, %v4326_v45, %v7262_v32 }
 0x3de   : > { %v9917_v58 = vpop.permute.xlu0 %7269  ;;  %v4360_v46 = vsel %vm4351_vm4, %v4323_v16, %v7256_v38  ;;  %v4361_v1 = vsel %vm4351_vm4, %v4324_v21, %v7257_v3  ;;  %v2877_v3 = vld [vmem:[#allocation3 + $0x70] sm:$0xff]  ;;  %v2878_v38 = vld [vmem:[#allocation3 + $0x78] sm:$0xff] }
 0x3df   : > { %v7265_v61 = vpop.permute.xlu1 %7264  ;;  %v7272_v15 = vunpack.i.h.bf16 %v9917_v58  ;;  %v7271_v17 = vunpack.i.l.bf16 %v9917_v58 }
 0x3e0   : > { %v7267_v48 = vunpack.i.h.bf16 %v7265_v61  ;;  %v7266_v52 = vunpack.i.l.bf16 %v7265_v61 }
 0x3e1   : > { %v4399_v24 = vsel %vm4388_vm6, %v4362_v60, %v7271_v17  ;;  %v4400_v42 = vsel %vm4388_vm6, %v4363_v39, %v7272_v15 }
 0x3e2   : > { %v7280_v63 = vpop.permute.xlu0 %7279  ;;  %v4397_v30 = vsel %vm4388_vm6, %v4360_v46, %v7266_v52  ;;  %v4398_v20 = vsel %vm4388_vm6, %v4361_v1, %v7267_v48  ;;  %v2876_v48 = vld [vmem:[#allocation3 + $0x68] sm:$0xff] }
 0x3e3   : > { %v7275_v47 = vpop.permute.xlu1 %7274  ;;  %v7282_v12 = vunpack.i.h.bf16 %v7280_v63  ;;  %v7281_v34 = vunpack.i.l.bf16 %v7280_v63 }
 0x3e4   : > { %v7277_v33 = vunpack.i.h.bf16 %v7275_v47  ;;  %v7276_v43 = vunpack.i.l.bf16 %v7275_v47 }
 0x3e5   : > { %v4436_v57 = vsel %vm4425_vm7, %v4399_v24, %v7281_v34  ;;  %v4437_v54 = vsel %vm4425_vm7, %v4400_v42, %v7282_v12 }
 0x3e6   : > { %v9937_v23 = vpop.permute.xlu0 %7289  ;;  %v4434_v50 = vsel %vm4425_vm7, %v4397_v30, %v7276_v43  ;;  %v4435_v56 = vsel %vm4425_vm7, %v4398_v20, %v7277_v33 }
 0x3e7   : > { %v7285_v18 = vpop.permute.xlu1 %7284  ;;  %v7292_v41 = vunpack.i.h.bf16 %v9937_v23  ;;  %v7291_v2 = vunpack.i.l.bf16 %v9937_v23 }
 0x3e8   : > { %v7287_v62 = vunpack.i.h.bf16 %v7285_v18  ;;  %v7286_v25 = vunpack.i.l.bf16 %v7285_v18 }
 0x3e9   : > { %v4220_v43 = vsel %vm1919_vm14, %v2876_v48, %v7292_v41  ;;  %v4219_v16 = vsel %vm1919_vm14, %v2875_v5, %v7291_v2 }
 0x3ea   : > { %v4471_v4 = vsel %vm4462_vm8, %v4434_v50, %v7286_v25  ;;  %v4472_v35 = vsel %vm4462_vm8, %v4435_v56, %v7287_v62  ;;  %v7300_v22 = vpop.permute.xlu0 %7299 }
 0x3eb   : > { %v4503_v11 = vpack.c.bf16 %v4472_v35, %v4471_v4  ;;  %v7295_v10 = vpop.permute.xlu1 %7294  ;;  %v7302_v40 = vunpack.i.h.bf16 %v7300_v22  ;;  %v7301_v19 = vunpack.i.l.bf16 %v7300_v22 }
 0x3ec   : > { %v7297_v58 = vunpack.i.h.bf16 %v7295_v10  ;;  %v7296_v28 = vunpack.i.l.bf16 %v7295_v10 }
 0x3ed   : > { %5677 = vmatprep.mubr.msk.bf16.mxu0 %vm4560_vm9, %v4503_v11  ;;  %v4222_v52 = vsel %vm1919_vm14, %v2878_v38, %v7302_v40  ;;  %v4221_v0 = vsel %vm1919_vm14, %v2877_v3, %v7301_v19 }
 0x3ee   : > { %v4473_v13 = vsel %vm4462_vm8, %v4436_v57, %v7296_v28  ;;  %v4474_v61 = vsel %vm4462_vm8, %v4437_v54, %v7297_v58  ;;  %v7310_v27 = vpop.permute.xlu0 %7309 }
 0x3ef   : > { %v4504_v55 = vpack.c.bf16 %v4474_v61, %v4473_v13  ;;  %v7305_v14 = vpop.permute.xlu1 %7304  ;;  %v7312_v9 = vunpack.i.h.bf16 %v7310_v27  ;;  %v7311_v7 = vunpack.i.l.bf16 %v7310_v27 }
 0x3f0   : > { %v7307_v63 = vunpack.i.h.bf16 %v7305_v14  ;;  %v7306_v59 = vunpack.i.l.bf16 %v7305_v14 }
 0x3f1   : > { %5678 = vmatmul.mubr.msk.bf16.gmra.mrb[44].mxu0 %vm4560_vm9, %v4504_v55  ;;  %v4257_v21 = vsel %vm1993_vm1, %v4221_v0, %v7311_v7  ;;  %v4258_v32 = vsel %vm1993_vm1, %v4222_v52, %v7312_v9 }
 0x3f2   : > { %v7320_v53 = vpop.permute.xlu0 %7319  ;;  %v4255_v23 = vsel %vm1993_vm1, %v4219_v16, %v7306_v59  ;;  %v4256_v46 = vsel %vm1993_vm1, %v4220_v43, %v7307_v63 }
 0x3f3   : > { %v7315_v49 = vpop.permute.xlu1 %7314  ;;  %v7322_v47 = vunpack.i.h.bf16 %v7320_v53  ;;  %v7321_v29 = vunpack.i.l.bf16 %v7320_v53 }
 0x3f4   : > { %v7317_v37 = vunpack.i.h.bf16 %v7315_v49  ;;  %v7316_v33 = vunpack.i.l.bf16 %v7315_v49 }
 0x3f5   : > { %v4293_v18 = vsel %vm2067_vm3, %v4257_v21, %v7321_v29  ;;  %v4294_v30 = vsel %vm2067_vm3, %v4258_v32, %v7322_v47 }
 0x3f6   : > { %v7330_v36 = vpop.permute.xlu0 %7329  ;;  %v4291_v25 = vsel %vm2067_vm3, %v4255_v23, %v7316_v33  ;;  %v4292_v12 = vsel %vm2067_vm3, %v4256_v46, %v7317_v37 }
 0x3f7   : > { %v7325_v26 = vpop.permute.xlu1 %7324  ;;  %v7332_v1 = vunpack.i.h.bf16 %v7330_v36  ;;  %v7331_v15 = vunpack.i.l.bf16 %v7330_v36 }
 0x3f8   : > { %v7327_v20 = vunpack.i.h.bf16 %v7325_v26  ;;  %v7326_v62 = vunpack.i.l.bf16 %v7325_v26 }
 0x3f9   : > { %v4329_v22 = vsel %vm2141_vm5, %v4293_v18, %v7331_v15  ;;  %v4330_v60 = vsel %vm2141_vm5, %v4294_v30, %v7332_v1  ;;  %v10018_v15 = vld [vmem:[%s10270_s4] ss:$0 sm:$0xff] }
 0x3fa   : > { %v7340_v44 = vpop.permute.xlu0 %7339  ;;  %v4327_v24 = vsel %vm2141_vm5, %v4291_v25, %v7326_v62  ;;  %v4328_v42 = vsel %vm2141_vm5, %v4292_v12, %v7327_v20  ;;  %v10027_v20 = vld [vmem:[%s10272_s6] ss:$0 sm:$0xff] }
 0x3fb   : > { %v7335_v6 = vpop.permute.xlu1 %7334  ;;  %v7342_v34 = vunpack.i.h.bf16 %v7340_v44  ;;  %v7341_v50 = vunpack.i.l.bf16 %v7340_v44 }
 0x3fc   : > { %v7337_v56 = vunpack.i.h.bf16 %v7335_v6  ;;  %v7336_v51 = vunpack.i.l.bf16 %v7335_v6 }
 0x3fd   : > { %v4366_v57 = vsel %vm4351_vm4, %v4329_v22, %v7341_v50  ;;  %v4367_v54 = vsel %vm4351_vm4, %v4330_v60, %v7342_v34 }
 0x3fe   : > { %v7350_v8 = vpop.permute.xlu0 %7349  ;;  %v4364_v27 = vsel %vm4351_vm4, %v4327_v24, %v7336_v51  ;;  %v4365_v55 = vsel %vm4351_vm4, %v4328_v42, %v7337_v56 }
 0x3ff   : > { %v7345_v17 = vpop.permute.xlu1 %7344  ;;  %v7352_v45 = vunpack.i.h.bf16 %v7350_v8  ;;  %v7351_v4 = vunpack.i.l.bf16 %v7350_v8 }
 0x400   : > { %v7347_v39 = vunpack.i.h.bf16 %v7345_v17  ;;  %v7346_v11 = vunpack.i.l.bf16 %v7345_v17 }
 0x401   : > { %v4403_v14 = vsel %vm4388_vm6, %v4366_v57, %v7351_v4  ;;  %v4404_v53 = vsel %vm4388_vm6, %v4367_v54, %v7352_v45  ;;  %v10036_v4 = vadd.f32 %v10027_v20, %v10018_v15 }
 0x402   : > { %v7360_v35 = vpop.permute.xlu0 %7359  ;;  %v4401_v36 = vsel %vm4388_vm6, %v4364_v27, %v7346_v11  ;;  %v4402_v26 = vsel %vm4388_vm6, %v4365_v55, %v7347_v39 }
 0x403   : > { %v7355_v10 = vpop.permute.xlu1 %7354  ;;  %v7362_v58 = vunpack.i.h.bf16 %v7360_v35  ;;  %v7361_v28 = vunpack.i.l.bf16 %v7360_v35 }
 0x404   : > { %v7357_v13 = vunpack.i.h.bf16 %v7355_v10  ;;  %v7356_v61 = vunpack.i.l.bf16 %v7355_v10 }
 0x405   : > { %v4440_v2 = vsel %vm4425_vm7, %v4403_v14, %v7361_v28  ;;  %v4441_v9 = vsel %vm4425_vm7, %v4404_v53, %v7362_v58 }
 0x406   : > { %v7370_v49 = vpop.permute.xlu0 %7369  ;;  %v4438_v63 = vsel %vm4425_vm7, %v4401_v36, %v7356_v61  ;;  %v4439_v59 = vsel %vm4425_vm7, %v4402_v26, %v7357_v13 }
 0x407   : > { %v7372_v40 = vunpack.i.h.bf16 %v7370_v49  ;;  %v7371_v19 = vunpack.i.l.bf16 %v7370_v49  ;;  %v7365_v41 = vpop.permute.xlu1 %7364 }
 0x408   : > { %v7367_v7 = vunpack.i.h.bf16 %v7365_v41  ;;  %v7366_v44 = vunpack.i.l.bf16 %v7365_v41 }
 0x409   : > { %v4477_v6 = vsel %vm4462_vm8, %v4440_v2, %v7371_v19  ;;  %v4478_v3 = vsel %vm4462_vm8, %v4441_v9, %v7372_v40 }
 0x40a   : > { %v4475_v38 = vsel %vm4462_vm8, %v4438_v63, %v7366_v44  ;;  %v4476_v47 = vsel %vm4462_vm8, %v4439_v59, %v7367_v7  ;;  %v4506_v5 = vpack.c.bf16 %v4478_v3, %v4477_v6 }
 0x40b   : > { %v4505_v29 = vpack.c.bf16 %v4476_v47, %v4475_v38 }
 0x40d   : > { %5681 = vmatprep.mubr.msk.bf16.mxu0 %vm4560_vm9, %v4505_v29 }
 0x40e   : > { %5682 = vmatmul.mubr.msk.bf16.gmra.mrb[48].mxu0 %vm4560_vm9, %v4506_v5 }
 0x40f   : > { %5747 = vmatprep.mubr.msk.f32.mxu0 %vm7496_vm11, %v7490_v31 }
 0x469   : > { %v5709_v48 = vpop.f32.mrb[20].mxu1 }
 0x46a   : > { %v4949_v52 = vpop.f32.mrb[21].mxu1 }
 0x46b   : > { %v5710_v0 = vpop.f32.mrb[22].mxu1 }
 0x46c   : > { %v4952_v37 = vpop.f32.mrb[23].mxu1 }
 0x471   : > { %v9997_v33 = vpop.f32.mrb[24].mxu1 }
 0x472   : > { %v9999_v43 = vpop.f32.mrb[25].mxu1 }
 0x473   : > { %v10001_v16 = vpop.f32.mrb[26].mxu1 }
 0x474   : > { %v10003_v21 = vpop.f32.mrb[27].mxu1 }
 0x479   : > { %v10005_v32 = vpop.f32.mrb[28].mxu1 }
 0x47a   : > { %v10007_v8 = vpop.f32.mrb[29].mxu1 }
 0x47b   : > { %v10009_v23 = vpop.f32.mrb[30].mxu1 }
 0x47c   : > { %v10011_v46 = vpop.f32.mrb[31].mxu1 }
 0x481   : > { %v10013_v1 = vpop.f32.mrb[32].mxu1 }
 0x482   : > { %v10020_v17 = vpop.f32.mrb[33].mxu1 }
 0x483   : > { %v10022_v18 = vpop.f32.mrb[34].mxu1 }
 0x484   : > { %v5671_v30 = vpop.f32.mrb[36].mxu0  ;;  %v10029_v62 = vpop.f32.mrb[35].mxu1 }
 0x485   : > { %v4662_v25 = vadd.f32 %v5671_v30, %v10018_v15  ;;  %v4653_v12 = vpop.f32.mrb[37].mxu0 }
 0x486   : > { %v4654_v34 = vadd.f32 %v10018_v15, %v4653_v12  ;;  %v5672_v50 = vpop.f32.mrb[38].mxu0 }
 0x487   : > { %v5764_v56 = vadd.f32 %v5709_v48, %v4662_v25  ;;  %v4665_v51 = vadd.f32 %v5672_v50, %v10018_v15  ;;  %v4656_v45 = vpop.f32.mrb[39].mxu0 }
 0x488   : > { %v5767_v35 = vadd.f32 %v4949_v52, %v4654_v34  ;;  %v4657_v22 = vadd.f32 %v10018_v15, %v4656_v45 }
 0x489   : > { %v5765_v60 = vadd.f32 %v5764_v56, %v10027_v20  ;;  %v5770_v39 = vadd.f32 %v10027_v20, %v4665_v51  ;;  %v5725_v11 = vpop.f32.mrb[0].mxu1 }
 0x48a   : > { %v5773_v10 = vadd.f32 %v10027_v20, %v4657_v22  ;;  %v5013_v24 = vpop.f32.mrb[1].mxu1  ;;  %v5768_v55 = vadd.f32 %v5767_v35, %v10027_v20  ;;  %v5812_v3 = vadd.f32 %v10036_v4, %v5725_v11 }
 0x48b   : > { %v10042_v42 = vadd.f32 %v5770_v39, %v5710_v0  ;;  %v10045_v58 = vadd.f32 %v10036_v4, %v5013_v24  ;;  %v5726_v28 = vpop.f32.mrb[2].mxu1  ;;  %v5132_v13 = vrot.slane %v5765_v60, 2 }
 0x48c   : > { %v10047_v57 = vadd.f32 %v5773_v10, %v4952_v37  ;;  %v5016_v54 = vpop.f32.mrb[3].mxu1  ;;  %v5816_v38 = vadd.f32 %v10036_v4, %v5726_v28 }
 0x48d   : > { %v5133_v61 = vrot.slane %v10042_v42, 2  ;;  %v10051_v27 = vadd.f32 %v10036_v4, %v5016_v54  ;;  %v5171_v53 = vrot.slane %v10045_v58, 2 }
 0x48f   : > { %v5134_v14 = vsel %vm5131_vm0, %v5132_v13, %v5133_v61  ;;  %v5173_v49 = vrot.slane %v10051_v27, 2 }
 0x490   : > { %v10059_v36 = vadd.f32 %v5768_v55, %v5134_v14 }
 0x491   : > { %v10066_v26 = vsel %vm5131_vm0, %v5171_v53, %v5173_v49  ;;  %v5729_v40 = vpop.f32.mrb[4].mxu1 }
 0x492   : > { %v5029_v19 = vpop.f32.mrb[5].mxu1  ;;  %v5820_v41 = vadd.f32 %v10036_v4, %v5729_v40 }
 0x493   : > { %v5822_v2 = vadd.f32 %v10036_v4, %v5029_v19  ;;  %v5730_v9 = vpop.f32.mrb[6].mxu1 }
 0x494   : > { %v5032_v7 = vpop.f32.mrb[7].mxu1  ;;  %v5187_v63 = vrot.slane %v5820_v41, 2  ;;  %v5824_v22 = vadd.f32 %v10036_v4, %v5730_v9 }
 0x495   : > { %v5826_v44 = vadd.f32 %v10036_v4, %v5032_v7  ;;  %v5184_v59 = vrot.slane %v5822_v2, 2 }
 0x497   : > { %v5185_v6 = vrot.slane %v5826_v44, 2 }
 0x499   : > { %v5186_v47 = vsel %vm5131_vm0, %v5184_v59, %v5185_v6  ;;  %v5188_v29 = vsel %vm5131_vm0, %v5185_v6, %v5187_v63  ;;  %v5733_v5 = vpop.f32.mrb[8].mxu1 }
 0x49a   : > { %v10075_v48 = vadd.f32 %v5812_v3, %v5186_v47  ;;  %v10077_v52 = vadd.f32 %v5816_v38, %v5188_v29  ;;  %v5828_v0 = vadd.f32 %v10036_v4, %v5733_v5  ;;  %v5045_v37 = vpop.f32.mrb[9].mxu1 }
 0x49b   : > { %v5830_v30 = vadd.f32 %v10036_v4, %v5045_v37  ;;  %v5734_v25 = vpop.f32.mrb[10].mxu1 }
 0x49c   : > { %v5199_v12 = vrot.slane %v5828_v0, 2  ;;  %v5048_v34 = vpop.f32.mrb[11].mxu1  ;;  %v7388_v50 = vpack.i.bf16 %v10077_v52, %v10075_v48 }
 0x49d   : > { %v5834_v56 = vadd.f32 %v10036_v4, %v5048_v34  ;;  %v5196_v45 = vrot.slane %v5830_v30, 2  ;;  %v5832_v34 = vadd.f32 %v10036_v4, %v5734_v25 }
 0x49e   : > { %v5206_v51 = vadd.f32 %v5830_v30, %v5199_v12 }
 0x49f   : > { %v5197_v35 = vrot.slane %v5834_v56, 2 }
 0x4a0   : > { %v5283_v55 = vrot.slane %v5206_v51, 4 }
 0x4a1   : > { %v5198_v60 = vsel %vm5131_vm0, %v5196_v45, %v5197_v35  ;;  %v5200_v39 = vsel %vm5131_vm0, %v5197_v35, %v5199_v12  ;;  %v5737_v11 = vpop.f32.mrb[12].mxu1 }
 0x4a2   : > { %v5204_v10 = vadd.f32 %v5820_v41, %v5198_v60  ;;  %v5205_v24 = vadd.f32 %v5824_v22, %v5200_v39  ;;  %v5836_v28 = vadd.f32 %v10036_v4, %v5737_v11  ;;  %v5061_v54 = vpop.f32.mrb[13].mxu1 }
 0x4a3   : > { %v5738_v13 = vpop.f32.mrb[14].mxu1  ;;  %v5838_v9 = vadd.f32 %v10036_v4, %v5061_v54 }
 0x4a4   : > { %v5280_v14 = vrot.slane %v5204_v10, 4  ;;  %v5281_v40 = vrot.slane %v5205_v24, 4  ;;  %v5840_v19 = vadd.f32 %v10036_v4, %v5738_v13  ;;  %v5675_v2 = vpop.f32.mrb[40].mxu0  ;;  %v5064_v7 = vpop.f32.mrb[15].mxu1  ;;  %v5211_v44 = vrot.slane %v5836_v28, 2 }
 0x4a5   : > { %v4678_v63 = vadd.f32 %v5675_v2, %v10018_v15  ;;  %v5842_v59 = vadd.f32 %v10036_v4, %v5064_v7  ;;  %v4669_v41 = vpop.f32.mrb[41].mxu0 }
 0x4a6   : > { %v5213_v6 = vrot.slane %v5840_v19, 2  ;;  %v4670_v3 = vadd.f32 %v10018_v15, %v4669_v41  ;;  %v5676_v38 = vpop.f32.mrb[42].mxu0  ;;  %v10094_v47 = vsel %vm4615_vm2, %v5280_v14, %v5281_v40  ;;  %v10097_v29 = vsel %vm4615_vm2, %v5281_v40, %v5283_v55 }
 0x4a7   : > { %v5776_v5 = vadd.f32 %v10027_v20, %v4678_v63  ;;  %v5210_v0 = vrot.slane %v5842_v59, 2  ;;  %v4681_v37 = vadd.f32 %v5676_v38, %v10018_v15  ;;  %v4672_v30 = vpop.f32.mrb[43].mxu0  ;;  %v7393_v12 = vpack.i.bf16 %v10097_v29, %v10094_v47 }
 0x4a8   : > { %v5214_v56 = vsel %vm5131_vm0, %v5211_v44, %v5213_v6  ;;  %v5779_v51 = vadd.f32 %v10027_v20, %v4670_v3  ;;  %v4673_v45 = vadd.f32 %v10018_v15, %v4672_v30 }
 0x4a9   : > { %v10107_v35 = vadd.f32 %v5838_v9, %v5214_v56  ;;  %v5777_v22 = vadd.f32 %v5776_v5, %v9997_v33  ;;  %v5212_v60 = vsel %vm5131_vm0, %v5210_v0, %v5211_v44  ;;  %v5782_v39 = vadd.f32 %v10027_v20, %v4681_v37  ;;  %v5741_v11 = vpop.f32.mrb[16].mxu1 }
 0x4aa   : > { %v10112_v10 = vadd.f32 %v5832_v34, %v5212_v60  ;;  %v5780_v24 = vadd.f32 %v5779_v51, %v9999_v43  ;;  %v5785_v25 = vadd.f32 %v10027_v20, %v4673_v45  ;;  %v5844_v28 = vadd.f32 %v10036_v4, %v5741_v11  ;;  %v5077_v54 = vpop.f32.mrb[17].mxu1 }
 0x4ab   : > { %v5783_v13 = vadd.f32 %v5782_v39, %v10001_v16  ;;  %v5742_v55 = vpop.f32.mrb[18].mxu1  ;;  %v5144_v7 = vrot.slane %v5777_v22, 2 }
 0x4ac   : > { %v5135_v14 = vrot.slane %v5780_v24, 2  ;;  %v5786_v33 = vadd.f32 %v5785_v25, %v10003_v21  ;;  %v5848_v40 = vadd.f32 %v10036_v4, %v5742_v55  ;;  %v5080_v2 = vpop.f32.mrb[19].mxu1  ;;  %v7398_v43 = vpack.i.bf16 %v10107_v35, %v10112_v10 }
 0x4ad   : > { %v5145_v44 = vrot.slane %v5783_v13, 2  ;;  %v5850_v9 = vadd.f32 %v10036_v4, %v5080_v2  ;;  %v5223_v59 = vrot.slane %v5844_v28, 2  ;;  %v5846_v21 = vadd.f32 %v10036_v4, %v5077_v54 }
 0x4ae   : > { %v5136_v63 = vsel %vm5131_vm0, %v5133_v61, %v5135_v14  ;;  %v5225_v16 = vrot.slane %v5848_v40, 2 }
 0x4af   : > { %v5146_v41 = vsel %vm5131_vm0, %v5144_v7, %v5145_v44  ;;  %v5222_v6 = vrot.slane %v5850_v9, 2  ;;  %v10129_v3 = vadd.f32 %v10047_v57, %v5136_v63 }
 0x4b0   : > { %v5152_v38 = vadd.f32 %v5780_v24, %v5146_v41  ;;  %v5226_v5 = vsel %vm5131_vm0, %v5223_v59, %v5225_v16  ;;  %v5232_v0 = vadd.f32 %v5850_v9, %v5225_v16 }
 0x4b1   : > { %v5231_v37 = vadd.f32 %v5846_v21, %v5226_v5  ;;  %v5224_v30 = vsel %vm5131_vm0, %v5222_v6, %v5223_v59 }
 0x4b2   : > { %v5230_v42 = vadd.f32 %v5840_v19, %v5224_v30  ;;  %v5305_v34 = vrot.slane %v5232_v0, 4  ;;  %v5236_v6 = vrot.slane %v5152_v38, 4 }
 0x4b3   : > { %v5303_v61 = vrot.slane %v5231_v37, 4 }
 0x4b4   : > { %v5302_v56 = vrot.slane %v5230_v42, 4 }
 0x4b5   : > { %v10134_v51 = vsel %vm4615_vm2, %v5303_v61, %v5305_v34 }
 0x4b6   : > { %v10137_v4 = vsel %vm4615_vm2, %v5302_v56, %v5303_v61 }
 0x4b7   : > { %v7403_v57 = vpack.i.bf16 %v10134_v51, %v10137_v4 }
 0x4c4   : > { %v5679_v45 = vpop.f32.mrb[44].mxu0 }
 0x4c5   : > { %v4694_v60 = vadd.f32 %v5679_v45, %v10018_v15  ;;  %v4685_v39 = vpop.f32.mrb[45].mxu0 }
 0x4c6   : > { %v4686_v11 = vadd.f32 %v10018_v15, %v4685_v39  ;;  %v5680_v24 = vpop.f32.mrb[46].mxu0 }
 0x4c7   : > { %v5788_v19 = vadd.f32 %v10027_v20, %v4694_v60  ;;  %v4697_v25 = vadd.f32 %v5680_v24, %v10018_v15  ;;  %v4688_v28 = vpop.f32.mrb[47].mxu0 }
 0x4c8   : > { %v5791_v54 = vadd.f32 %v10027_v20, %v4686_v11  ;;  %v4689_v13 = vadd.f32 %v10018_v15, %v4688_v28 }
 0x4c9   : > { %v5789_v55 = vadd.f32 %v5788_v19, %v10005_v32  ;;  %v5794_v14 = vadd.f32 %v10027_v20, %v4697_v25 }
 0x4ca   : > { %v5792_v40 = vadd.f32 %v5791_v54, %v10007_v8  ;;  %v5797_v2 = vadd.f32 %v10027_v20, %v4689_v13 }
 0x4cb   : > { %v5795_v7 = vadd.f32 %v5794_v14, %v10009_v23 }
 0x4cc   : > { %v5147_v9 = vrot.slane %v5792_v40, 2  ;;  %v5798_v63 = vadd.f32 %v5797_v2, %v10011_v46 }
 0x4cd   : > { %v5158_v24 = vrot.slane %v5795_v7, 2 }
 0x4ce   : > { %v5148_v59 = vsel %vm5131_vm0, %v5145_v44, %v5147_v9  ;;  %v5154_v16 = vadd.f32 %v5777_v22, %v5147_v9  ;;  %v7495_v9 = vmov 0.0|0.0  }
 0x4cf   : > { %v5153_v41 = vadd.f32 %v5786_v33, %v5148_v59  ;;  %5750 = vmatprep.subr.bf16.mxu0 %v7495_v9 }
 0x4d0   : > { %v5239_v21 = vrot.slane %v5154_v16, 4 }
 0x4d1   : > { %v5237_v5 = vrot.slane %v5153_v41, 4 }
 0x4d3   : > { %v5238_v32 = vsel %vm4615_vm2, %v5236_v6, %v5237_v5  ;;  %v5240_v0 = vsel %vm4615_vm2, %v5237_v5, %v5239_v21 }
 0x4d4   : > { %v7373_v37 = vpack.i.bf16 %v5240_v0, %v5238_v32 }
 0x4d6   : > { %7374 = vrot.lane.b32.xlu1 %v7373_v37, %s7482_s27 }
 0x4e1   : > { %v5683_v8 = vpop.f32.mrb[48].mxu0 }
 0x4e2   : > { %v4710_v23 = vadd.f32 %v5683_v8, %v10018_v15  ;;  %v4701_v30 = vpop.f32.mrb[49].mxu0 }
 0x4e3   : > { %v4702_v46 = vadd.f32 %v10018_v15, %v4701_v30  ;;  %v5684_v42 = vpop.f32.mrb[50].mxu0 }
 0x4e4   : > { %v5800_v22 = vadd.f32 %v10027_v20, %v4710_v23  ;;  %v4713_v33 = vadd.f32 %v5684_v42, %v10018_v15  ;;  %v4704_v44 = vpop.f32.mrb[51].mxu0 }
 0x4e5   : > { %v5803_v38 = vadd.f32 %v10027_v20, %v4702_v46  ;;  %v4705_v34 = vadd.f32 %v10018_v15, %v4704_v44 }
 0x4e6   : > { %v5801_v61 = vadd.f32 %v5800_v22, %v10013_v1  ;;  %v5806_v56 = vadd.f32 %v10027_v20, %v4713_v33 }
 0x4e7   : > { %v5804_v45 = vadd.f32 %v5803_v38, %v10020_v17  ;;  %v5809_v60 = vadd.f32 %v10027_v20, %v4705_v34  ;;  %v5327_v38 = vld [vmem:[%s10274_s8] sm:$0xff] }
 0x4e8   : > { %v5179_v39 = vadd.f32 %v5801_v61, %v10066_v26  ;;  %v5807_v11 = vadd.f32 %v5806_v56, %v10022_v18 }
 0x4e9   : > { %v5159_v19 = vrot.slane %v5804_v45, 2  ;;  %v5810_v25 = vadd.f32 %v5809_v60, %v10029_v62 }
 0x4ea   : > { %v5170_v28 = vrot.slane %v5807_v11, 2  ;;  %v5180_v15 = vadd.f32 %v5807_v11, %v5173_v49  ;;  %v5259_v13 = vrot.slane %v5179_v39, 4 }
 0x4eb   : > { %v5160_v1 = vsel %vm5131_vm0, %v5158_v24, %v5159_v19  ;;  %v5161_v54 = vrot.slane %v5810_v25, 2 }
 0x4ec   : > { %v5261_v14 = vrot.slane %v5180_v15, 4  ;;  %v5172_v17 = vsel %vm5131_vm0, %v5170_v28, %v5171_v53  ;;  %v5165_v20 = vadd.f32 %v5798_v63, %v5160_v1 }
 0x4ed   : > { %v5178_v26 = vadd.f32 %v5810_v25, %v5172_v17  ;;  %v5162_v18 = vsel %vm5131_vm0, %v5159_v19, %v5161_v54 }
 0x4ee   : > { %v5166_v40 = vadd.f32 %v5789_v55, %v5162_v18  ;;  %v5262_v62 = vsel %vm4615_vm2, %v5259_v13, %v5261_v14 }
 0x4ef   : > { %v5258_v2 = vrot.slane %v5178_v26, 4 }
 0x4f0   : > { %v7378_v7 = vpack.i.bf16 %v5166_v40, %v5165_v20 }
 0x4f1   : > { %v5260_v27 = vsel %vm4615_vm2, %v5258_v2, %v5259_v13 }
 0x4f2   : > { %7379 = vrot.lane.b32.xlu0 %v7378_v7, %s7484_s29  ;;  %v7383_v49 = vpack.i.bf16 %v5262_v62, %v5260_v27 }
 0x4f4   : > { %7384 = vrot.lane.b32.xlu1 %v7383_v49, %s7486_s23  ;;  %s323_s23 = sand.u32 1, %s7471_s10  }
 0x4f5   : > { %s5403_s14 = scalar_lea.sflag [#allocation5], %s323_s23 }
 0x4f6   : > { %7389 = vrot.lane.b32.xlu0 %v7388_v50, %s7488_s16  ;;  %s5479_s16 = sshll.u32 %s323_s23, 3 }
 0x4f8   : > { %7394 = vrot.lane.b32.xlu1 %v7393_v12, %s7491_s24  ;;  %s5548_s24 = sshll.u32 %s7569_s13, 7  ;;  %s7497_s13 = smov [#allocation4]  }
 0x4f9   : > { %s10223_s17 = scalar_lea.hbm %s10275_s9, %s5548_s24  ;;  %s7421_s27 = sshll.u32 %s7497_s13, 4  ;;  %s7422_s27 = int_to_ptr.vmem [resolvable:$false] %s7421_s27 }
 0x4fa   : > { %7399 = vrot.lane.b32.xlu0 %v7398_v43, %s7492_s26  ;;  %s325_s26 = scalar_lea.vmem [#allocation4], %s5479_s16  ;;  %s7423_s29 = scalar_lea.vmem %s7422_s27, 256 }
 0x4fc   : > { %7404 = vrot.lane.b32.xlu1 %v7403_v57, %s7493_s22  ;;  %s5416_s22 = sshll.u32 %s325_s26, 4  ;;  %s10225_s22 = int_to_ptr.vmem [resolvable:$true] %s5416_s22 }
 0x4fd   : > { %s7417_s21 = scalar_lea.vmem %s10225_s22, 128  ;;  %p7424_p0 = scmp.lt.s32.totalorder %s10225_s22, %s7422_s27 }
 0x4fe   : > { %p7418_p11 = scmp.ne.s32.totalorder %s10225_s22, %s7417_s21  ;;  %p7425_p1 = scmp.lt.s32.totalorder %s7423_s29, %s7417_s21 }
 0x500   : > { %p7419_p12 = pnand %p7418_p11, %p7586_p5  ;;  %p7426_p2 = por %p7425_p1, %p7424_p0 }
 0x502   : > { %p7420_p13 = pneg %p7419_p12 }
 0x504   : > { %p7427_p3 = pnand %p7426_p2, %p7420_p13 }
 0x548   : > { %v7375_v31 = vpop.permute.xlu1 %7374 }
 0x549   : > { %v7377_v58 = vunpack.i.h.bf16 %v7375_v31  ;;  %v7376_v53 = vunpack.i.l.bf16 %v7375_v31 }
 0x54b   : > { %v5313_v47 = vsel %vm1919_vm14, %v10059_v36, %v7376_v53  ;;  %v5314_v29 = vsel %vm1919_vm14, %v10129_v3, %v7377_v58 }
 0x564   : > { %v7380_v48 = vpop.permute.xlu0 %7379 }
 0x565   : > { %v7382_v52 = vunpack.i.h.bf16 %v7380_v48  ;;  %v7381_v50 = vunpack.i.l.bf16 %v7380_v48 }
 0x566   : > { %v7385_v12 = vpop.permute.xlu1 %7384 }
 0x567   : > { %v5315_v35 = vsel %vm1993_vm1, %v5313_v47, %v7381_v50  ;;  %v5316_v10 = vsel %vm1993_vm1, %v5314_v29, %v7382_v52  ;;  %v7387_v43 = vunpack.i.h.bf16 %v7385_v12  ;;  %v7386_v51 = vunpack.i.l.bf16 %v7385_v12 }
 0x568   : > { %v7390_v4 = vpop.permute.xlu0 %7389 }
 0x569   : > { %v5317_v57 = vsel %vm2067_vm3, %v5315_v35, %v7386_v51  ;;  %v5318_v55 = vsel %vm2067_vm3, %v5316_v10, %v7387_v43  ;;  %v7392_v63 = vunpack.i.h.bf16 %v7390_v4  ;;  %v7391_v59 = vunpack.i.l.bf16 %v7390_v4 }
 0x56a   : > { %v7395_v16 = vpop.permute.xlu1 %7394 }
 0x56b   : > { %v5319_v36 = vsel %vm2141_vm5, %v5317_v57, %v7391_v59  ;;  %v5320_v41 = vsel %vm2141_vm5, %v5318_v55, %v7392_v63  ;;  %v7397_v3 = vunpack.i.h.bf16 %v7395_v16  ;;  %v7396_v21 = vunpack.i.l.bf16 %v7395_v16 }
 0x56c   : > { %v7400_v6 = vpop.permute.xlu0 %7399 }
 0x56d   : > { %v5321_v5 = vsel %vm4351_vm4, %v5319_v36, %v7396_v21  ;;  %v5322_v32 = vsel %vm4351_vm4, %v5320_v41, %v7397_v3  ;;  %v7402_v0 = vunpack.i.h.bf16 %v7400_v6  ;;  %v7401_v37 = vunpack.i.l.bf16 %v7400_v6 }
 0x56e   : > { %v7405_v8 = vpop.permute.xlu1 %7404 }
 0x56f   : > { %v5323_v23 = vsel %vm4388_vm6, %v5321_v5, %v7401_v37  ;;  %v5324_v30 = vsel %vm4388_vm6, %v5322_v32, %v7402_v0  ;;  %v7407_v46 = vunpack.i.h.bf16 %v7405_v8  ;;  %v7406_v42 = vunpack.i.l.bf16 %v7405_v8 }
 0x571   : > { %v5325_v22 = vsel %vm4425_vm7, %v5323_v23, %v7406_v42  ;;  %v5326_v33 = vsel %vm4425_vm7, %v5324_v30, %v7407_v46 }
 0x572   : > { %v5751_v44 = vpack.c.bf16 %v5326_v33, %v5325_v22 }
 0x574   : > { %5752 = vmatpush3.bf16.msra.mxu0 %v5751_v44 }
 0x577   : > { %5748 = vmatmul.mubr.msk.f32.vlgmr.msra.gmra.mrb[52].mxu0 %vm1993_vm1, %v5327_v38 }
 0x64a   : > { %v5397_v34 = vpop.f32.mrb[52].mxu0 }
 0x64b   : > { %5401 = vst.msk [vmem:[%s325_s26] sm:$0xff] %vm4462_vm8, %v5397_v34  ;;  %v5749_v61 = vpop.f32.mrb[53].mxu0 }
 0x64c   : > { %7430 = shalt.err (!%p7427_p3)
}
 0x64d   : > { %s7431_s23 = scalar_lea.hbm %s10223_s17, 128  ;;  %s7435_s26 = scalar_lea.hbm %s10275_s9, 256 }
 0x64e   : > { %p7432_p4 = scmp.ne.s32.totalorder %s10223_s17, %s7431_s23  ;;  %p7436_p9 = scmp.lt.u32.totalorder %s10223_s17, %s10275_s9 }
 0x64f   : > { %p7437_p10 = scmp.lt.u32.totalorder %s7435_s26, %s7431_s23  ;;  %p7439_p12 = scmp.lt.u32.totalorder %s7431_s23, %s10223_s17 }
 0x650   : > { %p7433_p7 = pnand %p7432_p4, %p7586_p5 }
 0x651   : > { %p7438_p11 = por %p7437_p10, %p7436_p9 }
 0x652   : > { %p7434_p8 = pneg %p7433_p7 }
 0x653   : > { %p7440_p13 = por %p7439_p12, %p7438_p11 }
 0x655   : > { %p7441_p0 = pnand %p7440_p13, %p7434_p8 }
 0x657   : > { %7444 = shalt.err (!%p7441_p0)
}
 0x658   : > { %5876 = dma.vmem_to_hbm [thread:$0]  (%p7586_p5), %s10225_s22, 128, %s10223_s17, %s5403_s14  }
 0x659 PF: > { %p5882_p1 = scmp.ge.s32.totalorder %s7479_s12, 2  ;;  %s5428_s21 = sand.u32 1, %s7467_s30  }
 0x65a   : > { %s5429_s13 = scalar_lea.sflag [#allocation5], %s5428_s21 }
 0x65b   : > { %p5879_p2 = pnand %p5882_p1, %p7590_p6 }
 0x65d   : > { %7462 = dma.done.wait (!%p5879_p2), %s5429_s13, 128  }
 0x65e   : > { %7464 = vsyncadd (!%p5879_p2), %s5429_s13, 4294967168  ;;  %p19_p3 = scmp.ge.s32.totalorder %s7573_s15, 4   ;;  %s10434_s30 = smov %s7471_s10 }
 0x65f   : > { %s10435_s10 = smov %s7475_s11  ;;  %s10436_s11 = smov %s7584_s18 }
 0x660   : > { %s10437_s12 = smov %s7573_s15  ;;  %21 = sbr.rel (!%p19_p3) target bundleno = 3 (0x3), region = 91 }
 0x667   :  { %5434 = vsyncpa [#allocation5], 1 }
 0x668   :  { %5436 = vsyncpa [#allocation5 + $0x1], 1 }

</bundles_post_ra>
